<compile_context>
chip_gen: v5e
topology: v5e:2x2
jax: 0.10.0
libtpu: 0.0.40
codegen_flags: <defaults>
</compile_context>

<pallas_src>
import math
import functools

import jax
import jax.numpy as jnp
from jax.experimental import pallas as pl
from jax.experimental.pallas import tpu as pltpu


_VMEM_LIMIT_BYTES = 48 * 1024 * 1024  # < v7x 64 MiB physical, > scoped defaults
_RESIDENT_RHS_BUDGET = 8 * 1024 * 1024  # xw panel kept resident if under this


def _round_up(x, m):
    return ((x + m - 1) // m) * m


# ---------------------------------------------------------------------------
# Kernels
# ---------------------------------------------------------------------------
def _xw_bias_kernel(x_ref, w_ref, b_ref, o_ref):
    """o = x @ W + b for one row tile; W/b are whole (resident) panels."""
    acc = jnp.dot(x_ref[...], w_ref[...], preferred_element_type=jnp.float32)
    o_ref[...] = (acc + b_ref[...].astype(jnp.float32)).astype(o_ref.dtype)


def _g_matmul_resident_kernel(g_ref, xw_ref, o_ref, acc_ref, *, tk):
    """o = G @ xw; xw is a VMEM-resident (Mp, Fp) panel, sliced per k step."""
    k = pl.program_id(1)

    @pl.when(k == 0)
    def _():
        acc_ref[...] = jnp.zeros_like(acc_ref)

    start = pl.multiple_of(k * tk, tk)
    rhs = xw_ref[pl.ds(start, tk), :]
    acc_ref[...] += jnp.dot(g_ref[...], rhs, preferred_element_type=jnp.float32)

    @pl.when(k == pl.num_programs(1) - 1)
    def _():
        o_ref[...] = acc_ref[...].astype(o_ref.dtype)


def _g_matmul_streamed_kernel(g_ref, xw_ref, o_ref, acc_ref):
    """o = G @ xw; xw streamed as (tk, Fp) tiles (fallback for huge graphs)."""
    k = pl.program_id(1)

    @pl.when(k == 0)
    def _():
        acc_ref[...] = jnp.zeros_like(acc_ref)

    acc_ref[...] += jnp.dot(
        g_ref[...], xw_ref[...], preferred_element_type=jnp.float32
    )

    @pl.when(k == pl.num_programs(1) - 1)
    def _():
        o_ref[...] = acc_ref[...].astype(o_ref.dtype)


# ---------------------------------------------------------------------------
# pallas_call wrappers (shapes already padded to tile multiples)
# ---------------------------------------------------------------------------
def _xw_bias(x, w, b, out_dtype, *, tm):
    Mp, Kp = x.shape
    _, Fp = w.shape
    assert Mp % tm == 0
    return pl.pallas_call(
        _xw_bias_kernel,
        out_shape=jax.ShapeDtypeStruct((Mp, Fp), out_dtype),
        grid_spec=pltpu.PrefetchScalarGridSpec(
            num_scalar_prefetch=0,
            grid=(Mp // tm,),
            in_specs=[
                pl.BlockSpec((tm, Kp), lambda i: (i, 0)),
                pl.BlockSpec((Kp, Fp), lambda i: (0, 0)),  # resident W
                pl.BlockSpec((1, Fp), lambda i: (0, 0)),   # resident bias
            ],
            out_specs=pl.BlockSpec((tm, Fp), lambda i: (i, 0)),
        ),
        compiler_params=pltpu.CompilerParams(
            dimension_semantics=("parallel",),
            vmem_limit_bytes=_VMEM_LIMIT_BYTES,
        ),
    )(x, w, b.reshape(1, Fp))


def _g_matmul(G, xw, out_dtype, *, tm, tk, resident_rhs):
    Mp, Mp2 = G.shape
    _, Fp = xw.shape
    assert Mp == Mp2 and Mp % tm == 0 and Mp % tk == 0

    if resident_rhs:
        kernel = functools.partial(_g_matmul_resident_kernel, tk=tk)
        xw_spec = pl.BlockSpec((Mp, Fp), lambda i, k: (0, 0))  # resident panel
    else:
        kernel = _g_matmul_streamed_kernel
        xw_spec = pl.BlockSpec((tk, Fp), lambda i, k: (k, 0))

    return pl.pallas_call(
        kernel,
        out_shape=jax.ShapeDtypeStruct((Mp, Fp), out_dtype),
        grid_spec=pltpu.PrefetchScalarGridSpec(
            num_scalar_prefetch=0,
            grid=(Mp // tm, Mp // tk),
            in_specs=[
                pl.BlockSpec((tm, tk), lambda i, k: (i, k)),
                xw_spec,
            ],
            out_specs=pl.BlockSpec((tm, Fp), lambda i, k: (i, 0)),
            scratch_shapes=[pltpu.VMEM((tm, Fp), jnp.float32)],
        ),
        compiler_params=pltpu.CompilerParams(
            dimension_semantics=("parallel", "arbitrary"),
            vmem_limit_bytes=_VMEM_LIMIT_BYTES,
        ),
    )(G, xw)


# ---------------------------------------------------------------------------
# HGNN_conv forward
# ---------------------------------------------------------------------------
def _pad_cast_2d(a, row_pad, col_pad, dtype):
    if a.dtype != dtype:
        a = a.astype(dtype)
    if row_pad or col_pad:
        a = jnp.pad(a, ((0, row_pad), (0, col_pad)))
    return a


@functools.partial(jax.jit, static_argnames=("compute_dtype",))
def hgnn_conv(x, G, weight, bias, compute_dtype=jnp.bfloat16):
    """Pallas HGNN_conv forward: G @ (x @ weight + bias).

    compute_dtype: MXU operand dtype (bf16 default: native MXU path, halves
    HBM traffic for G).  Accumulation is always f32; the result keeps x.dtype.
    Pass compute_dtype=jnp.float32 for the f32 parity path.
    """
    num_nodes, in_ft = x.shape
    out_ft = weight.shape[1]
    out_dtype = x.dtype
    cdt = jnp.dtype(compute_dtype) if compute_dtype is not None else x.dtype

    # Tile selection: keep per-grid-step MXU work well above the ~0.35us
    # pipeline floor while fitting VMEM on every generation (incl. v7x 64MiB),
    # and keep M//TM >= 2 so v7x megacore has both TensorCores busy.
    if num_nodes >= 4096:
        TM, TK_G = 512, 2048
    elif num_nodes >= 1024:
        TM, TK_G = 512, 1024
    elif num_nodes > 256:
        TM, TK_G = 256, 512
    else:
        TM, TK_G = 256, 256

    # Padded sizes (zero padding; exact, see module docstring).
    Mp = _round_up(num_nodes, math.lcm(TM, TK_G))
    Kp = _round_up(in_ft, 128)
    Fp = _round_up(out_ft, 128)  # lane-dense output last dim

    xp = _pad_cast_2d(x, Mp - num_nodes, Kp - in_ft, cdt)
    wp = _pad_cast_2d(weight, Kp - in_ft, Fp - out_ft, cdt)
    Gp = _pad_cast_2d(G, Mp - num_nodes, Mp - num_nodes, cdt)

    b = bias if bias is not None else jnp.zeros((out_ft,), jnp.float32)
    bp = b.astype(jnp.float32)
    if Fp > out_ft:
        bp = jnp.pad(bp, (0, Fp - out_ft))

    # xw = x @ W + b   (kept in compute dtype as RHS of the second matmul)
    xw = _xw_bias(xp, wp, bp, cdt, tm=TM)

    # out = G @ xw, full output width per step so G is streamed exactly once;
    # keep the xw panel VMEM-resident when it is small enough.
    resident_rhs = (Mp * Fp * jnp.dtype(cdt).itemsize) <= _RESIDENT_RHS_BUDGET
    outp = _g_matmul(Gp, xw, out_dtype, tm=TM, tk=TK_G, resident_rhs=resident_rhs)

    return outp[:num_nodes, :out_ft]


# ---------------------------------------------------------------------------
# Test
# ---------------------------------------------------------------------------
if __name__ == "__main__":
    # Small, deterministic synthetic problem.  in_ft / out_ft deliberately not
    # tile multiples to exercise the padding path.
    num_nodes, in_ft, out_ft = 512, 320, 192
    key = jax.random.PRNGKey(0)
    kx, kg, kw, kb = jax.random.split(key, 4)

    x = jax.random.normal(kx, (num_nodes, in_ft), dtype=jnp.float32)
    G = jax.random.normal(kg, (num_nodes, num_nodes), dtype=jnp.float32)

    # Parameter init mirrors reset_parameters(): uniform(-stdv, stdv),
    # stdv = 1 / sqrt(out_ft).
    stdv = 1.0 / math.sqrt(out_ft)
    weight = jax.random.uniform(
        kw, (in_ft, out_ft), minval=-stdv, maxval=stdv, dtype=jnp.float32
    )
    bias = jax.random.uniform(
        kb, (out_ft,), minval=-stdv, maxval=stdv, dtype=jnp.float32
    )

    # Plain-JAX reference.
    ref = G @ (x @ weight + bias)
    ref_scale = jnp.max(jnp.abs(ref)) + 1e-6

    # Default fast path: bf16 MXU operands, f32 accumulation.
    out_bf16 = jax.block_until_ready(hgnn_conv(x, G, weight, bias))
    assert out_bf16.shape == (num_nodes, out_ft)
    rel_err_bf16 = jnp.max(jnp.abs(out_bf16 - ref)) / ref_scale
    assert rel_err_bf16 < 5e-2, f"bf16 path rel err too high: {rel_err_bf16}"

    # f32 parity path (opt-in).
    out_f32 = jax.block_until_ready(
        hgnn_conv(x, G, weight, bias, compute_dtype=jnp.float32)
    )
    assert out_f32.shape == (num_nodes, out_ft)
    rel_err_f32 = jnp.max(jnp.abs(out_f32 - ref)) / ref_scale
    assert rel_err_f32 < 1e-2, f"f32 path rel err too high: {rel_err_f32}"

    print("KERNEL_OK")
</pallas_src>

<mosaic_0001>
module attributes {stable_mosaic.version = 11 : i64} {
  func.func @_xw_bias_kernel(%arg0: i32, %arg1: memref<256x384xbf16, #tpu.memory_space<vmem>>, %arg2: memref<384x256xbf16, #tpu.memory_space<vmem>>, %arg3: memref<1x256xf32, #tpu.memory_space<vmem>>, %arg4: memref<256x256xbf16, #tpu.memory_space<vmem>>) attributes {dimension_semantics = [#tpu.dimension_semantics<parallel>], iteration_bounds = array<i64: 2>, scalar_prefetch = 0 : i64, scratch_operands = 0 : i64, tpu.core_type = #tpu.core_type<tc>, window_params = [{transform_indices = @transform_0, window_bounds = array<i64: 256, 384>}, {pipeline_mode = #tpu.pipeline_mode<synchronous>, transform_indices = @transform_1, window_bounds = array<i64: 384, 256>}, {pipeline_mode = #tpu.pipeline_mode<synchronous>, transform_indices = @transform_2, window_bounds = array<i64: 1, 256>}, {transform_indices = @transform_3, window_bounds = array<i64: 256, 256>}]} {
    %c0 = arith.constant 0 : index
    %c0_0 = arith.constant 0 : index
    %0 = vector.load %arg1[%c0, %c0_0] : memref<256x384xbf16, #tpu.memory_space<vmem>>, vector<256x384xbf16>
    %c0_1 = arith.constant 0 : index
    %c0_2 = arith.constant 0 : index
    %1 = vector.load %arg2[%c0_1, %c0_2] : memref<384x256xbf16, #tpu.memory_space<vmem>>, vector<384x256xbf16>
    %cst = arith.constant dense<0.000000e+00> : vector<256x256xf32>
    %2 = tpu.matmul %0, %1, %cst {dimension_numbers = #tpu.dot_dimension_numbers<[1], [0], [0], [1], [0, 0, 1, 1], [], []>} : vector<256x384xbf16>, vector<384x256xbf16>, vector<256x256xf32> -> vector<256x256xf32>
    %c0_3 = arith.constant 0 : index
    %c0_4 = arith.constant 0 : index
    %3 = vector.load %arg3[%c0_3, %c0_4] : memref<1x256xf32, #tpu.memory_space<vmem>>, vector<1x256xf32>
    %4 = vector.broadcast %3 : vector<1x256xf32> to vector<256x256xf32>
    %5 = arith.addf %2, %4 : vector<256x256xf32>
    %6 = arith.truncf %5 : vector<256x256xf32> to vector<256x256xbf16>
    %c0_5 = arith.constant 0 : index
    %c0_6 = arith.constant 0 : index
    %7 = vector.load %arg4[%c0_5, %c0_6] : memref<256x256xbf16, #tpu.memory_space<vmem>>, vector<256x256xbf16>
    tpu.vector_store %arg4[%c0_5, %c0_6], %6 {strides = array<i32>} : memref<256x256xbf16, #tpu.memory_space<vmem>>, vector<256x256xbf16>,
    return
  }
  func.func @transform_0(%arg0: i32) -> (i32, i32) {
    %c0_i32 = arith.constant 0 : i32
    %c0_i32_0 = arith.constant 0 : i32
    return %arg0, %c0_i32 : i32, i32
  }
  func.func @transform_1(%arg0: i32) -> (i32, i32) {
    %c0_i32 = arith.constant 0 : i32
    %c0_i32_0 = arith.constant 0 : i32
    %c0_i32_1 = arith.constant 0 : i32
    return %c0_i32, %c0_i32_0 : i32, i32
  }
  func.func @transform_2(%arg0: i32) -> (i32, i32) {
    %c0_i32 = arith.constant 0 : i32
    %c0_i32_0 = arith.constant 0 : i32
    %c0_i32_1 = arith.constant 0 : i32
    return %c0_i32, %c0_i32_0 : i32, i32
  }
  func.func @transform_3(%arg0: i32) -> (i32, i32) {
    %c0_i32 = arith.constant 0 : i32
    %c0_i32_0 = arith.constant 0 : i32
    return %arg0, %c0_i32 : i32, i32
  }
}

module attributes {stable_mosaic.version = 11 : i64} {
  func.func @_g_matmul_resident_kernel(%arg0: i32, %arg1: i32, %arg2: memref<256x512xbf16, #tpu.memory_space<vmem>>, %arg3: memref<512x256xbf16, #tpu.memory_space<vmem>>, %arg4: memref<256x256xf32, #tpu.memory_space<vmem>>, %arg5: memref<256x256xf32, #tpu.memory_space<vmem>>) attributes {dimension_semantics = [#tpu.dimension_semantics<parallel>, #tpu.dimension_semantics<arbitrary>], iteration_bounds = array<i64: 2, 1>, scalar_prefetch = 0 : i64, scratch_operands = 1 : i64, tpu.core_type = #tpu.core_type<tc>, window_params = [{transform_indices = @transform_0, window_bounds = array<i64: 256, 512>}, {pipeline_mode = #tpu.pipeline_mode<synchronous>, transform_indices = @transform_1, window_bounds = array<i64: 512, 256>}, {transform_indices = @transform_2, window_bounds = array<i64: 256, 256>}]} {
    %c0_i32 = arith.constant 0 : i32
    %0 = arith.cmpi eq, %arg1, %c0_i32 : i32
    %1 = arith.extui %0 : i1 to i32
    %c0_i32_0 = arith.constant 0 : i32
    %2 = arith.cmpi ne, %1, %c0_i32_0 : i32
    scf.if %2 {
      %cst_9 = arith.constant 0.000000e+00 : f32
      %15 = vector.broadcast %cst_9 : f32 to vector<256x256xf32>
      %c0_10 = arith.constant 0 : index
      %c0_11 = arith.constant 0 : index
      %16 = vector.load %arg5[%c0_10, %c0_11] : memref<256x256xf32, #tpu.memory_space<vmem>>, vector<256x256xf32>
      tpu.vector_store %arg5[%c0_10, %c0_11], %15 {strides = array<i32>} : memref<256x256xf32, #tpu.memory_space<vmem>>, vector<256x256xf32>,
    } else {
    }
    %c512_i32 = arith.constant 512 : i32
    %3 = arith.muli %arg1, %c512_i32 : i32
    %4 = tpu.assume_multiple %3, 512 : i32
    %5 = arith.index_cast %4 : i32 to index
    %c0 = arith.constant 0 : index
    %6 = vector.load %arg3[%5, %c0] : memref<512x256xbf16, #tpu.memory_space<vmem>>, vector<512x256xbf16>
    %c0_1 = arith.constant 0 : index
    %c0_2 = arith.constant 0 : index
    %7 = vector.load %arg5[%c0_1, %c0_2] : memref<256x256xf32, #tpu.memory_space<vmem>>, vector<256x256xf32>
    %c0_3 = arith.constant 0 : index
    %c0_4 = arith.constant 0 : index
    %8 = vector.load %arg2[%c0_3, %c0_4] : memref<256x512xbf16, #tpu.memory_space<vmem>>, vector<256x512xbf16>
    %cst = arith.constant dense<0.000000e+00> : vector<256x256xf32>
    %9 = tpu.matmul %8, %6, %cst {dimension_numbers = #tpu.dot_dimension_numbers<[1], [0], [0], [1], [0, 0, 1, 1], [], []>} : vector<256x512xbf16>, vector<512x256xbf16>, vector<256x256xf32> -> vector<256x256xf32>
    %10 = arith.addf %7, %9 : vector<256x256xf32>
    %c0_5 = arith.constant 0 : index
    %c0_6 = arith.constant 0 : index
    %11 = vector.load %arg5[%c0_5, %c0_6] : memref<256x256xf32, #tpu.memory_space<vmem>>, vector<256x256xf32>
    tpu.vector_store %arg5[%c0_5, %c0_6], %10 {strides = array<i32>} : memref<256x256xf32, #tpu.memory_space<vmem>>, vector<256x256xf32>,
    %c0_i32_7 = arith.constant 0 : i32
    %12 = arith.cmpi eq, %arg1, %c0_i32_7 : i32
    %13 = arith.extui %12 : i1 to i32
    %c0_i32_8 = arith.constant 0 : i32
    %14 = arith.cmpi ne, %13, %c0_i32_8 : i32
    scf.if %14 {
      %c0_9 = arith.constant 0 : index
      %c0_10 = arith.constant 0 : index
      %15 = vector.load %arg5[%c0_9, %c0_10] : memref<256x256xf32, #tpu.memory_space<vmem>>, vector<256x256xf32>
      %c0_11 = arith.constant 0 : index
      %c0_12 = arith.constant 0 : index
      %16 = vector.load %arg4[%c0_11, %c0_12] : memref<256x256xf32, #tpu.memory_space<vmem>>, vector<256x256xf32>
      tpu.vector_store %arg4[%c0_11, %c0_12], %15 {strides = array<i32>} : memref<256x256xf32, #tpu.memory_space<vmem>>, vector<256x256xf32>,
    } else {
    }
    return
  }
  func.func @transform_0(%arg0: i32, %arg1: i32) -> (i32, i32) {
    %c0_i32 = arith.constant 0 : i32
    return %arg0, %arg1 : i32, i32
  }
  func.func @transform_1(%arg0: i32, %arg1: i32) -> (i32, i32) {
    %c0_i32 = arith.constant 0 : i32
    %c0_i32_0 = arith.constant 0 : i32
    %c0_i32_1 = arith.constant 0 : i32
    return %c0_i32, %c0_i32_0 : i32, i32
  }
  func.func @transform_2(%arg0: i32, %arg1: i32) -> (i32, i32) {
    %c0_i32 = arith.constant 0 : i32
    %c0_i32_0 = arith.constant 0 : i32
    return %arg0, %c0_i32 : i32, i32
  }
}

</mosaic_0001>

<bundles_post_ra>
// kernel: hgnn_conv.2
= control target key start
LH: loop header
LB: loop body
LE: loop exit
PB: predicated region body
PF: predicated region fallthrough
CT: control target
= control target key end

     0   :  { %s1995_s12 = smov 0   ;;  %s2737_s0 = inlined_call_operand.vmem [shape: bf16[512,384], index: 0, kind: input, shape index: {}]   ;;  %s2738_s1 = inlined_call_operand.vmem [shape: bf16[384,256], index: 1, kind: input, shape index: {}]   ;;  %s2739_s2 = inlined_call_operand.vmem [shape: f32[1,256], index: 2, kind: input, shape index: {}]   ;;  %s2740_s3 = inlined_call_operand.vmem [shape: bf16[512,256], index: 3, kind: output, shape index: {}]  }
   0x1 LB: > { %s1449_s13 = sadd.s32 4294967295, %s1973_s12   ;;  %p1453_p0 = scmp.ge.s32.totalorder %s1973_s12, 1  ;;  %s1973_s12 = sphi %s1995_s12, %s13_s12  }
   0x2   : > { %p139_p1 = scmp.lt.s32.totalorder %s1973_s12, 3 }
   0x4   : > { %p140_p2 = pnand %p1453_p0, %p139_p1 }
   0x5   : > { %s1454_s21 = sshll.u32 (!%p140_p2), %s1449_s13, 5 }
   0x6   : > { %143 = sbr.rel (%p140_p2) target bundleno = 563 (0x233), region = 32  ;;  %p166_p3 = scmp.lt.s32.totalorder (!%p140_p2), %s1454_s21, 63 }
   0xb   : > { %v1709_v0 = vld [vmem:[%s2738_s1 + $0x70] sm:$0xf]  ;;  %v1909_v1 = vld [vmem:[%s2738_s1 + $0x74] sm:$0xf0]  ;;  %v1701_v5 = vld [vmem:[%s2738_s1 + $0x60] sm:$0xf] }
   0xc   : > { %v1773_v2 = vld [vmem:[%s2738_s1 + $0xf0] sm:$0xf]  ;;  %v1710_v3 = vor.u32 %v1909_v1, %v1709_v0  ;;  %v1925_v4 = vld [vmem:[%s2738_s1 + $0xf4] sm:$0xf0]  ;;  %v1907_v6 = vld [vmem:[%s2738_s1 + $0x64] sm:$0xf0] }
   0xd   : > { %v1774_v7 = vor.u32 %v1925_v4, %v1773_v2  ;;  %v1765_v8 = vld [vmem:[%s2738_s1 + $0xe0] sm:$0xf]  ;;  %v1923_v9 = vld [vmem:[%s2738_s1 + $0xe4] sm:$0xf0]  ;;  %v1702_v10 = vor.u32 %v1907_v6, %v1701_v5  ;;  %v1693_v12 = vld [vmem:[%s2738_s1 + $0x50] sm:$0xf] }
   0xe   : > { %793 = vmatpush.bf16.msra.mxu0 %v1710_v3  ;;  %1942 = vmatpush.bf16.msra.mxu2 %v1710_v3  ;;  %v1766_v11 = vor.u32 %v1923_v9, %v1765_v8  ;;  %v1905_v13 = vld [vmem:[%s2738_s1 + $0x54] sm:$0xf0]  ;;  %v1757_v14 = vld [vmem:[%s2738_s1 + $0xd0] sm:$0xf]  ;;  %v1685_v18 = vld [vmem:[%s2738_s1 + $0x40] sm:$0xf] }
   0xf   : > { %1950 = vmatpush.bf16.msra.mxu3 %v1774_v7  ;;  %882 = vmatpush.bf16.msra.mxu1 %v1774_v7  ;;  %v1921_v15 = vld [vmem:[%s2738_s1 + $0xd4] sm:$0xf0]  ;;  %v1694_v16 = vor.u32 %v1905_v13, %v1693_v12  ;;  %v1903_v19 = vld [vmem:[%s2738_s1 + $0x44] sm:$0xf0]  ;;  %v1749_v20 = vld [vmem:[%s2738_s1 + $0xc0] sm:$0xf] }
  0x10   : > { %v1758_v17 = vor.u32 %v1921_v15, %v1757_v14  ;;  %v1919_v21 = vld [vmem:[%s2738_s1 + $0xc4] sm:$0xf0]  ;;  %v1686_v22 = vor.u32 %v1903_v19, %v1685_v18  ;;  %v1677_v24 = vld [vmem:[%s2738_s1 + $0x30] sm:$0xf]  ;;  %v1901_v25 = vld [vmem:[%s2738_s1 + $0x34] sm:$0xf0] }
  0x11   : > { %v1750_v23 = vor.u32 %v1919_v21, %v1749_v20  ;;  %v1741_v26 = vld [vmem:[%s2738_s1 + $0xb0] sm:$0xf]  ;;  %v1917_v27 = vld [vmem:[%s2738_s1 + $0xb4] sm:$0xf0]  ;;  %v1678_v28 = vor.u32 %v1901_v25, %v1677_v24  ;;  %s2742_s21 = smov (!%p166_p3, %s1454_s21), 63 }
  0x12   : > { %794 = vmatpush.bf16.msra.mxu0 %v1702_v10  ;;  %1943 = vmatpush.bf16.msra.mxu2 %v1702_v10  ;;  %v1742_v29 = vor.u32 %v1917_v27, %v1741_v26  ;;  %v1669_v30 = vld [vmem:[%s2738_s1 + $0x20] sm:$0xf]  ;;  %v1899_v31 = vld [vmem:[%s2738_s1 + $0x24] sm:$0xf0]  ;;  %s1958_s10 = smul.u32 12, %s2742_s21  ;;  %s1845_s17 = sshll.u32 %s2742_s21, 3 }
  0x13   : > { %1951 = vmatpush.bf16.msra.mxu3 %v1766_v11  ;;  %883 = vmatpush.bf16.msra.mxu1 %v1766_v11  ;;  %v1733_v32 = vld [vmem:[%s2738_s1 + $0xa0] sm:$0xf]  ;;  %v1915_v33 = vld [vmem:[%s2738_s1 + $0xa4] sm:$0xf0]  ;;  %v1670_v34 = vor.u32 %v1899_v31, %v1669_v30  ;;  %v1661_v36 = vld [vmem:[%s2738_s1 + $0x10] sm:$0xf]  ;;  %s2612_s20 = scalar_lea.vmem %s2740_s3, %s1845_s17 }
  0x14   : > { %v1734_v35 = vor.u32 %v1915_v33, %v1733_v32  ;;  %v1897_v37 = vld [vmem:[%s2738_s1 + $0x14] sm:$0xf0]  ;;  %v1725_v38 = vld [vmem:[%s2738_s1 + $0x90] sm:$0xf]  ;;  %v1653_v41 = vld [vmem:[%s2738_s1] sm:$0xf]  ;;  %s2098_s26 = scalar_lea.vmem %s2737_s0, %s1958_s10 }
  0x15   : > { %v1913_v39 = vld [vmem:[%s2738_s1 + $0x94] sm:$0xf0]  ;;  %v1662_v40 = vor.u32 %v1897_v37, %v1661_v36  ;;  %v1895_v43 = vld [vmem:[%s2738_s1 + $0x4] sm:$0xf0]  ;;  %v1717_v44 = vld [vmem:[%s2738_s1 + $0x80] sm:$0xf] }
  0x16   : > { %795 = vmatpush.bf16.msra.mxu0 %v1694_v16  ;;  %1944 = vmatpush.bf16.msra.mxu2 %v1694_v16  ;;  %v1726_v42 = vor.u32 %v1913_v39, %v1725_v38  ;;  %v1911_v45 = vld [vmem:[%s2738_s1 + $0x84] sm:$0xf0]  ;;  %v1908_v46 = vld [vmem:[%s2738_s1 + $0x74] sm:$0xf]  ;;  %v1711_v47 = vld [vmem:[%s2738_s1 + $0x78] sm:$0xf0]  ;;  %v1654_v52 = vor.u32 %v1895_v43, %v1653_v41 }
  0x17   : > { %1952 = vmatpush.bf16.msra.mxu3 %v1758_v17  ;;  %884 = vmatpush.bf16.msra.mxu1 %v1758_v17  ;;  %v1837_v48 = vld [vmem:[%s2738_s1 + $0x170] sm:$0xf]  ;;  %v1461_v49 = vld [vmem:[%s2098_s26] sm:$0xf]  ;;  %v1847_v50 = vld [vmem:[%s2098_s26 + $0x8] sm:$0xf0]  ;;  %v1718_v58 = vor.u32 %v1911_v45, %v1717_v44  ;;  %v1714_v62 = vor.u32 %v1908_v46, %v1711_v47 }
  0x18   : > { %v1941_v51 = vld [vmem:[%s2738_s1 + $0x174] sm:$0xf0]  ;;  %v1557_v53 = vld [vmem:[%s2098_s26 + $0xc0] sm:$0xf]  ;;  %v1871_v54 = vld [vmem:[%s2098_s26 + $0xc8] sm:$0xf0]  ;;  %v2144_v3 = vor.u32 %v1847_v50, %v1461_v49 }
  0x19   : > { %v1870_v55 = vld [vmem:[%s2098_s26 + $0xc4] sm:$0xf]  ;;  %v1924_v56 = vld [vmem:[%s2738_s1 + $0xf4] sm:$0xf]  ;;  %v1775_v57 = vld [vmem:[%s2738_s1 + $0xf8] sm:$0xf0]  ;;  %v1838_v63 = vor.u32 %v1941_v51, %v1837_v48  ;;  %v2146_v4 = vor.u32 %v1871_v54, %v1557_v53 }
  0x1a   : > { %796 = vmatpush.bf16.msra.mxu0 %v1686_v22  ;;  %1945 = vmatpush.bf16.msra.mxu2 %v1686_v22  ;;  %v1559_v59 = vld [vmem:[%s2098_s26 + $0xcc] sm:$0xf0]  ;;  %v1846_v60 = vld [vmem:[%s2098_s26 + $0x4] sm:$0xf]  ;;  %v1940_v0 = vld [vmem:[%s2738_s1 + $0x174] sm:$0xf]  ;;  %v1778_v10 = vor.u32 %v1924_v56, %v1775_v57 }
  0x1b   : > { %1953 = vmatpush.bf16.msra.mxu3 %v1750_v23  ;;  %885 = vmatpush.bf16.msra.mxu1 %v1750_v23  ;;  %v1463_v61 = vld [vmem:[%s2098_s26 + $0xc] sm:$0xf0]  ;;  %v1839_v1 = vld [vmem:[%s2738_s1 + $0x178] sm:$0xf0]  ;;  %v1906_v2 = vld [vmem:[%s2738_s1 + $0x64] sm:$0xf]  ;;  %v2157_v8 = vor.u32 %v1870_v55, %v1559_v59 }
  0x1c   : > { %v1703_v5 = vld [vmem:[%s2738_s1 + $0x68] sm:$0xf0]  ;;  %v1829_v6 = vld [vmem:[%s2738_s1 + $0x160] sm:$0xf]  ;;  %v1939_v7 = vld [vmem:[%s2738_s1 + $0x164] sm:$0xf0]  ;;  %v2159_v9 = vor.u32 %v1846_v60, %v1463_v61  ;;  %v1842_v11 = vor.u32 %v1940_v0, %v1839_v1 }
  0x1d   : > { %v1922_v12 = vld [vmem:[%s2738_s1 + $0xe4] sm:$0xf]  ;;  %v1706_v13 = vor.u32 %v1906_v2, %v1703_v5  ;;  %v1830_v14 = vor.u32 %v1939_v7, %v1829_v6  ;;  %v1767_v15 = vld [vmem:[%s2738_s1 + $0xe8] sm:$0xf0]  ;;  %v1904_v18 = vld [vmem:[%s2738_s1 + $0x54] sm:$0xf] }
  0x1e   : > { %797 = vmatpush.bf16.msra.mxu0 %v1678_v28  ;;  %1946 = vmatpush.bf16.msra.mxu2 %v1678_v28  ;;  %v1938_v16 = vld [vmem:[%s2738_s1 + $0x164] sm:$0xf]  ;;  %v1831_v17 = vld [vmem:[%s2738_s1 + $0x168] sm:$0xf0]  ;;  %v1695_v19 = vld [vmem:[%s2738_s1 + $0x58] sm:$0xf0]  ;;  %v1770_v21 = vor.u32 %v1922_v12, %v1767_v15 }
  0x1f   : > { %1954 = vmatpush.bf16.msra.mxu3 %v1742_v29  ;;  %886 = vmatpush.bf16.msra.mxu1 %v1742_v29  ;;  %v1821_v20 = vld [vmem:[%s2738_s1 + $0x150] sm:$0xf]  ;;  %v1834_v22 = vor.u32 %v1938_v16, %v1831_v17  ;;  %v1937_v23 = vld [vmem:[%s2738_s1 + $0x154] sm:$0xf0]  ;;  %v1920_v24 = vld [vmem:[%s2738_s1 + $0xd4] sm:$0xf]  ;;  %v1698_v25 = vor.u32 %v1904_v18, %v1695_v19 }
  0x20   : > { %v1822_v26 = vor.u32 %v1937_v23, %v1821_v20  ;;  %v1759_v27 = vld [vmem:[%s2738_s1 + $0xd8] sm:$0xf0]  ;;  %v1936_v28 = vld [vmem:[%s2738_s1 + $0x154] sm:$0xf]  ;;  %v1473_v32 = vld [vmem:[%s2098_s26 + $0x18] sm:$0xf] }
  0x21   : > { %v1823_v29 = vld [vmem:[%s2738_s1 + $0x158] sm:$0xf0]  ;;  %v1762_v30 = vor.u32 %v1920_v24, %v1759_v27  ;;  %v1850_v33 = vld [vmem:[%s2098_s26 + $0x20] sm:$0xf0]  ;;  %v1571_v37 = vld [vmem:[%s2098_s26 + $0xe4] sm:$0xf0] }
  0x22   : > { %798 = vmatpush.bf16.msra.mxu0 %v1670_v34  ;;  %1947 = vmatpush.bf16.msra.mxu2 %v1670_v34  ;;  %v1826_v31 = vor.u32 %v1936_v28, %v1823_v29  ;;  %v1569_v34 = vld [vmem:[%s2098_s26 + $0xd8] sm:$0xf]  ;;  %v1873_v36 = vld [vmem:[%s2098_s26 + $0xdc] sm:$0xf]  ;;  %v1475_v39 = vld [vmem:[%s2098_s26 + $0x24] sm:$0xf0] }
  0x23   : > { %1955 = vmatpush.bf16.msra.mxu3 %v1734_v35  ;;  %887 = vmatpush.bf16.msra.mxu1 %v1734_v35  ;;  %v1874_v35 = vld [vmem:[%s2098_s26 + $0xe0] sm:$0xf0]  ;;  %v1849_v38 = vld [vmem:[%s2098_s26 + $0x1c] sm:$0xf]  ;;  %v1687_v45 = vld [vmem:[%s2738_s1 + $0x48] sm:$0xf0] }
  0x24   : > { %v2211_v41 = vor.u32 %v1874_v35, %v1569_v34  ;;  %v2215_v43 = vor.u32 %v1849_v38, %v1475_v39  ;;  %v1902_v44 = vld [vmem:[%s2738_s1 + $0x44] sm:$0xf]  ;;  %v1813_v46 = vld [vmem:[%s2738_s1 + $0x140] sm:$0xf]  ;;  %v1935_v48 = vld [vmem:[%s2738_s1 + $0x144] sm:$0xf0] }
  0x25   : > { %v1690_v47 = vor.u32 %v1902_v44, %v1687_v45  ;;  %v1918_v49 = vld [vmem:[%s2738_s1 + $0xc4] sm:$0xf]  ;;  %v1751_v50 = vld [vmem:[%s2738_s1 + $0xc8] sm:$0xf0]  ;;  %v1814_v51 = vor.u32 %v1935_v48, %v1813_v46  ;;  %v1485_v56 = vld [vmem:[%s2098_s26 + $0x30] sm:$0xf] }
  0x26   : > { %799 = vmatpush.bf16.msra.mxu0 %v1662_v40  ;;  %1948 = vmatpush.bf16.msra.mxu2 %v1662_v40  ;;  %v2209_v40 = vor.u32 %v1850_v33, %v1473_v32  ;;  %v1934_v53 = vld [vmem:[%s2738_s1 + $0x144] sm:$0xf]  ;;  %v1815_v54 = vld [vmem:[%s2738_s1 + $0x148] sm:$0xf0]  ;;  %v1853_v57 = vld [vmem:[%s2098_s26 + $0x38] sm:$0xf0] }
  0x27   : > { %1956 = vmatpush.bf16.msra.mxu3 %v1726_v42  ;;  %888 = vmatpush.bf16.msra.mxu1 %v1726_v42  ;;  %v2213_v42 = vor.u32 %v1873_v36, %v1571_v37  ;;  %v1818_v55 = vor.u32 %v1934_v53, %v1815_v54  ;;  %v1877_v59 = vld [vmem:[%s2098_s26 + $0xf8] sm:$0xf0]  ;;  %v1876_v60 = vld [vmem:[%s2098_s26 + $0xf4] sm:$0xf]  ;;  %v1583_v61 = vld [vmem:[%s2098_s26 + $0xfc] sm:$0xf0]  ;;  %v2253_v0 = vor.u32 %v1853_v57, %v1485_v56 }
  0x28   : > { %v2257_v2 = vor.u32 %v1876_v60, %v1583_v61  ;;  %v1900_v6 = vld [vmem:[%s2738_s1 + $0x34] sm:$0xf]  ;;  %v1679_v7 = vld [vmem:[%s2738_s1 + $0x38] sm:$0xf0]  ;;  %v1933_v12 = vld [vmem:[%s2738_s1 + $0x134] sm:$0xf0] }
  0x29   : > { %v1932_v17 = vld [vmem:[%s2738_s1 + $0x134] sm:$0xf]  ;;  %v1807_v18 = vld [vmem:[%s2738_s1 + $0x138] sm:$0xf0]  ;;  %v1497_v20 = vld [vmem:[%s2098_s26 + $0x48] sm:$0xf] }
  0x2a   : > { %800 = vmatpush.bf16.msra.mxu0 %v1654_v52  ;;  %1949 = vmatpush.bf16.msra.mxu2 %v1654_v52  ;;  %v1754_v52 = vor.u32 %v1918_v49, %v1751_v50  ;;  %v1810_v19 = vor.u32 %v1932_v17, %v1807_v18  ;;  %v1880_v23 = vld [vmem:[%s2098_s26 + $0x110] sm:$0xf0]  ;;  %v1879_v24 = vld [vmem:[%s2098_s26 + $0x10c] sm:$0xf]  ;;  %v1499_v27 = vld [vmem:[%s2098_s26 + $0x54] sm:$0xf0] }
  0x2b   : > { %1957 = vmatpush.bf16.msra.mxu3 %v1718_v58  ;;  %889 = vmatpush.bf16.msra.mxu1 %v1718_v58  ;;  %v1581_v58 = vld [vmem:[%s2098_s26 + $0xf0] sm:$0xf]  ;;  %v1898_v32 = vld [vmem:[%s2738_s1 + $0x24] sm:$0xf]  ;;  %v1671_v33 = vld [vmem:[%s2738_s1 + $0x28] sm:$0xf0] }
  0x2c   : > { %v2255_v1 = vor.u32 %v1877_v59, %v1581_v58  ;;  %v1797_v34 = vld [vmem:[%s2738_s1 + $0x120] sm:$0xf]  ;;  %v1674_v35 = vor.u32 %v1898_v32, %v1671_v33  ;;  %v1931_v36 = vld [vmem:[%s2738_s1 + $0x124] sm:$0xf0]  ;;  %v1914_v37 = vld [vmem:[%s2738_s1 + $0xa4] sm:$0xf] }
  0x2d   : > { %801 = vmatmul.bf16.vlgmr.msra.gmra.mxu0 %v2144_v3  ;;  %841 = vmatmul.bf16.vlgmr.msra.gmra.mxu2 %v2146_v4  ;;  %v1735_v38 = vld [vmem:[%s2738_s1 + $0xa8] sm:$0xf0]  ;;  %v1798_v39 = vor.u32 %v1931_v36, %v1797_v34  ;;  %v1930_v45 = vld [vmem:[%s2738_s1 + $0x124] sm:$0xf]  ;;  %v1509_v48 = vld [vmem:[%s2098_s26 + $0x60] sm:$0xf] }
  0x2e   : > { %971 = vmatpush.bf16.msrb.mxu2 %v1838_v63  ;;  %930 = vmatmul.bf16.vlgmr.msra.gmra.mxu3 %v2157_v8  ;;  %v1487_v63 = vld [vmem:[%s2098_s26 + $0x3c] sm:$0xf0]  ;;  %v1738_v44 = vor.u32 %v1914_v37, %v1735_v38  ;;  %v1799_v46 = vld [vmem:[%s2738_s1 + $0x128] sm:$0xf0]  ;;  %v1607_v53 = vld [vmem:[%s2098_s26 + $0x12c] sm:$0xf0] }
  0x2f   : > { %1060 = vmatpush.bf16.msrb.mxu3 %v1714_v62  ;;  %890 = vmatmul.bf16.vlgmr.msra.gmra.mxu1 %v2159_v9  ;;  %v1852_v62 = vld [vmem:[%s2098_s26 + $0x34] sm:$0xf]  ;;  %v1859_v49 = vld [vmem:[%s2098_s26 + $0x68] sm:$0xf0]  ;;  %v1605_v50 = vld [vmem:[%s2098_s26 + $0x120] sm:$0xf] }
  0x30   : > { %1149 = vmatpush.bf16.msrb.mxu0 %v1778_v10  ;;  %1238 = vmatpush.bf16.msrb.mxu1 %v1842_v11  ;;  %v2259_v5 = vor.u32 %v1852_v62, %v1487_v63  ;;  %v1805_v10 = vld [vmem:[%s2738_s1 + $0x130] sm:$0xf]  ;;  %v1682_v11 = vor.u32 %v1900_v6, %v1679_v7  ;;  %v1858_v54 = vld [vmem:[%s2098_s26 + $0x64] sm:$0xf]  ;;  %v2341_v56 = vor.u32 %v1859_v49, %v1509_v48  ;;  %v1896_v60 = vld [vmem:[%s2738_s1 + $0x14] sm:$0xf] }
  0x31   : > { %v1806_v15 = vor.u32 %v1933_v12, %v1805_v10  ;;  %v1663_v61 = vld [vmem:[%s2738_s1 + $0x18] sm:$0xf0]  ;;  %v1789_v62 = vld [vmem:[%s2738_s1 + $0x110] sm:$0xf]  ;;  %v1929_v6 = vld [vmem:[%s2738_s1 + $0x114] sm:$0xf0] }
  0x32   : > { %972 = vmatpush.bf16.msrb.mxu2 %v1830_v14  ;;  %v1743_v14 = vld [vmem:[%s2738_s1 + $0xb8] sm:$0xf0]  ;;  %v1666_v63 = vor.u32 %v1896_v60, %v1663_v61  ;;  %v1912_v7 = vld [vmem:[%s2738_s1 + $0x94] sm:$0xf]  ;;  %v1862_v17 = vld [vmem:[%s2098_s26 + $0x80] sm:$0xf0] }
  0x33   : > { %1061 = vmatpush.bf16.msrb.mxu3 %v1706_v13  ;;  %v1916_v13 = vld [vmem:[%s2738_s1 + $0xb4] sm:$0xf]  ;;  %v1727_v10 = vld [vmem:[%s2738_s1 + $0x98] sm:$0xf0]  ;;  %v1617_v18 = vld [vmem:[%s2098_s26 + $0x138] sm:$0xf] }
  0x34   : > { %1150 = vmatpush.bf16.msrb.mxu0 %v1770_v21  ;;  %1239 = vmatpush.bf16.msrb.mxu1 %v1834_v22  ;;  %v1746_v16 = vor.u32 %v1916_v13, %v1743_v14  ;;  %v1856_v21 = vld [vmem:[%s2098_s26 + $0x50] sm:$0xf0]  ;;  %v1593_v22 = vld [vmem:[%s2098_s26 + $0x108] sm:$0xf]  ;;  %v1730_v12 = vor.u32 %v1912_v7, %v1727_v10  ;;  %v1791_v14 = vld [vmem:[%s2738_s1 + $0x118] sm:$0xf0] }
  0x35   : > { %v2297_v28 = vor.u32 %v1856_v21, %v1497_v20  ;;  %v2299_v29 = vor.u32 %v1880_v23, %v1593_v22  ;;  %v1928_v13 = vld [vmem:[%s2738_s1 + $0x114] sm:$0xf]  ;;  %v1885_v20 = vld [vmem:[%s2098_s26 + $0x13c] sm:$0xf]  ;;  %v1619_v21 = vld [vmem:[%s2098_s26 + $0x144] sm:$0xf0] }
  0x36   : > { %973 = vmatpush.bf16.msrb.mxu2 %v1822_v26  ;;  %v1855_v26 = vld [vmem:[%s2098_s26 + $0x4c] sm:$0xf]  ;;  %v1861_v22 = vld [vmem:[%s2098_s26 + $0x7c] sm:$0xf]  ;;  %v1523_v23 = vld [vmem:[%s2098_s26 + $0x84] sm:$0xf0] }
  0x37   : > { %1062 = vmatpush.bf16.msrb.mxu3 %v1698_v25  ;;  %v1595_v25 = vld [vmem:[%s2098_s26 + $0x114] sm:$0xf0]  ;;  %v1894_v32 = vld [vmem:[%s2738_s1 + $0x4] sm:$0xf]  ;;  %v1655_v33 = vld [vmem:[%s2738_s1 + $0x8] sm:$0xf0] }
  0x38   : > { %1151 = vmatpush.bf16.msrb.mxu0 %v1762_v30  ;;  %1240 = vmatpush.bf16.msrb.mxu1 %v1826_v31  ;;  %v2301_v30 = vor.u32 %v1879_v24, %v1595_v25  ;;  %v2303_v31 = vor.u32 %v1855_v26, %v1499_v27  ;;  %v2389_v26 = vor.u32 %v1885_v20, %v1619_v21  ;;  %v1781_v34 = vld [vmem:[%s2738_s1 + $0x100] sm:$0xf]  ;;  %v1927_v36 = vld [vmem:[%s2738_s1 + $0x104] sm:$0xf0]  ;;  %v1910_v37 = vld [vmem:[%s2738_s1 + $0x84] sm:$0xf] }
  0x39   : > { %v2391_v27 = vor.u32 %v1861_v22, %v1523_v23  ;;  %v1719_v38 = vld [vmem:[%s2738_s1 + $0x88] sm:$0xf0]  ;;  %v1533_v48 = vld [vmem:[%s2098_s26 + $0x90] sm:$0xf]  ;;  %v1865_v49 = vld [vmem:[%s2098_s26 + $0x98] sm:$0xf0] }
  0x3a   : > { %974 = vmatpush.bf16.msrb.mxu2 %v1814_v51  ;;  %v1883_v51 = vld [vmem:[%s2098_s26 + $0x128] sm:$0xf0]  ;;  %v2429_v60 = vor.u32 %v1865_v49, %v1533_v48  ;;  %v1868_v7 = vld [vmem:[%s2098_s26 + $0xb0] sm:$0xf0]  ;;  %v1641_v10 = vld [vmem:[%s2098_s26 + $0x168] sm:$0xf] }
  0x3b   : > { %1063 = vmatpush.bf16.msrb.mxu3 %v1690_v47  ;;  %v1802_v47 = vor.u32 %v1930_v45, %v1799_v46  ;;  %v2343_v57 = vor.u32 %v1883_v51, %v1605_v50  ;;  %v1926_v45 = vld [vmem:[%s2738_s1 + $0x104] sm:$0xf]  ;;  %v1783_v46 = vld [vmem:[%s2738_s1 + $0x108] sm:$0xf0]  ;;  %v1629_v50 = vld [vmem:[%s2098_s26 + $0x150] sm:$0xf] }
  0x3c   : > { %1152 = vmatpush.bf16.msrb.mxu0 %v1754_v52  ;;  %1241 = vmatpush.bf16.msrb.mxu1 %v1818_v55  ;;  %v1882_v52 = vld [vmem:[%s2098_s26 + $0x124] sm:$0xf]  ;;  %v1511_v55 = vld [vmem:[%s2098_s26 + $0x6c] sm:$0xf0]  ;;  %v1889_v51 = vld [vmem:[%s2098_s26 + $0x158] sm:$0xf0] }
  0x3d   : > { %806 = vmatmul.bf16.gmra.mxu0 %v2209_v40  ;;  %846 = vmatmul.bf16.gmra.mxu2 %v2211_v41  ;;  %v2345_v58 = vor.u32 %v1882_v52, %v1607_v53  ;;  %v2347_v59 = vor.u32 %v1858_v54, %v1511_v55  ;;  %v1888_v52 = vld [vmem:[%s2098_s26 + $0x154] sm:$0xf]  ;;  %v1631_v53 = vld [vmem:[%s2098_s26 + $0x15c] sm:$0xf0]  ;;  %v2431_v61 = vor.u32 %v1889_v51, %v1629_v50  ;;  %v1469_v21 = vld [vmem:[%s2098_s26 + $0x8] sm:$0xf] }
  0x3e   : > { %935 = vmatmul.bf16.gmra.mxu3 %v2213_v42  ;;  %975 = vmatpush.bf16.msrb.mxu2 %v1806_v15  ;;  %v1794_v15 = vor.u32 %v1928_v13, %v1791_v14  ;;  %v1864_v54 = vld [vmem:[%s2098_s26 + $0x94] sm:$0xf]  ;;  %v1535_v55 = vld [vmem:[%s2098_s26 + $0x9c] sm:$0xf0]  ;;  %v1643_v13 = vld [vmem:[%s2098_s26 + $0x174] sm:$0xf0] }
  0x3f   : > { %895 = vmatmul.bf16.gmra.mxu1 %v2215_v43  ;;  %1064 = vmatpush.bf16.msrb.mxu3 %v1682_v11  ;;  %v1790_v11 = vor.u32 %v1929_v6, %v1789_v62  ;;  %v2433_v62 = vor.u32 %v1888_v52, %v1631_v53  ;;  %v1545_v6 = vld [vmem:[%s2098_s26 + $0xa8] sm:$0xf]  ;;  %v1867_v14 = vld [vmem:[%s2098_s26 + $0xac] sm:$0xf]  ;;  %v2464_v20 = vld [vmem:[%s2739_s2] sm:$0x3] }
  0x40   : > { %1153 = vmatpush.bf16.msrb.mxu0 %v1746_v16  ;;  %1242 = vmatpush.bf16.msrb.mxu1 %v1810_v19  ;;  %v1521_v16 = vld [vmem:[%s2098_s26 + $0x78] sm:$0xf]  ;;  %v1886_v19 = vld [vmem:[%s2098_s26 + $0x140] sm:$0xf0]  ;;  %v1848_v22 = vld [vmem:[%s2098_s26 + $0x10] sm:$0xf0] }
  0x41   : > { %v2385_v24 = vor.u32 %v1862_v17, %v1521_v16  ;;  %v2387_v25 = vor.u32 %v1886_v19, %v1617_v18  ;;  %v2449_v16 = vor.u32 %v1868_v7, %v1545_v6  ;;  %v2469_v23 = vperm.slane %v2464_v20, 0  ;;  %v1481_v49 = vld [vmem:[%s2098_s26 + $0x20] sm:$0xf]  ;;  %v1851_v50 = vld [vmem:[%s2098_s26 + $0x28] sm:$0xf0] }
  0x42   : > { %976 = vmatpush.bf16.msrb.mxu2 %v1798_v39  ;;  %v1782_v39 = vor.u32 %v1927_v36, %v1781_v34 }
  0x43   : > { %1065 = vmatpush.bf16.msrb.mxu3 %v1674_v35  ;;  %v1658_v35 = vor.u32 %v1894_v32, %v1655_v33  ;;  %v1470_v32 = vor.u32 %v1848_v22, %v1469_v21 }
  0x44   : > { %1154 = vmatpush.bf16.msrb.mxu0 %v1738_v44  ;;  %1243 = vmatpush.bf16.msrb.mxu1 %v1802_v47  ;;  %v1722_v44 = vor.u32 %v1910_v37, %v1719_v38  ;;  %v1786_v47 = vor.u32 %v1926_v45, %v1783_v46 }
  0x46   : > { %977 = vmatpush.bf16.msrb.mxu2 %v1790_v11  ;;  %v1892_v11 = vld [vmem:[%s2098_s26 + $0x170] sm:$0xf0] }
  0x47   : > { %1066 = vmatpush.bf16.msrb.mxu3 %v1666_v63  ;;  %v2435_v63 = vor.u32 %v1864_v54, %v1535_v55  ;;  %v2451_v17 = vor.u32 %v1892_v11, %v1641_v10 }
  0x48   : > { %1155 = vmatpush.bf16.msrb.mxu0 %v1730_v12  ;;  %1244 = vmatpush.bf16.msrb.mxu1 %v1794_v15  ;;  %v1891_v12 = vld [vmem:[%s2098_s26 + $0x16c] sm:$0xf]  ;;  %v1547_v15 = vld [vmem:[%s2098_s26 + $0xb4] sm:$0xf0] }
  0x49   : > { %v2453_v18 = vor.u32 %v1891_v12, %v1643_v13  ;;  %v2455_v19 = vor.u32 %v1867_v14, %v1547_v15 }
  0x4a   : > { %978 = vmatpush.bf16.msrb.mxu2 %v1782_v39 }
  0x4b   : > { %1067 = vmatpush.bf16.msrb.mxu3 %v1658_v35 }
  0x4c   : > { %1156 = vmatpush.bf16.msrb.mxu0 %v1722_v44  ;;  %1245 = vmatpush.bf16.msrb.mxu1 %v1786_v47 }
  0x4d   : > { %811 = vmatmul.bf16.gmra.mxu0 %v2253_v0  ;;  %851 = vmatmul.bf16.gmra.mxu2 %v2255_v1 }
  0x4e   : > { %940 = vmatmul.bf16.gmra.mxu3 %v2257_v2 }
  0x4f   : > { %900 = vmatmul.bf16.gmra.mxu1 %v2259_v5 }
  0x5d   : > { %816 = vmatmul.bf16.gmra.mxu0 %v2297_v28  ;;  %856 = vmatmul.bf16.gmra.mxu2 %v2299_v29 }
  0x5e   : > { %945 = vmatmul.bf16.gmra.mxu3 %v2301_v30 }
  0x5f   : > { %905 = vmatmul.bf16.gmra.mxu1 %v2303_v31 }
  0x6d   : > { %821 = vmatmul.bf16.gmra.mxu0 %v2341_v56  ;;  %861 = vmatmul.bf16.gmra.mxu2 %v2343_v57 }
  0x6e   : > { %950 = vmatmul.bf16.gmra.mxu3 %v2345_v58 }
  0x6f   : > { %910 = vmatmul.bf16.gmra.mxu1 %v2347_v59 }
  0x7d   : > { %826 = vmatmul.bf16.gmra.mxu0 %v2385_v24  ;;  %866 = vmatmul.bf16.gmra.mxu2 %v2387_v25 }
  0x7e   : > { %955 = vmatmul.bf16.gmra.mxu3 %v2389_v26 }
  0x7f   : > { %915 = vmatmul.bf16.gmra.mxu1 %v2391_v27 }
  0x8d   : > { %831 = vmatmul.bf16.gmra.mxu0 %v2429_v60  ;;  %871 = vmatmul.bf16.gmra.mxu2 %v2431_v61 }
  0x8e   : > { %960 = vmatmul.bf16.gmra.mxu3 %v2433_v62 }
  0x8f   : > { %920 = vmatmul.bf16.gmra.mxu1 %v2435_v63 }
  0x9d   : > { %836 = vmatmul.bf16.gmra.mxu0 %v2449_v16  ;;  %876 = vmatmul.bf16.gmra.mxu2 %v2451_v17 }
  0x9e   : > { %965 = vmatmul.bf16.gmra.mxu3 %v2453_v18 }
  0x9f   : > { %925 = vmatmul.bf16.gmra.mxu1 %v2455_v19 }
  0xaa   : > { %v802_v33 = vpop.f32.mrf.mxu0 }
  0xab   : > { %v803_v34 = vadd.f32 %v802_v33, %v2469_v23  ;;  %v1854_v33 = vld [vmem:[%s2098_s26 + $0x40] sm:$0xf0] }
  0xac   : > { %v891_v35 = vpop.f32.mrf.mxu1 }
  0xad   : > { %v2472_v36 = vadd.f32 %v891_v35, %v803_v34  ;;  %979 = vmatmul.bf16.vlgmr.msrb.gmra.mxu2 %v1470_v32  ;;  %1157 = vmatmul.bf16.vlgmr.msrb.gmra.mxu0 %v2159_v9 }
  0xae   : > { %1068 = vmatmul.bf16.vlgmr.msrb.gmra.mxu3 %v2144_v3  ;;  %v1482_v3 = vor.u32 %v1851_v50, %v1481_v49 }
  0xaf   : > { %1246 = vmatmul.bf16.vlgmr.msrb.gmra.mxu1 %v1470_v32  ;;  %v1493_v32 = vld [vmem:[%s2098_s26 + $0x38] sm:$0xf] }
  0xb0   : > { %v842_v37 = vpop.f32.mrf.mxu2 }
  0xb1   : > { %v843_v38 = vadd.f32 %v842_v37, %v2469_v23  ;;  %v931_v39 = vpop.f32.mrf.mxu3 }
  0xb2   : > { %v804_v44 = vpop.f32.mrf.mxu0 }
  0xb3   : > { %v2477_v45 = vadd.f32 %v931_v39, %v843_v38  ;;  %v805_v46 = vadd.f32 %v804_v44, %v2469_v23 }
  0xb4   : > { %v893_v47 = vpop.f32.mrf.mxu1 }
  0xb5   : > { %v2480_v48 = vadd.f32 %v893_v47, %v805_v46 }
  0xb8   : > { %v844_v51 = vpop.f32.mrf.mxu2 }
  0xb9   : > { %v845_v9 = vadd.f32 %v844_v51, %v2469_v23  ;;  %v933_v52 = vpop.f32.mrf.mxu3 }
  0xba   : > { %v807_v53 = vpop.f32.mrf.mxu0 }
  0xbb   : > { %v2485_v54 = vadd.f32 %v933_v52, %v845_v9  ;;  %v808_v55 = vadd.f32 %v807_v53, %v2469_v23 }
  0xbc   : > { %v896_v6 = vpop.f32.mrf.mxu1 }
  0xbd   : > { %v2488_v7 = vadd.f32 %v896_v6, %v808_v55  ;;  %984 = vmatmul.bf16.gmra.mxu2 %v1482_v3  ;;  %1162 = vmatmul.bf16.gmra.mxu0 %v2215_v43  ;;  %v1505_v55 = vld [vmem:[%s2098_s26 + $0x50] sm:$0xf]  ;;  %v1857_v6 = vld [vmem:[%s2098_s26 + $0x58] sm:$0xf0] }
  0xbe   : > { %1073 = vmatmul.bf16.gmra.mxu3 %v2209_v40  ;;  %v1494_v40 = vor.u32 %v1854_v33, %v1493_v32 }
  0xbf   : > { %1251 = vmatmul.bf16.gmra.mxu1 %v1482_v3 }
  0xc0   : > { %v847_v10 = vpop.f32.mrf.mxu2 }
  0xc1   : > { %v848_v11 = vadd.f32 %v847_v10, %v2469_v23  ;;  %v936_v12 = vpop.f32.mrf.mxu3 }
  0xc2   : > { %v809_v13 = vpop.f32.mrf.mxu0 }
  0xc3   : > { %v2493_v14 = vadd.f32 %v936_v12, %v848_v11  ;;  %v810_v15 = vadd.f32 %v809_v13, %v2469_v23 }
  0xc4   : > { %v898_v21 = vpop.f32.mrf.mxu1 }
  0xc5   : > { %v2496_v22 = vadd.f32 %v898_v21, %v810_v15 }
  0xc8   : > { %v849_v34 = vpop.f32.mrf.mxu2 }
  0xc9   : > { %v850_v43 = vadd.f32 %v849_v34, %v2469_v23  ;;  %v938_v35 = vpop.f32.mrf.mxu3 }
  0xca   : > { %v812_v37 = vpop.f32.mrf.mxu0 }
  0xcb   : > { %v2501_v38 = vadd.f32 %v938_v35, %v850_v43  ;;  %v813_v39 = vadd.f32 %v812_v37, %v2469_v23 }
  0xcc   : > { %v901_v44 = vpop.f32.mrf.mxu1 }
  0xcd   : > { %v2504_v46 = vadd.f32 %v901_v44, %v813_v39  ;;  %989 = vmatmul.bf16.gmra.mxu2 %v1494_v40  ;;  %1167 = vmatmul.bf16.gmra.mxu0 %v2259_v5 }
  0xce   : > { %1078 = vmatmul.bf16.gmra.mxu3 %v2253_v0  ;;  %v1506_v0 = vor.u32 %v1857_v6, %v1505_v55 }
  0xcf   : > { %1256 = vmatmul.bf16.gmra.mxu1 %v1494_v40 }
  0xd0   : > { %v852_v47 = vpop.f32.mrf.mxu2 }
  0xd1   : > { %v853_v49 = vadd.f32 %v852_v47, %v2469_v23  ;;  %v941_v50 = vpop.f32.mrf.mxu3  ;;  %v1517_v47 = vld [vmem:[%s2098_s26 + $0x68] sm:$0xf] }
  0xd2   : > { %v814_v51 = vpop.f32.mrf.mxu0 }
  0xd3   : > { %v2509_v9 = vadd.f32 %v941_v50, %v853_v49  ;;  %v815_v52 = vadd.f32 %v814_v51, %v2469_v23  ;;  %v1860_v49 = vld [vmem:[%s2098_s26 + $0x70] sm:$0xf0] }
  0xd4   : > { %v903_v3 = vpop.f32.mrf.mxu1 }
  0xd5   : > { %v2512_v53 = vadd.f32 %v903_v3, %v815_v52 }
  0xd8   : > { %v854_v10 = vpop.f32.mrf.mxu2 }
  0xd9   : > { %v855_v5 = vadd.f32 %v854_v10, %v2469_v23  ;;  %v943_v11 = vpop.f32.mrf.mxu3 }
  0xda   : > { %v817_v12 = vpop.f32.mrf.mxu0 }
  0xdb   : > { %v2517_v13 = vadd.f32 %v943_v11, %v855_v5  ;;  %v818_v15 = vadd.f32 %v817_v12, %v2469_v23 }
  0xdc   : > { %v906_v21 = vpop.f32.mrf.mxu1 }
  0xdd   : > { %v2520_v32 = vadd.f32 %v906_v21, %v818_v15  ;;  %994 = vmatmul.bf16.gmra.mxu2 %v1506_v0  ;;  %1172 = vmatmul.bf16.gmra.mxu0 %v2303_v31 }
  0xde   : > { %1083 = vmatmul.bf16.gmra.mxu3 %v2297_v28  ;;  %v1518_v28 = vor.u32 %v1860_v49, %v1517_v47 }
  0xdf   : > { %1261 = vmatmul.bf16.gmra.mxu1 %v1506_v0 }
  0xe0   : > { %v857_v33 = vpop.f32.mrf.mxu2 }
  0xe1   : > { %v858_v34 = vadd.f32 %v857_v33, %v2469_v23  ;;  %v946_v43 = vpop.f32.mrf.mxu3 }
  0xe2   : > { %v819_v35 = vpop.f32.mrf.mxu0 }
  0xe3   : > { %v2525_v40 = vadd.f32 %v946_v43, %v858_v34  ;;  %v820_v37 = vadd.f32 %v819_v35, %v2469_v23  ;;  %v1529_v43 = vld [vmem:[%s2098_s26 + $0x80] sm:$0xf]  ;;  %v1863_v35 = vld [vmem:[%s2098_s26 + $0x88] sm:$0xf0] }
  0xe4   : > { %v908_v39 = vpop.f32.mrf.mxu1 }
  0xe5   : > { %v2528_v44 = vadd.f32 %v908_v39, %v820_v37 }
  0xe8   : > { %v859_v50 = vpop.f32.mrf.mxu2 }
  0xe9   : > { %v860_v31 = vadd.f32 %v859_v50, %v2469_v23  ;;  %v948_v51 = vpop.f32.mrf.mxu3 }
  0xea   : > { %v822_v52 = vpop.f32.mrf.mxu0 }
  0xeb   : > { %v2533_v3 = vadd.f32 %v948_v51, %v860_v31  ;;  %v823_v55 = vadd.f32 %v822_v52, %v2469_v23 }
  0xec   : > { %v911_v6 = vpop.f32.mrf.mxu1 }
  0xed   : > { %v2536_v10 = vadd.f32 %v911_v6, %v823_v55  ;;  %999 = vmatmul.bf16.gmra.mxu2 %v1518_v28  ;;  %1177 = vmatmul.bf16.gmra.mxu0 %v2347_v59 }
  0xee   : > { %1088 = vmatmul.bf16.gmra.mxu3 %v2341_v56  ;;  %v1530_v56 = vor.u32 %v1863_v35, %v1529_v43 }
  0xef   : > { %1266 = vmatmul.bf16.gmra.mxu1 %v1518_v28 }
  0xf0   : > { %v862_v5 = vpop.f32.mrf.mxu2 }
  0xf1   : > { %v863_v11 = vadd.f32 %v862_v5, %v2469_v23  ;;  %v951_v0 = vpop.f32.mrf.mxu3 }
  0xf2   : > { %v824_v12 = vpop.f32.mrf.mxu0 }
  0xf3   : > { %v2541_v15 = vadd.f32 %v951_v0, %v863_v11  ;;  %v825_v21 = vadd.f32 %v824_v12, %v2469_v23 }
  0xf4   : > { %v913_v33 = vpop.f32.mrf.mxu1 }
  0xf5   : > { %v2544_v34 = vadd.f32 %v913_v33, %v825_v21  ;;  %v1541_v21 = vld [vmem:[%s2098_s26 + $0x98] sm:$0xf]  ;;  %v1866_v33 = vld [vmem:[%s2098_s26 + $0xa0] sm:$0xf0] }
  0xf8   : > { %v864_v37 = vpop.f32.mrf.mxu2 }
  0xf9   : > { %v865_v59 = vadd.f32 %v864_v37, %v2469_v23  ;;  %v953_v39 = vpop.f32.mrf.mxu3 }
  0xfa   : > { %v827_v47 = vpop.f32.mrf.mxu0 }
  0xfb   : > { %v2549_v49 = vadd.f32 %v953_v39, %v865_v59  ;;  %v828_v50 = vadd.f32 %v827_v47, %v2469_v23 }
  0xfc   : > { %v916_v31 = vpop.f32.mrf.mxu1 }
  0xfd   : > { %v2552_v51 = vadd.f32 %v916_v31, %v828_v50  ;;  %1004 = vmatmul.bf16.gmra.mxu2 %v1530_v56  ;;  %1182 = vmatmul.bf16.gmra.mxu0 %v2391_v27 }
  0xfe   : > { %1093 = vmatmul.bf16.gmra.mxu3 %v2385_v24  ;;  %v1542_v24 = vor.u32 %v1866_v33, %v1541_v21  ;;  %v1553_v21 = vld [vmem:[%s2098_s26 + $0xb0] sm:$0xf]  ;;  %v1869_v33 = vld [vmem:[%s2098_s26 + $0xb8] sm:$0xf0] }
  0xff   : > { %1271 = vmatmul.bf16.gmra.mxu1 %v1530_v56 }
 0x100   : > { %v867_v28 = vpop.f32.mrf.mxu2 }
 0x101   : > { %v868_v52 = vadd.f32 %v867_v28, %v2469_v23  ;;  %v956_v55 = vpop.f32.mrf.mxu3 }
 0x102   : > { %v829_v6 = vpop.f32.mrf.mxu0 }
 0x103   : > { %v2557_v5 = vadd.f32 %v956_v55, %v868_v52  ;;  %v830_v11 = vadd.f32 %v829_v6, %v2469_v23 }
 0x104   : > { %v918_v0 = vpop.f32.mrf.mxu1 }
 0x105   : > { %v2560_v12 = vadd.f32 %v918_v0, %v830_v11 }
 0x108   : > { %v869_v43 = vpop.f32.mrf.mxu2 }
 0x109   : > { %v870_v27 = vadd.f32 %v869_v43, %v2469_v23  ;;  %v958_v35 = vpop.f32.mrf.mxu3 }
 0x10a   : > { %v832_v37 = vpop.f32.mrf.mxu0 }
 0x10b   : > { %v2565_v59 = vadd.f32 %v958_v35, %v870_v27  ;;  %v833_v39 = vadd.f32 %v832_v37, %v2469_v23 }
 0x10c   : > { %v921_v56 = vpop.f32.mrf.mxu1 }
 0x10d   : > { %v2568_v47 = vadd.f32 %v921_v56, %v833_v39  ;;  %1009 = vmatmul.bf16.gmra.mxu2 %v1542_v24  ;;  %1187 = vmatmul.bf16.gmra.mxu0 %v2435_v63 }
 0x10e   : > { %1098 = vmatmul.bf16.gmra.mxu3 %v2429_v60  ;;  %v1554_v60 = vor.u32 %v1869_v33, %v1553_v21 }
 0x10f   : > { %1276 = vmatmul.bf16.gmra.mxu1 %v1542_v24 }
 0x110   : > { %v872_v50 = vpop.f32.mrf.mxu2 }
 0x111   : > { %v873_v31 = vadd.f32 %v872_v50, %v2469_v23  ;;  %v961_v28 = vpop.f32.mrf.mxu3 }
 0x112   : > { %v834_v52 = vpop.f32.mrf.mxu0 }
 0x113   : > { %v2573_v55 = vadd.f32 %v961_v28, %v873_v31  ;;  %v835_v6 = vadd.f32 %v834_v52, %v2469_v23 }
 0x114   : > { %v923_v11 = vpop.f32.mrf.mxu1 }
 0x115   : > { %v2576_v0 = vadd.f32 %v923_v11, %v835_v6 }
 0x118   : > { %v874_v43 = vpop.f32.mrf.mxu2 }
 0x119   : > { %v875_v63 = vadd.f32 %v874_v43, %v2469_v23  ;;  %v963_v27 = vpop.f32.mrf.mxu3  ;;  %v1565_v43 = vld [vmem:[%s2098_s26 + $0xc8] sm:$0xf] }
 0x11a   : > { %v837_v35 = vpop.f32.mrf.mxu0 }
 0x11b   : > { %v2581_v24 = vadd.f32 %v963_v27, %v875_v63  ;;  %v838_v37 = vadd.f32 %v837_v35, %v2469_v23  ;;  %v1872_v63 = vld [vmem:[%s2098_s26 + $0xd0] sm:$0xf0] }
 0x11c   : > { %v926_v39 = vpop.f32.mrf.mxu1 }
 0x11d   : > { %v2584_v56 = vadd.f32 %v926_v39, %v838_v37  ;;  %1014 = vmatmul.bf16.gmra.mxu2 %v1554_v60  ;;  %1192 = vmatmul.bf16.gmra.mxu0 %v2455_v19 }
 0x11e   : > { %1103 = vmatmul.bf16.gmra.mxu3 %v2449_v16 }
 0x11f   : > { %1281 = vmatmul.bf16.gmra.mxu1 %v1554_v60  ;;  %v1566_v60 = vor.u32 %v1872_v63, %v1565_v43 }
 0x120   : > { %v877_v50 = vpop.f32.mrf.mxu2 }
 0x121   : > { %v878_v31 = vadd.f32 %v877_v50, %v2469_v23  ;;  %v966_v28 = vpop.f32.mrf.mxu3  ;;  %v2602_v50 = vperm.slane %v2464_v20, 1 }
 0x122   : > { %v839_v52 = vpop.f32.mrf.mxu0 }
 0x123   : > { %v2589_v6 = vadd.f32 %v966_v28, %v878_v31  ;;  %v840_v11 = vadd.f32 %v839_v52, %v2469_v23 }
 0x124   : > { %v928_v21 = vpop.f32.mrf.mxu1 }
 0x125   : > { %v2592_v33 = vadd.f32 %v928_v21, %v840_v11 }
 0x128   : > { %v879_v27 = vpop.f32.mrf.mxu2 }
 0x129   : > { %v880_v19 = vadd.f32 %v879_v27, %v2469_v23  ;;  %v968_v16 = vpop.f32.mrf.mxu3  ;;  %v1577_v27 = vld [vmem:[%s2098_s26 + $0xe0] sm:$0xf] }
 0x12a   : > { %v1158_v35 = vpop.f32.mrf.mxu0 }
 0x12b   : > { %v2597_v37 = vadd.f32 %v968_v16, %v880_v19  ;;  %v1875_v19 = vld [vmem:[%s2098_s26 + $0xe8] sm:$0xf0] }
 0x12c   : > { %v1247_v39 = vpop.f32.mrf.mxu1  ;;  %v1578_v16 = vor.u32 %v1875_v19, %v1577_v27 }
 0x12d   : > { %1019 = vmatmul.bf16.gmra.mxu2 %v1566_v60  ;;  %1197 = vmatmul.bf16.gmra.mxu0 %v2157_v8 }
 0x12e   : > { %1108 = vmatmul.bf16.gmra.mxu3 %v2146_v4 }
 0x12f   : > { %1286 = vmatmul.bf16.gmra.mxu1 %v1566_v60 }
 0x130   : > { %v980_v31 = vpop.f32.mrf.mxu2 }
 0x131   : > { %v1069_v23 = vpop.f32.mrf.mxu3  ;;  %v981_v43 = vadd.f32 %v980_v31, %v2472_v36 }
 0x132   : > { %v1070_v28 = vadd.f32 %v1069_v23, %v2602_v50  ;;  %v1160_v52 = vpop.f32.mrf.mxu0 }
 0x134   : > { %v1249_v11 = vpop.f32.mrf.mxu1  ;;  %v1159_v21 = vadd.f32 %v1158_v35, %v1070_v28 }
 0x136   : > { %v1248_v63 = vadd.f32 %v1247_v39, %v1159_v21 }
 0x138   : > { %v1327_v4 = vpack.c.bf16 %v1248_v63, %v981_v43  ;;  %v982_v8 = vpop.f32.mrf.mxu2 }
 0x139   : > { %v1071_v20 = vpop.f32.mrf.mxu3  ;;  %v983_v39 = vadd.f32 %v982_v8, %v2480_v48 }
 0x13a   : > { %1359 = vst [vmem:[%s2612_s20] sm:$0xff] %v1327_v4  ;;  %v1072_v60 = vadd.f32 %v1071_v20, %v2602_v50  ;;  %v1163_v35 = vpop.f32.mrf.mxu0  ;;  %v1589_v20 = vld [vmem:[%s2098_s26 + $0xf8] sm:$0xf] }
 0x13c   : > { %v1252_v23 = vpop.f32.mrf.mxu1  ;;  %v1161_v36 = vadd.f32 %v1160_v52, %v1072_v60  ;;  %v1878_v60 = vld [vmem:[%s2098_s26 + $0x100] sm:$0xf0] }
 0x13d   : > { %1024 = vmatmul.bf16.gmra.mxu2 %v1578_v16  ;;  %1202 = vmatmul.bf16.gmra.mxu0 %v2213_v42 }
 0x13e   : > { %v1250_v31 = vadd.f32 %v1249_v11, %v1161_v36  ;;  %1113 = vmatmul.bf16.gmra.mxu3 %v2211_v41  ;;  %v1590_v41 = vor.u32 %v1878_v60, %v1589_v20  ;;  %v1881_v20 = vld [vmem:[%s2098_s26 + $0x118] sm:$0xf0] }
 0x13f   : > { %1291 = vmatmul.bf16.gmra.mxu1 %v1578_v16 }
 0x140   : > { %v1328_v28 = vpack.c.bf16 %v1250_v31, %v983_v39  ;;  %v985_v21 = vpop.f32.mrf.mxu2 }
 0x141   : > { %v1074_v43 = vpop.f32.mrf.mxu3  ;;  %v986_v4 = vadd.f32 %v985_v21, %v2488_v7 }
 0x142   : > { %1360 = vst [vmem:[%s2612_s20 + $0x8] sm:$0xff] %v1328_v28  ;;  %v1075_v63 = vadd.f32 %v1074_v43, %v2602_v50  ;;  %v1165_v27 = vpop.f32.mrf.mxu0 }
 0x144   : > { %v1254_v52 = vpop.f32.mrf.mxu1  ;;  %v1164_v19 = vadd.f32 %v1163_v35, %v1075_v63 }
 0x146   : > { %v1253_v42 = vadd.f32 %v1252_v23, %v1164_v19 }
 0x148   : > { %v1329_v48 = vpack.c.bf16 %v1253_v42, %v986_v4  ;;  %v987_v11 = vpop.f32.mrf.mxu2  ;;  %v1601_v42 = vld [vmem:[%s2098_s26 + $0x110] sm:$0xf] }
 0x149   : > { %v1076_v8 = vpop.f32.mrf.mxu3  ;;  %v988_v7 = vadd.f32 %v987_v11, %v2496_v22 }
 0x14a   : > { %1361 = vst [vmem:[%s2612_s20 + $0x10] sm:$0xff] %v1329_v48  ;;  %v1077_v16 = vadd.f32 %v1076_v8, %v2602_v50  ;;  %v1168_v36 = vpop.f32.mrf.mxu0 }
 0x14c   : > { %v1257_v39 = vpop.f32.mrf.mxu1  ;;  %v1166_v31 = vadd.f32 %v1165_v27, %v1077_v16 }
 0x14d   : > { %1029 = vmatmul.bf16.gmra.mxu2 %v1590_v41  ;;  %1207 = vmatmul.bf16.gmra.mxu0 %v2257_v2 }
 0x14e   : > { %v1255_v35 = vadd.f32 %v1254_v52, %v1166_v31  ;;  %1118 = vmatmul.bf16.gmra.mxu3 %v2255_v1  ;;  %v1602_v1 = vor.u32 %v1881_v20, %v1601_v42 }
 0x14f   : > { %1296 = vmatmul.bf16.gmra.mxu1 %v1590_v41 }
 0x150   : > { %v1330_v23 = vpack.c.bf16 %v1255_v35, %v988_v7  ;;  %v990_v28 = vpop.f32.mrf.mxu2 }
 0x151   : > { %v1079_v21 = vpop.f32.mrf.mxu3  ;;  %v991_v4 = vadd.f32 %v990_v28, %v2504_v46 }
 0x152   : > { %1362 = vst [vmem:[%s2612_s20 + $0x18] sm:$0xff] %v1330_v23  ;;  %v1080_v43 = vadd.f32 %v1079_v21, %v2602_v50  ;;  %v1170_v63 = vpop.f32.mrf.mxu0 }
 0x154   : > { %v1259_v27 = vpop.f32.mrf.mxu1  ;;  %v1169_v19 = vadd.f32 %v1168_v36, %v1080_v43  ;;  %v1613_v43 = vld [vmem:[%s2098_s26 + $0x128] sm:$0xf] }
 0x156   : > { %v1258_v2 = vadd.f32 %v1257_v39, %v1169_v19 }
 0x158   : > { %v1331_v22 = vpack.c.bf16 %v1258_v2, %v991_v4  ;;  %v992_v52 = vpop.f32.mrf.mxu2 }
 0x159   : > { %v1081_v60 = vpop.f32.mrf.mxu3  ;;  %v993_v46 = vadd.f32 %v992_v52, %v2512_v53 }
 0x15a   : > { %1363 = vst [vmem:[%s2612_s20 + $0x20] sm:$0xff] %v1331_v22  ;;  %v1082_v48 = vadd.f32 %v1081_v60, %v2602_v50  ;;  %v1173_v11 = vpop.f32.mrf.mxu0 }
 0x15c   : > { %v1262_v8 = vpop.f32.mrf.mxu1  ;;  %v1171_v41 = vadd.f32 %v1170_v63, %v1082_v48  ;;  %v1884_v63 = vld [vmem:[%s2098_s26 + $0x130] sm:$0xf0] }
 0x15d   : > { %1034 = vmatmul.bf16.gmra.mxu2 %v1602_v1  ;;  %1212 = vmatmul.bf16.gmra.mxu0 %v2301_v30 }
 0x15e   : > { %v1260_v16 = vadd.f32 %v1259_v27, %v1171_v41  ;;  %1123 = vmatmul.bf16.gmra.mxu3 %v2299_v29  ;;  %v1614_v29 = vor.u32 %v1884_v63, %v1613_v43 }
 0x15f   : > { %1301 = vmatmul.bf16.gmra.mxu1 %v1602_v1 }
 0x160   : > { %v1332_v36 = vpack.c.bf16 %v1260_v16, %v993_v46  ;;  %v995_v39 = vpop.f32.mrf.mxu2  ;;  %v1625_v16 = vld [vmem:[%s2098_s26 + $0x140] sm:$0xf] }
 0x161   : > { %v1084_v31 = vpop.f32.mrf.mxu3  ;;  %v996_v21 = vadd.f32 %v995_v39, %v2520_v32 }
 0x162   : > { %1364 = vst [vmem:[%s2612_s20 + $0x28] sm:$0xff] %v1332_v36  ;;  %v1085_v7 = vadd.f32 %v1084_v31, %v2602_v50  ;;  %v1175_v35 = vpop.f32.mrf.mxu0  ;;  %v1887_v36 = vld [vmem:[%s2098_s26 + $0x148] sm:$0xf0] }
 0x164   : > { %v1264_v23 = vpop.f32.mrf.mxu1  ;;  %v1174_v28 = vadd.f32 %v1173_v11, %v1085_v7 }
 0x166   : > { %v1263_v30 = vadd.f32 %v1262_v8, %v1174_v28 }
 0x168   : > { %v1333_v53 = vpack.c.bf16 %v1263_v30, %v996_v21  ;;  %v997_v27 = vpop.f32.mrf.mxu2 }
 0x169   : > { %v1086_v19 = vpop.f32.mrf.mxu3  ;;  %v998_v32 = vadd.f32 %v997_v27, %v2528_v44 }
 0x16a   : > { %1365 = vst [vmem:[%s2612_s20 + $0x30] sm:$0xff] %v1333_v53  ;;  %v1087_v4 = vadd.f32 %v1086_v19, %v2602_v50  ;;  %v1178_v2 = vpop.f32.mrf.mxu0 }
 0x16c   : > { %v1267_v42 = vpop.f32.mrf.mxu1  ;;  %v1176_v20 = vadd.f32 %v1175_v35, %v1087_v4 }
 0x16d   : > { %1039 = vmatmul.bf16.gmra.mxu2 %v1614_v29  ;;  %1217 = vmatmul.bf16.gmra.mxu0 %v2345_v58 }
 0x16e   : > { %v1265_v22 = vadd.f32 %v1264_v23, %v1176_v20  ;;  %1128 = vmatmul.bf16.gmra.mxu3 %v2343_v57  ;;  %v1626_v57 = vor.u32 %v1887_v36, %v1625_v16 }
 0x16f   : > { %1306 = vmatmul.bf16.gmra.mxu1 %v1614_v29 }
 0x170   : > { %v1334_v52 = vpack.c.bf16 %v1265_v22, %v998_v32  ;;  %v1000_v60 = vpop.f32.mrf.mxu2 }
 0x171   : > { %v1089_v1 = vpop.f32.mrf.mxu3  ;;  %v1001_v46 = vadd.f32 %v1000_v60, %v2536_v10 }
 0x172   : > { %1366 = vst [vmem:[%s2612_s20 + $0x38] sm:$0xff] %v1334_v52  ;;  %v1090_v48 = vadd.f32 %v1089_v1, %v2602_v50  ;;  %v1180_v11 = vpop.f32.mrf.mxu0 }
 0x174   : > { %v1269_v8 = vpop.f32.mrf.mxu1  ;;  %v1179_v41 = vadd.f32 %v1178_v2, %v1090_v48  ;;  %v1637_v2 = vld [vmem:[%s2098_s26 + $0x158] sm:$0xf] }
 0x176   : > { %v1268_v58 = vadd.f32 %v1267_v42, %v1179_v41  ;;  %v1890_v42 = vld [vmem:[%s2098_s26 + $0x160] sm:$0xf0] }
 0x178   : > { %v1335_v44 = vpack.c.bf16 %v1268_v58, %v1001_v46  ;;  %v1002_v39 = vpop.f32.mrf.mxu2 }
 0x179   : > { %v1091_v31 = vpop.f32.mrf.mxu3  ;;  %v1003_v10 = vadd.f32 %v1002_v39, %v2544_v34  ;;  %v1649_v39 = vld [vmem:[%s2098_s26 + $0x170] sm:$0xf] }
 0x17a   : > { %1367 = vst [vmem:[%s2612_s20 + $0x40] sm:$0xff] %v1335_v44  ;;  %v1092_v7 = vadd.f32 %v1091_v31, %v2602_v50  ;;  %v1183_v35 = vpop.f32.mrf.mxu0  ;;  %v1893_v31 = vld [vmem:[%s2098_s26 + $0x178] sm:$0xf0] }
 0x17c   : > { %v1272_v23 = vpop.f32.mrf.mxu1  ;;  %v1181_v28 = vadd.f32 %v1180_v11, %v1092_v7 }
 0x17d   : > { %1044 = vmatmul.bf16.gmra.mxu2 %v1626_v57  ;;  %1222 = vmatmul.bf16.gmra.mxu0 %v2389_v26 }
 0x17e   : > { %v1270_v21 = vadd.f32 %v1269_v8, %v1181_v28  ;;  %1133 = vmatmul.bf16.gmra.mxu3 %v2387_v25  ;;  %v1638_v25 = vor.u32 %v1890_v42, %v1637_v2 }
 0x17f   : > { %1311 = vmatmul.bf16.gmra.mxu1 %v1626_v57 }
 0x180   : > { %v1336_v30 = vpack.c.bf16 %v1270_v21, %v1003_v10  ;;  %v1005_v43 = vpop.f32.mrf.mxu2 }
 0x181   : > { %v1094_v63 = vpop.f32.mrf.mxu3  ;;  %v1006_v4 = vadd.f32 %v1005_v43, %v2552_v51 }
 0x182   : > { %1368 = vst [vmem:[%s2612_s20 + $0x48] sm:$0xff] %v1336_v30  ;;  %v1095_v53 = vadd.f32 %v1094_v63, %v2602_v50  ;;  %v1185_v27 = vpop.f32.mrf.mxu0 }
 0x184   : > { %v1274_v19 = vpop.f32.mrf.mxu1  ;;  %v1184_v29 = vadd.f32 %v1183_v35, %v1095_v53 }
 0x186   : > { %v1273_v26 = vadd.f32 %v1272_v23, %v1184_v29 }
 0x188   : > { %v1337_v34 = vpack.c.bf16 %v1273_v26, %v1006_v4  ;;  %v1007_v20 = vpop.f32.mrf.mxu2 }
 0x189   : > { %v1096_v32 = vpop.f32.mrf.mxu3  ;;  %v1008_v51 = vadd.f32 %v1007_v20, %v2560_v12 }
 0x18a   : > { %1369 = vst [vmem:[%s2612_s20 + $0x50] sm:$0xff] %v1337_v34  ;;  %v1097_v22 = vadd.f32 %v1096_v32, %v2602_v50  ;;  %v1188_v52 = vpop.f32.mrf.mxu0 }
 0x18c   : > { %v1277_v60 = vpop.f32.mrf.mxu1  ;;  %v1186_v1 = vadd.f32 %v1185_v27, %v1097_v22 }
 0x18d   : > { %1049 = vmatmul.bf16.gmra.mxu2 %v1638_v25  ;;  %1227 = vmatmul.bf16.gmra.mxu0 %v2433_v62 }
 0x18e   : > { %v1275_v48 = vadd.f32 %v1274_v19, %v1186_v1  ;;  %1138 = vmatmul.bf16.gmra.mxu3 %v2431_v61  ;;  %v1650_v61 = vor.u32 %v1893_v31, %v1649_v39 }
 0x18f   : > { %1316 = vmatmul.bf16.gmra.mxu1 %v1638_v25 }
 0x190   : > { %v1338_v11 = vpack.c.bf16 %v1275_v48, %v1008_v51  ;;  %v1010_v8 = vpop.f32.mrf.mxu2 }
 0x191   : > { %v1099_v41 = vpop.f32.mrf.mxu3  ;;  %v1011_v44 = vadd.f32 %v1010_v8, %v2568_v47 }
 0x192   : > { %1370 = vst [vmem:[%s2612_s20 + $0x58] sm:$0xff] %v1338_v11  ;;  %v1100_v46 = vadd.f32 %v1099_v41, %v2602_v50  ;;  %v1190_v58 = vpop.f32.mrf.mxu0 }
 0x194   : > { %v1279_v16 = vpop.f32.mrf.mxu1  ;;  %v1189_v36 = vadd.f32 %v1188_v52, %v1100_v46 }
 0x196   : > { %v1278_v62 = vadd.f32 %v1277_v60, %v1189_v36 }
 0x198   : > { %v1339_v12 = vpack.c.bf16 %v1278_v62, %v1011_v44  ;;  %v1012_v57 = vpop.f32.mrf.mxu2 }
 0x199   : > { %v1101_v7 = vpop.f32.mrf.mxu3  ;;  %v1013_v21 = vadd.f32 %v1012_v57, %v2576_v0 }
 0x19a   : > { %1371 = vst [vmem:[%s2612_s20 + $0x60] sm:$0xff] %v1339_v12  ;;  %v1102_v35 = vadd.f32 %v1101_v7, %v2602_v50  ;;  %v1193_v23 = vpop.f32.mrf.mxu0 }
 0x19c   : > { %v1282_v28 = vpop.f32.mrf.mxu1  ;;  %v1191_v10 = vadd.f32 %v1190_v58, %v1102_v35 }
 0x19d   : > { %1054 = vmatmul.bf16.gmra.mxu2 %v1650_v61  ;;  %1232 = vmatmul.bf16.gmra.mxu0 %v2453_v18 }
 0x19e   : > { %v1280_v47 = vadd.f32 %v1279_v16, %v1191_v10  ;;  %1143 = vmatmul.bf16.gmra.mxu3 %v2451_v17 }
 0x19f   : > { %1321 = vmatmul.bf16.gmra.mxu1 %v1650_v61 }
 0x1a0   : > { %v1340_v30 = vpack.c.bf16 %v1280_v47, %v1013_v21  ;;  %v1015_v43 = vpop.f32.mrf.mxu2 }
 0x1a1   : > { %v1104_v63 = vpop.f32.mrf.mxu3  ;;  %v1016_v4 = vadd.f32 %v1015_v43, %v2584_v56 }
 0x1a2   : > { %1372 = vst [vmem:[%s2612_s20 + $0x68] sm:$0xff] %v1340_v30  ;;  %v1105_v53 = vadd.f32 %v1104_v63, %v2602_v50  ;;  %v1195_v27 = vpop.f32.mrf.mxu0 }
 0x1a4   : > { %v1284_v19 = vpop.f32.mrf.mxu1  ;;  %v1194_v29 = vadd.f32 %v1193_v23, %v1105_v53 }
 0x1a6   : > { %v1283_v18 = vadd.f32 %v1282_v28, %v1194_v29 }
 0x1a8   : > { %v1341_v26 = vpack.c.bf16 %v1283_v18, %v1016_v4  ;;  %v1017_v0 = vpop.f32.mrf.mxu2 }
 0x1a9   : > { %v1106_v2 = vpop.f32.mrf.mxu3  ;;  %v1018_v32 = vadd.f32 %v1017_v0, %v2592_v33 }
 0x1aa   : > { %1373 = vst [vmem:[%s2612_s20 + $0x70] sm:$0xff] %v1341_v26  ;;  %v1107_v17 = vadd.f32 %v1106_v2, %v2602_v50  ;;  %v1198_v42 = vpop.f32.mrf.mxu0 }
 0x1ac   : > { %v1287_v34 = vpop.f32.mrf.mxu1  ;;  %v1196_v20 = vadd.f32 %v1195_v27, %v1107_v17 }
 0x1ae   : > { %v1285_v25 = vadd.f32 %v1284_v19, %v1196_v20 }
 0x1b0   : > { %v1342_v22 = vpack.c.bf16 %v1285_v25, %v1018_v32  ;;  %v1020_v52 = vpop.f32.mrf.mxu2 }
 0x1b1   : > { %v1109_v60 = vpop.f32.mrf.mxu3  ;;  %v1021_v11 = vadd.f32 %v1020_v52, %v2477_v45 }
 0x1b2   : > { %1374 = vst [vmem:[%s2612_s20 + $0x78] sm:$0xff] %v1342_v22  ;;  %v1110_v56 = vadd.f32 %v1109_v60, %v2602_v50  ;;  %v1200_v1 = vpop.f32.mrf.mxu0 }
 0x1b4   : > { %v1289_v51 = vpop.f32.mrf.mxu1  ;;  %v1199_v48 = vadd.f32 %v1198_v42, %v1110_v56 }
 0x1b6   : > { %v1288_v8 = vadd.f32 %v1287_v34, %v1199_v48 }
 0x1b8   : > { %v1343_v41 = vpack.c.bf16 %v1288_v8, %v1021_v11  ;;  %v1022_v46 = vpop.f32.mrf.mxu2 }
 0x1b9   : > { %v1111_v58 = vpop.f32.mrf.mxu3  ;;  %v1023_v62 = vadd.f32 %v1022_v46, %v2485_v54 }
 0x1ba   : > { %1375 = vst [vmem:[%s2612_s20 + $0x80] sm:$0xff] %v1343_v41  ;;  %v1112_v33 = vadd.f32 %v1111_v58, %v2602_v50  ;;  %v1203_v16 = vpop.f32.mrf.mxu0 }
 0x1bc   : > { %v1292_v36 = vpop.f32.mrf.mxu1  ;;  %v1201_v44 = vadd.f32 %v1200_v1, %v1112_v33 }
 0x1be   : > { %v1290_v39 = vadd.f32 %v1289_v51, %v1201_v44 }
 0x1c0   : > { %v1344_v31 = vpack.c.bf16 %v1290_v39, %v1023_v62  ;;  %v1025_v12 = vpop.f32.mrf.mxu2 }
 0x1c1   : > { %v1114_v57 = vpop.f32.mrf.mxu3  ;;  %v1026_v23 = vadd.f32 %v1025_v12, %v2493_v14 }
 0x1c2   : > { %1376 = vst [vmem:[%s2612_s20 + $0x88] sm:$0xff] %v1344_v31  ;;  %v1115_v45 = vadd.f32 %v1114_v57, %v2602_v50  ;;  %v1205_v7 = vpop.f32.mrf.mxu0 }
 0x1c4   : > { %v1294_v61 = vpop.f32.mrf.mxu1  ;;  %v1204_v35 = vadd.f32 %v1203_v16, %v1115_v45 }
 0x1c6   : > { %v1293_v28 = vadd.f32 %v1292_v36, %v1204_v35 }
 0x1c8   : > { %v1345_v10 = vpack.c.bf16 %v1293_v28, %v1026_v23  ;;  %v1027_v21 = vpop.f32.mrf.mxu2 }
 0x1c9   : > { %v1116_v47 = vpop.f32.mrf.mxu3  ;;  %v1028_v53 = vadd.f32 %v1027_v21, %v2501_v38 }
 0x1ca   : > { %1377 = vst [vmem:[%s2612_s20 + $0x90] sm:$0xff] %v1345_v10  ;;  %v1117_v54 = vadd.f32 %v1116_v47, %v2602_v50  ;;  %v1208_v30 = vpop.f32.mrf.mxu0 }
 0x1cc   : > { %v1297_v43 = vpop.f32.mrf.mxu1  ;;  %v1206_v63 = vadd.f32 %v1205_v7, %v1117_v54 }
 0x1ce   : > { %v1295_v27 = vadd.f32 %v1294_v61, %v1206_v63 }
 0x1d0   : > { %v1346_v19 = vpack.c.bf16 %v1295_v27, %v1028_v53  ;;  %v1030_v29 = vpop.f32.mrf.mxu2 }
 0x1d1   : > { %v1119_v4 = vpop.f32.mrf.mxu3  ;;  %v1031_v2 = vadd.f32 %v1030_v29, %v2509_v9 }
 0x1d2   : > { %1378 = vst [vmem:[%s2612_s20 + $0x98] sm:$0xff] %v1346_v19  ;;  %v1120_v14 = vadd.f32 %v1119_v4, %v2602_v50  ;;  %v1210_v18 = vpop.f32.mrf.mxu0 }
 0x1d4   : > { %v1299_v26 = vpop.f32.mrf.mxu1  ;;  %v1209_v0 = vadd.f32 %v1208_v30, %v1120_v14 }
 0x1d6   : > { %v1298_v17 = vadd.f32 %v1297_v43, %v1209_v0 }
 0x1d8   : > { %v1347_v42 = vpack.c.bf16 %v1298_v17, %v1031_v2  ;;  %v1032_v34 = vpop.f32.mrf.mxu2 }
 0x1d9   : > { %v1121_v20 = vpop.f32.mrf.mxu3  ;;  %v1033_v52 = vadd.f32 %v1032_v34, %v2517_v13 }
 0x1da   : > { %1379 = vst [vmem:[%s2612_s20 + $0xa0] sm:$0xff] %v1347_v42  ;;  %v1122_v38 = vadd.f32 %v1121_v20, %v2602_v50  ;;  %v1213_v32 = vpop.f32.mrf.mxu0 }
 0x1dc   : > { %v1302_v25 = vpop.f32.mrf.mxu1  ;;  %v1211_v22 = vadd.f32 %v1210_v18, %v1122_v38 }
 0x1de   : > { %v1300_v60 = vadd.f32 %v1299_v26, %v1211_v22 }
 0x1e0   : > { %v1348_v56 = vpack.c.bf16 %v1300_v60, %v1033_v52  ;;  %v1035_v1 = vpop.f32.mrf.mxu2 }
 0x1e1   : > { %v1124_v51 = vpop.f32.mrf.mxu3  ;;  %v1036_v41 = vadd.f32 %v1035_v1, %v2525_v40 }
 0x1e2   : > { %1380 = vst [vmem:[%s2612_s20 + $0xa8] sm:$0xff] %v1348_v56  ;;  %v1125_v9 = vadd.f32 %v1124_v51, %v2602_v50  ;;  %v1215_v48 = vpop.f32.mrf.mxu0 }
 0x1e4   : > { %v1304_v11 = vpop.f32.mrf.mxu1  ;;  %v1214_v8 = vadd.f32 %v1213_v32, %v1125_v9 }
 0x1e6   : > { %v1303_v46 = vadd.f32 %v1302_v25, %v1214_v8 }
 0x1e8   : > { %v1349_v58 = vpack.c.bf16 %v1303_v46, %v1036_v41  ;;  %v1037_v33 = vpop.f32.mrf.mxu2 }
 0x1e9   : > { %v1126_v16 = vpop.f32.mrf.mxu3  ;;  %v1038_v39 = vadd.f32 %v1037_v33, %v2533_v3 }
 0x1ea   : > { %1381 = vst [vmem:[%s2612_s20 + $0xb0] sm:$0xff] %v1349_v58  ;;  %v1127_v13 = vadd.f32 %v1126_v16, %v2602_v50  ;;  %v1218_v36 = vpop.f32.mrf.mxu0 }
 0x1ec   : > { %v1307_v44 = vpop.f32.mrf.mxu1  ;;  %v1216_v62 = vadd.f32 %v1215_v48, %v1127_v13 }
 0x1ee   : > { %v1305_v31 = vadd.f32 %v1304_v11, %v1216_v62 }
 0x1f0   : > { %v1350_v12 = vpack.c.bf16 %v1305_v31, %v1038_v39  ;;  %v1040_v57 = vpop.f32.mrf.mxu2 }
 0x1f1   : > { %v1129_v45 = vpop.f32.mrf.mxu3  ;;  %v1041_v23 = vadd.f32 %v1040_v57, %v2541_v15 }
 0x1f2   : > { %1382 = vst [vmem:[%s2612_s20 + $0xb8] sm:$0xff] %v1350_v12  ;;  %v1130_v40 = vadd.f32 %v1129_v45, %v2602_v50  ;;  %v1220_v7 = vpop.f32.mrf.mxu0 }
 0x1f4   : > { %v1309_v61 = vpop.f32.mrf.mxu1  ;;  %v1219_v35 = vadd.f32 %v1218_v36, %v1130_v40 }
 0x1f6   : > { %v1308_v28 = vadd.f32 %v1307_v44, %v1219_v35 }
 0x1f8   : > { %v1351_v10 = vpack.c.bf16 %v1308_v28, %v1041_v23  ;;  %v1042_v21 = vpop.f32.mrf.mxu2 }
 0x1f9   : > { %v1131_v47 = vpop.f32.mrf.mxu3  ;;  %v1043_v63 = vadd.f32 %v1042_v21, %v2549_v49 }
 0x1fa   : > { %1383 = vst [vmem:[%s2612_s20 + $0xc0] sm:$0xff] %v1351_v10  ;;  %v1132_v3 = vadd.f32 %v1131_v47, %v2602_v50  ;;  %v1223_v54 = vpop.f32.mrf.mxu0 }
 0x1fc   : > { %v1312_v30 = vpop.f32.mrf.mxu1  ;;  %v1221_v43 = vadd.f32 %v1220_v7, %v1132_v3 }
 0x1fe   : > { %v1310_v53 = vadd.f32 %v1309_v61, %v1221_v43 }
 0x200   : > { %v1352_v27 = vpack.c.bf16 %v1310_v53, %v1043_v63  ;;  %v1045_v19 = vpop.f32.mrf.mxu2 }
 0x201   : > { %v1134_v29 = vpop.f32.mrf.mxu3  ;;  %v1046_v26 = vadd.f32 %v1045_v19, %v2557_v5 }
 0x202   : > { %1384 = vst [vmem:[%s2612_s20 + $0xc8] sm:$0xff] %v1352_v27  ;;  %v1135_v15 = vadd.f32 %v1134_v29, %v2602_v50  ;;  %v1225_v4 = vpop.f32.mrf.mxu0 }
 0x204   : > { %v1224_v14 = vadd.f32 %v1223_v54, %v1135_v15  ;;  %v1314_v18 = vpop.f32.mrf.mxu1 }
 0x206   : > { %v1313_v0 = vadd.f32 %v1312_v30, %v1224_v14 }
 0x208   : > { %v1353_v2 = vpack.c.bf16 %v1313_v0, %v1046_v26  ;;  %v1047_v17 = vpop.f32.mrf.mxu2 }
 0x209   : > { %v1136_v42 = vpop.f32.mrf.mxu3  ;;  %v1048_v38 = vadd.f32 %v1047_v17, %v2565_v59 }
 0x20a   : > { %1385 = vst [vmem:[%s2612_s20 + $0xd0] sm:$0xff] %v1353_v2  ;;  %v1137_v49 = vadd.f32 %v1136_v42, %v2602_v50  ;;  %v1228_v20 = vpop.f32.mrf.mxu0 }
 0x20c   : > { %v1226_v34 = vadd.f32 %v1225_v4, %v1137_v49  ;;  %v1317_v25 = vpop.f32.mrf.mxu1 }
 0x20e   : > { %v1315_v32 = vadd.f32 %v1314_v18, %v1226_v34 }
 0x210   : > { %v1354_v22 = vpack.c.bf16 %v1315_v32, %v1048_v38  ;;  %v1050_v52 = vpop.f32.mrf.mxu2 }
 0x211   : > { %v1139_v60 = vpop.f32.mrf.mxu3  ;;  %v1051_v1 = vadd.f32 %v1050_v52, %v2573_v55 }
 0x212   : > { %1386 = vst [vmem:[%s2612_s20 + $0xd8] sm:$0xff] %v1354_v22  ;;  %v1140_v5 = vadd.f32 %v1139_v60, %v2602_v50  ;;  %v1230_v9 = vpop.f32.mrf.mxu0 }
 0x214   : > { %v1229_v56 = vadd.f32 %v1228_v20, %v1140_v5  ;;  %v1319_v8 = vpop.f32.mrf.mxu1 }
 0x216   : > { %v1318_v51 = vadd.f32 %v1317_v25, %v1229_v56 }
 0x218   : > { %v1355_v48 = vpack.c.bf16 %v1318_v51, %v1051_v1  ;;  %v1052_v11 = vpop.f32.mrf.mxu2 }
 0x219   : > { %v1141_v41 = vpop.f32.mrf.mxu3  ;;  %v1053_v58 = vadd.f32 %v1052_v11, %v2581_v24 }
 0x21a   : > { %1387 = vst [vmem:[%s2612_s20 + $0xe0] sm:$0xff] %v1355_v48  ;;  %v1142_v59 = vadd.f32 %v1141_v41, %v2602_v50  ;;  %v1233_v13 = vpop.f32.mrf.mxu0 }
 0x21c   : > { %v1231_v46 = vadd.f32 %v1230_v9, %v1142_v59  ;;  %v1322_v62 = vpop.f32.mrf.mxu1 }
 0x21e   : > { %v1320_v33 = vadd.f32 %v1319_v8, %v1231_v46 }
 0x220   : > { %v1356_v16 = vpack.c.bf16 %v1320_v33, %v1053_v58  ;;  %v1055_v36 = vpop.f32.mrf.mxu2 }
 0x221   : > { %v1144_v44 = vpop.f32.mrf.mxu3  ;;  %v1056_v31 = vadd.f32 %v1055_v36, %v2589_v6 }
 0x222   : > { %1388 = vst [vmem:[%s2612_s20 + $0xe8] sm:$0xff] %v1356_v16  ;;  %v1145_v55 = vadd.f32 %v1144_v44, %v2602_v50  ;;  %v1235_v24 = vpop.f32.mrf.mxu0 }
 0x224   : > { %v1234_v39 = vadd.f32 %v1233_v13, %v1145_v55  ;;  %v1324_v35 = vpop.f32.mrf.mxu1 }
 0x226   : > { %v1323_v12 = vadd.f32 %v1322_v62, %v1234_v39 }
 0x228   : > { %v1357_v57 = vpack.c.bf16 %v1323_v12, %v1056_v31  ;;  %v1057_v7 = vpop.f32.mrf.mxu2 }
 0x229   : > { %v1146_v45 = vpop.f32.mrf.mxu3  ;;  %v1058_v23 = vadd.f32 %v1057_v7, %v2597_v37 }
 0x22a   : > { %1389 = vst [vmem:[%s2612_s20 + $0xf0] sm:$0xff] %v1357_v57  ;;  %v1147_v40 = vadd.f32 %v1146_v45, %v2602_v50 }
 0x22c   : > { %v1236_v61 = vadd.f32 %v1235_v24, %v1147_v40 }
 0x22e   : > { %v1325_v28 = vadd.f32 %v1324_v35, %v1236_v61 }
 0x230   : > { %v1358_v10 = vpack.c.bf16 %v1325_v28, %v1058_v23 }
 0x232   : > { %1390 = vst [vmem:[%s2612_s20 + $0xf8] sm:$0xff] %v1358_v10 }
 0x233 PF: > { %s13_s12 = sadd.s32 1, %s1973_s12  }
 0x234   : > { %p10_p4 = scmp.ge.s32.totalorder %s13_s12, 4  }
 0x236   :  { %12 = sbr.rel (!%p10_p4) target bundleno = 1 (0x1), region = 62 }

// kernel: hgnn_conv.3
= control target key start
LH: loop header
LB: loop body
LE: loop exit
PB: predicated region body
PF: predicated region fallthrough
CT: control target
= control target key end

     0   :  { %s2850_s9 = smov 0   ;;  %s2852_s10 = smov 0   ;;  %s3729_s0 = inlined_call_operand.vmem [shape: bf16[512,512], index: 0, kind: input, shape index: {}]   ;;  %s3730_s1 = inlined_call_operand.vmem [shape: bf16[512,256], index: 1, kind: input, shape index: {}]   ;;  %s3731_s2 = inlined_call_operand.vmem [shape: f32[512,256], index: 2, kind: output, shape index: {}]  }
   0x1   :  { %s2854_s11 = smov 0  }
   0x2 LB: > { %s24_s12 = sadd.s32 1, %s2829_s10  ;;  %p2136_p0 = scmp.ge.s32.totalorder %s2833_s11, 1  ;;  %s2833_s11 = sphi %s2854_s11, %s12_s11   ;;  %s2829_s10 = sphi %s2852_s10, %s3784_s10   ;;  %s2825_s9 = sphi %s2850_s9, %s3783_s9  }
   0x3   : > { %p26_p1 = scmp.ge.s32.totalorder %s24_s12, 2  ;;  %p133_p2 = scmp.lt.s32.totalorder %s2833_s11, 3 }
   0x5   : > { %s3786_s12 = smov (%p26_p1, %s24_s12), 0  ;;  %p134_p3 = pnand %p2136_p0, %p133_p2 }
   0x7   : > { %137 = sbr.rel (%p134_p3) target bundleno = 689 (0x2b1), region = 28 }
   0xc   : > { %v2457_v0 = vld [vmem:[%s3730_s1 + $0x70] sm:$0xf]  ;;  %v2674_v1 = vld [vmem:[%s3730_s1 + $0x74] sm:$0xf0]  ;;  %v2449_v11 = vld [vmem:[%s3730_s1 + $0x60] sm:$0xf] }
   0xd   : > { %v2521_v2 = vld [vmem:[%s3730_s1 + $0xf0] sm:$0xf]  ;;  %v2458_v3 = vor.u32 %v2674_v1, %v2457_v0  ;;  %v2690_v4 = vld [vmem:[%s3730_s1 + $0xf4] sm:$0xf0]  ;;  %v2672_v13 = vld [vmem:[%s3730_s1 + $0x64] sm:$0xf0] }
   0xe   : > { %v2585_v5 = vld [vmem:[%s3730_s1 + $0x170] sm:$0xf]  ;;  %v2706_v6 = vld [vmem:[%s3730_s1 + $0x174] sm:$0xf0]  ;;  %v2522_v7 = vor.u32 %v2690_v4, %v2521_v2  ;;  %v2513_v14 = vld [vmem:[%s3730_s1 + $0xe0] sm:$0xf]  ;;  %v2450_v16 = vor.u32 %v2672_v13, %v2449_v11 }
   0xf   : > { %v2586_v8 = vor.u32 %v2706_v6, %v2585_v5  ;;  %v2649_v9 = vld [vmem:[%s3730_s1 + $0x1f0] sm:$0xf]  ;;  %v2722_v10 = vld [vmem:[%s3730_s1 + $0x1f4] sm:$0xf0]  ;;  %1086 = vmatpush.bf16.msra.mxu0 %v2458_v3  ;;  %v2688_v15 = vld [vmem:[%s3730_s1 + $0xe4] sm:$0xf0] }
  0x10   : > { %v2650_v12 = vor.u32 %v2722_v10, %v2649_v9  ;;  %1175 = vmatpush.bf16.msra.mxu1 %v2522_v7  ;;  %v2514_v17 = vor.u32 %v2688_v15, %v2513_v14  ;;  %v2577_v18 = vld [vmem:[%s3730_s1 + $0x160] sm:$0xf]  ;;  %v2704_v19 = vld [vmem:[%s3730_s1 + $0x164] sm:$0xf0]  ;;  %v2441_v23 = vld [vmem:[%s3730_s1 + $0x50] sm:$0xf] }
  0x11   : > { %1264 = vmatpush.bf16.msra.mxu2 %v2586_v8  ;;  %v2641_v20 = vld [vmem:[%s3730_s1 + $0x1e0] sm:$0xf]  ;;  %v2578_v21 = vor.u32 %v2704_v19, %v2577_v18  ;;  %v2720_v22 = vld [vmem:[%s3730_s1 + $0x1e4] sm:$0xf0]  ;;  %v2670_v24 = vld [vmem:[%s3730_s1 + $0x54] sm:$0xf0] }
  0x12   : > { %1353 = vmatpush.bf16.msra.mxu3 %v2650_v12  ;;  %v2642_v25 = vor.u32 %v2720_v22, %v2641_v20  ;;  %v2505_v26 = vld [vmem:[%s3730_s1 + $0xd0] sm:$0xf]  ;;  %v2686_v27 = vld [vmem:[%s3730_s1 + $0xd4] sm:$0xf0]  ;;  %v2442_v29 = vor.u32 %v2670_v24, %v2441_v23  ;;  %v2433_v35 = vld [vmem:[%s3730_s1 + $0x40] sm:$0xf] }
  0x13   : > { %v2569_v28 = vld [vmem:[%s3730_s1 + $0x150] sm:$0xf]  ;;  %1087 = vmatpush.bf16.msra.mxu0 %v2450_v16  ;;  %v2702_v30 = vld [vmem:[%s3730_s1 + $0x154] sm:$0xf0]  ;;  %v2506_v33 = vor.u32 %v2686_v27, %v2505_v26  ;;  %v2668_v36 = vld [vmem:[%s3730_s1 + $0x44] sm:$0xf0] }
  0x14   : > { %v2633_v31 = vld [vmem:[%s3730_s1 + $0x1d0] sm:$0xf]  ;;  %v2718_v32 = vld [vmem:[%s3730_s1 + $0x1d4] sm:$0xf0]  ;;  %1176 = vmatpush.bf16.msra.mxu1 %v2514_v17  ;;  %v2570_v34 = vor.u32 %v2702_v30, %v2569_v28  ;;  %v2497_v37 = vld [vmem:[%s3730_s1 + $0xc0] sm:$0xf]  ;;  %v2434_v44 = vor.u32 %v2668_v36, %v2433_v35 }
  0x15   : > { %1265 = vmatpush.bf16.msra.mxu2 %v2578_v21  ;;  %v2634_v38 = vor.u32 %v2718_v32, %v2633_v31  ;;  %v2684_v39 = vld [vmem:[%s3730_s1 + $0xc4] sm:$0xf0]  ;;  %v2561_v40 = vld [vmem:[%s3730_s1 + $0x140] sm:$0xf]  ;;  %v2425_v47 = vld [vmem:[%s3730_s1 + $0x30] sm:$0xf] }
  0x16   : > { %1354 = vmatpush.bf16.msra.mxu3 %v2642_v25  ;;  %v2700_v41 = vld [vmem:[%s3730_s1 + $0x144] sm:$0xf0]  ;;  %v2625_v42 = vld [vmem:[%s3730_s1 + $0x1c0] sm:$0xf]  ;;  %v2498_v45 = vor.u32 %v2684_v39, %v2497_v37  ;;  %v2666_v48 = vld [vmem:[%s3730_s1 + $0x34] sm:$0xf0] }
  0x17   : > { %v2716_v43 = vld [vmem:[%s3730_s1 + $0x1c4] sm:$0xf0]  ;;  %1088 = vmatpush.bf16.msra.mxu0 %v2442_v29  ;;  %v2562_v46 = vor.u32 %v2700_v41, %v2561_v40  ;;  %v2489_v49 = vld [vmem:[%s3730_s1 + $0xb0] sm:$0xf]  ;;  %v2682_v51 = vld [vmem:[%s3730_s1 + $0xb4] sm:$0xf0]  ;;  %v2426_v56 = vor.u32 %v2666_v48, %v2425_v47 }
  0x18   : > { %1177 = vmatpush.bf16.msra.mxu1 %v2506_v33  ;;  %v2626_v50 = vor.u32 %v2716_v43, %v2625_v42  ;;  %v2553_v52 = vld [vmem:[%s3730_s1 + $0x130] sm:$0xf]  ;;  %v2698_v53 = vld [vmem:[%s3730_s1 + $0x134] sm:$0xf0]  ;;  %v2490_v57 = vor.u32 %v2682_v51, %v2489_v49  ;;  %v2417_v59 = vld [vmem:[%s3730_s1 + $0x20] sm:$0xf] }
  0x19   : > { %1266 = vmatpush.bf16.msra.mxu2 %v2570_v34  ;;  %v2617_v54 = vld [vmem:[%s3730_s1 + $0x1b0] sm:$0xf]  ;;  %v2714_v55 = vld [vmem:[%s3730_s1 + $0x1b4] sm:$0xf0]  ;;  %v2554_v58 = vor.u32 %v2698_v53, %v2553_v52  ;;  %v2664_v60 = vld [vmem:[%s3730_s1 + $0x24] sm:$0xf0] }
  0x1a   : > { %1355 = vmatpush.bf16.msra.mxu3 %v2634_v38  ;;  %v2481_v61 = vld [vmem:[%s3730_s1 + $0xa0] sm:$0xf]  ;;  %v2618_v62 = vor.u32 %v2714_v55, %v2617_v54  ;;  %v2680_v63 = vld [vmem:[%s3730_s1 + $0xa4] sm:$0xf0]  ;;  %v2418_v4 = vor.u32 %v2664_v60, %v2417_v59  ;;  %v2409_v5 = vld [vmem:[%s3730_s1 + $0x10] sm:$0xf] }
  0x1b   : > { %1089 = vmatpush.bf16.msra.mxu0 %v2434_v44  ;;  %v2545_v0 = vld [vmem:[%s3730_s1 + $0x120] sm:$0xf]  ;;  %v2696_v1 = vld [vmem:[%s3730_s1 + $0x124] sm:$0xf0]  ;;  %v2662_v6 = vld [vmem:[%s3730_s1 + $0x14] sm:$0xf0]  ;;  %v2482_v7 = vor.u32 %v2680_v63, %v2481_v61 }
  0x1c   : > { %1178 = vmatpush.bf16.msra.mxu1 %v2498_v45  ;;  %v2609_v2 = vld [vmem:[%s3730_s1 + $0x1a0] sm:$0xf]  ;;  %v2712_v3 = vld [vmem:[%s3730_s1 + $0x1a4] sm:$0xf0]  ;;  %v2546_v8 = vor.u32 %v2696_v1, %v2545_v0  ;;  %v2473_v9 = vld [vmem:[%s3730_s1 + $0x90] sm:$0xf]  ;;  %v2410_v17 = vor.u32 %v2662_v6, %v2409_v5 }
  0x1d   : > { %1267 = vmatpush.bf16.msra.mxu2 %v2562_v46  ;;  %v2678_v10 = vld [vmem:[%s3730_s1 + $0x94] sm:$0xf0]  ;;  %v2537_v11 = vld [vmem:[%s3730_s1 + $0x110] sm:$0xf]  ;;  %v2610_v12 = vor.u32 %v2712_v3, %v2609_v2  ;;  %s2137_s27 = sshll.u32 %s2825_s9, 5 }
  0x1e   : > { %1356 = vmatpush.bf16.msra.mxu3 %v2626_v50  ;;  %v2694_v13 = vld [vmem:[%s3730_s1 + $0x114] sm:$0xf0]  ;;  %v2601_v14 = vld [vmem:[%s3730_s1 + $0x190] sm:$0xf]  ;;  %v2401_v16 = vld [vmem:[%s3730_s1] sm:$0xf]  ;;  %v2474_v21 = vor.u32 %v2678_v10, %v2473_v9 }
  0x1f   : > { %1090 = vmatpush.bf16.msra.mxu0 %v2426_v56  ;;  %v2710_v15 = vld [vmem:[%s3730_s1 + $0x194] sm:$0xf0]  ;;  %p163_p4 = scmp.lt.s32.totalorder %s2137_s27, 63  ;;  %v2660_v18 = vld [vmem:[%s3730_s1 + $0x4] sm:$0xf0]  ;;  %v2538_v22 = vor.u32 %v2694_v13, %v2537_v11 }
  0x20   : > { %1179 = vmatpush.bf16.msra.mxu1 %v2490_v57  ;;  %v2465_v19 = vld [vmem:[%s3730_s1 + $0x80] sm:$0xf]  ;;  %v2676_v20 = vld [vmem:[%s3730_s1 + $0x84] sm:$0xf0]  ;;  %v2602_v25 = vor.u32 %v2710_v15, %v2601_v14  ;;  %v2705_v28 = vld [vmem:[%s3730_s1 + $0x174] sm:$0xf]  ;;  %v2402_v31 = vor.u32 %v2660_v18, %v2401_v16 }
  0x21   : > { %1268 = vmatpush.bf16.msra.mxu2 %v2554_v58  ;;  %v2529_v23 = vld [vmem:[%s3730_s1 + $0x100] sm:$0xf]  ;;  %v2692_v24 = vld [vmem:[%s3730_s1 + $0x104] sm:$0xf0]  ;;  %s3788_s27 = smov (!%p163_p4, %s2137_s27), 63  ;;  %v2466_v35 = vor.u32 %v2676_v20, %v2465_v19 }
  0x22   : > { %1357 = vmatpush.bf16.msra.mxu3 %v2618_v62  ;;  %v2593_v26 = vld [vmem:[%s3730_s1 + $0x180] sm:$0xf]  ;;  %v2708_v27 = vld [vmem:[%s3730_s1 + $0x184] sm:$0xf0]  ;;  %s2657_s23 = sshll.u32 %s3788_s27, 4  ;;  %v2530_v36 = vor.u32 %v2692_v24, %v2529_v23 }
  0x23   : > { %1091 = vmatpush.bf16.msra.mxu0 %v2418_v4  ;;  %v2587_v29 = vld [vmem:[%s3730_s1 + $0x178] sm:$0xf0]  ;;  %v2721_v30 = vld [vmem:[%s3730_s1 + $0x1f4] sm:$0xf]  ;;  %s3080_s3 = scalar_lea.vmem %s3729_s0, %s2657_s23  ;;  %v2594_v41 = vor.u32 %v2708_v27, %v2593_v26  ;;  %v2703_v56 = vld [vmem:[%s3730_s1 + $0x164] sm:$0xf]  ;;  %s3390_s26 = scalar_lea.vmem %s3731_s2, %s2657_s23 }
  0x24   : > { %1180 = vmatpush.bf16.msra.mxu1 %v2482_v7  ;;  %v2651_v32 = vld [vmem:[%s3730_s1 + $0x1f8] sm:$0xf0]  ;;  %v2673_v33 = vld [vmem:[%s3730_s1 + $0x74] sm:$0xf]  ;;  %v2145_v37 = vld [vmem:[%s3080_s3] sm:$0xf]  ;;  %v2590_v45 = vor.u32 %v2705_v28, %v2587_v29 }
  0x25   : > { %1269 = vmatpush.bf16.msra.mxu2 %v2546_v8  ;;  %v2459_v34 = vld [vmem:[%s3730_s1 + $0x78] sm:$0xf0]  ;;  %v2725_v38 = vld [vmem:[%s3080_s3 + $0xc] sm:$0xf0]  ;;  %v2723_v39 = vld [vmem:[%s3080_s3 + $0x4] sm:$0xf]  ;;  %v2654_v49 = vor.u32 %v2721_v30, %v2651_v32 }
  0x26   : > { %1358 = vmatpush.bf16.msra.mxu3 %v2610_v12  ;;  %v2689_v40 = vld [vmem:[%s3730_s1 + $0xf4] sm:$0xf]  ;;  %v2153_v43 = vld [vmem:[%s3080_s3 + $0x8] sm:$0xf]  ;;  %v2726_v44 = vld [vmem:[%s3080_s3 + $0x14] sm:$0xf0]  ;;  %v3100_v46 = vor.u32 %v2725_v38, %v2145_v37  ;;  %v2462_v54 = vor.u32 %v2673_v33, %v2459_v34 }
  0x27   : > { %1092 = vmatpush.bf16.msra.mxu0 %v2410_v17  ;;  %v2147_v42 = vld [vmem:[%s3080_s3 + $0x10] sm:$0xf0]  ;;  %v2724_v47 = vld [vmem:[%s3080_s3 + $0xc] sm:$0xf]  ;;  %v2155_v48 = vld [vmem:[%s3080_s3 + $0x18] sm:$0xf0]  ;;  %v3109_v52 = vor.u32 %v2726_v44, %v2153_v43 }
  0x28   : > { %1181 = vmatpush.bf16.msra.mxu1 %v2474_v21  ;;  %v2523_v50 = vld [vmem:[%s3730_s1 + $0xf8] sm:$0xf0]  ;;  %v3107_v51 = vor.u32 %v2723_v39, %v2147_v42  ;;  %v3111_v53 = vor.u32 %v2724_v47, %v2155_v48  ;;  %v2579_v57 = vld [vmem:[%s3730_s1 + $0x168] sm:$0xf0]  ;;  %v2719_v58 = vld [vmem:[%s3730_s1 + $0x1e4] sm:$0xf] }
  0x29   : > { %1270 = vmatpush.bf16.msra.mxu2 %v2538_v22  ;;  %v2526_v55 = vor.u32 %v2689_v40, %v2523_v50  ;;  %v2582_v59 = vor.u32 %v2703_v56, %v2579_v57  ;;  %v2643_v60 = vld [vmem:[%s3730_s1 + $0x1e8] sm:$0xf0]  ;;  %v2671_v61 = vld [vmem:[%s3730_s1 + $0x64] sm:$0xf]  ;;  %v2161_v4 = vld [vmem:[%s3080_s3 + $0x20] sm:$0xf] }
  0x2a   : > { %1359 = vmatpush.bf16.msra.mxu3 %v2602_v25  ;;  %v2451_v62 = vld [vmem:[%s3730_s1 + $0x68] sm:$0xf0]  ;;  %v2646_v63 = vor.u32 %v2719_v58, %v2643_v60  ;;  %v2687_v1 = vld [vmem:[%s3730_s1 + $0xe4] sm:$0xf]  ;;  %v2729_v5 = vld [vmem:[%s3080_s3 + $0x2c] sm:$0xf0] }
  0x2b   : > { %1093 = vmatpush.bf16.msra.mxu0 %v2402_v31  ;;  %v2454_v0 = vor.u32 %v2671_v61, %v2451_v62  ;;  %v2515_v2 = vld [vmem:[%s3730_s1 + $0xe8] sm:$0xf0]  ;;  %v2727_v6 = vld [vmem:[%s3080_s3 + $0x24] sm:$0xf]  ;;  %v2163_v7 = vld [vmem:[%s3080_s3 + $0x30] sm:$0xf0]  ;;  %v3149_v12 = vor.u32 %v2729_v5, %v2161_v4 }
  0x2c   : > { %1182 = vmatpush.bf16.msra.mxu1 %v2466_v35  ;;  %v2518_v3 = vor.u32 %v2687_v1, %v2515_v2  ;;  %v2169_v8 = vld [vmem:[%s3080_s3 + $0x28] sm:$0xf]  ;;  %v2730_v9 = vld [vmem:[%s3080_s3 + $0x34] sm:$0xf0]  ;;  %v2728_v10 = vld [vmem:[%s3080_s3 + $0x2c] sm:$0xf]  ;;  %v3151_v13 = vor.u32 %v2727_v6, %v2163_v7 }
  0x2d   : > { %1271 = vmatpush.bf16.msra.mxu2 %v2530_v36  ;;  %v2171_v11 = vld [vmem:[%s3080_s3 + $0x38] sm:$0xf0]  ;;  %v3153_v14 = vor.u32 %v2730_v9, %v2169_v8  ;;  %v2177_v16 = vld [vmem:[%s3080_s3 + $0x40] sm:$0xf]  ;;  %v2733_v17 = vld [vmem:[%s3080_s3 + $0x4c] sm:$0xf0] }
  0x2e   : > { %1360 = vmatpush.bf16.msra.mxu3 %v2594_v41  ;;  %1094 = vmatmul.bf16.vlgmr.msra.gmra.mxu0 %v3100_v46  ;;  %v3155_v15 = vor.u32 %v2728_v10, %v2171_v11  ;;  %v2731_v18 = vld [vmem:[%s3080_s3 + $0x44] sm:$0xf]  ;;  %v2179_v19 = vld [vmem:[%s3080_s3 + $0x50] sm:$0xf0]  ;;  %v2185_v20 = vld [vmem:[%s3080_s3 + $0x48] sm:$0xf]  ;;  %v3169_v24 = vor.u32 %v2733_v17, %v2177_v16 }
  0x2f   : > { %1183 = vmatmul.bf16.vlgmr.msra.gmra.mxu1 %v3107_v51  ;;  %1442 = vmatpush.bf16.msrb.mxu0 %v2462_v54  ;;  %v2734_v21 = vld [vmem:[%s3080_s3 + $0x54] sm:$0xf0]  ;;  %v2732_v22 = vld [vmem:[%s3080_s3 + $0x4c] sm:$0xf]  ;;  %v2187_v23 = vld [vmem:[%s3080_s3 + $0x58] sm:$0xf0]  ;;  %v3171_v25 = vor.u32 %v2731_v18, %v2179_v19 }
  0x30   : > { %1272 = vmatmul.bf16.vlgmr.msra.gmra.mxu2 %v3109_v52  ;;  %1531 = vmatpush.bf16.msrb.mxu1 %v2526_v55  ;;  %v3173_v26 = vor.u32 %v2734_v21, %v2185_v20  ;;  %v3175_v27 = vor.u32 %v2732_v22, %v2187_v23  ;;  %v2701_v28 = vld [vmem:[%s3730_s1 + $0x154] sm:$0xf]  ;;  %v2571_v29 = vld [vmem:[%s3730_s1 + $0x158] sm:$0xf0]  ;;  %v2193_v40 = vld [vmem:[%s3080_s3 + $0x60] sm:$0xf] }
  0x31   : > { %1620 = vmatpush.bf16.msrb.mxu2 %v2590_v45  ;;  %1361 = vmatmul.bf16.vlgmr.msra.gmra.mxu3 %v3111_v53  ;;  %v2717_v30 = vld [vmem:[%s3730_s1 + $0x1d4] sm:$0xf]  ;;  %v2574_v31 = vor.u32 %v2701_v28, %v2571_v29  ;;  %v2635_v32 = vld [vmem:[%s3730_s1 + $0x1d8] sm:$0xf0]  ;;  %v2737_v41 = vld [vmem:[%s3080_s3 + $0x6c] sm:$0xf0] }
  0x32   : > { %1709 = vmatpush.bf16.msrb.mxu3 %v2654_v49  ;;  %v2669_v33 = vld [vmem:[%s3730_s1 + $0x54] sm:$0xf]  ;;  %v2443_v34 = vld [vmem:[%s3730_s1 + $0x58] sm:$0xf0]  ;;  %v2638_v35 = vor.u32 %v2717_v30, %v2635_v32  ;;  %v2735_v42 = vld [vmem:[%s3080_s3 + $0x64] sm:$0xf]  ;;  %v3213_v49 = vor.u32 %v2737_v41, %v2193_v40 }
  0x33   : > { %1443 = vmatpush.bf16.msrb.mxu0 %v2454_v0  ;;  %v2446_v36 = vor.u32 %v2669_v33, %v2443_v34  ;;  %v2685_v37 = vld [vmem:[%s3730_s1 + $0xd4] sm:$0xf]  ;;  %v2507_v38 = vld [vmem:[%s3730_s1 + $0xd8] sm:$0xf0]  ;;  %v2201_v44 = vld [vmem:[%s3080_s3 + $0x68] sm:$0xf] }
  0x34   : > { %1532 = vmatpush.bf16.msrb.mxu1 %v2518_v3  ;;  %v2510_v39 = vor.u32 %v2685_v37, %v2507_v38  ;;  %v2195_v43 = vld [vmem:[%s3080_s3 + $0x70] sm:$0xf0]  ;;  %v2738_v45 = vld [vmem:[%s3080_s3 + $0x74] sm:$0xf0]  ;;  %v2736_v47 = vld [vmem:[%s3080_s3 + $0x6c] sm:$0xf] }
  0x35   : > { %1621 = vmatpush.bf16.msrb.mxu2 %v2582_v59  ;;  %v2203_v48 = vld [vmem:[%s3080_s3 + $0x78] sm:$0xf0]  ;;  %v3215_v50 = vor.u32 %v2735_v42, %v2195_v43  ;;  %v3217_v54 = vor.u32 %v2738_v45, %v2201_v44  ;;  %v2209_v56 = vld [vmem:[%s3080_s3 + $0x80] sm:$0xf]  ;;  %v2741_v57 = vld [vmem:[%s3080_s3 + $0x8c] sm:$0xf0] }
  0x36   : > { %1710 = vmatpush.bf16.msrb.mxu3 %v2646_v63  ;;  %v3219_v55 = vor.u32 %v2736_v47, %v2203_v48  ;;  %v2739_v58 = vld [vmem:[%s3080_s3 + $0x84] sm:$0xf]  ;;  %v2211_v59 = vld [vmem:[%s3080_s3 + $0x90] sm:$0xf0]  ;;  %v2217_v60 = vld [vmem:[%s3080_s3 + $0x88] sm:$0xf]  ;;  %v3233_v0 = vor.u32 %v2741_v57, %v2209_v56 }
  0x37   : > { %1444 = vmatpush.bf16.msrb.mxu0 %v2446_v36  ;;  %v2742_v61 = vld [vmem:[%s3080_s3 + $0x94] sm:$0xf0]  ;;  %v2740_v62 = vld [vmem:[%s3080_s3 + $0x8c] sm:$0xf]  ;;  %v2219_v63 = vld [vmem:[%s3080_s3 + $0x98] sm:$0xf0]  ;;  %v3235_v1 = vor.u32 %v2739_v58, %v2211_v59 }
  0x38   : > { %1533 = vmatpush.bf16.msrb.mxu1 %v2510_v39  ;;  %v3237_v2 = vor.u32 %v2742_v61, %v2217_v60  ;;  %v3239_v3 = vor.u32 %v2740_v62, %v2219_v63  ;;  %v2699_v4 = vld [vmem:[%s3730_s1 + $0x144] sm:$0xf]  ;;  %v2563_v5 = vld [vmem:[%s3730_s1 + $0x148] sm:$0xf0]  ;;  %v2225_v20 = vld [vmem:[%s3080_s3 + $0xa0] sm:$0xf] }
  0x39   : > { %1622 = vmatpush.bf16.msrb.mxu2 %v2574_v31  ;;  %v2715_v6 = vld [vmem:[%s3730_s1 + $0x1c4] sm:$0xf]  ;;  %v2566_v7 = vor.u32 %v2699_v4, %v2563_v5  ;;  %v2627_v8 = vld [vmem:[%s3730_s1 + $0x1c8] sm:$0xf0]  ;;  %v2745_v21 = vld [vmem:[%s3080_s3 + $0xac] sm:$0xf0] }
  0x3a   : > { %1711 = vmatpush.bf16.msrb.mxu3 %v2638_v35  ;;  %v2667_v9 = vld [vmem:[%s3730_s1 + $0x44] sm:$0xf]  ;;  %v2435_v10 = vld [vmem:[%s3730_s1 + $0x48] sm:$0xf0]  ;;  %v2630_v11 = vor.u32 %v2715_v6, %v2627_v8  ;;  %v2227_v23 = vld [vmem:[%s3080_s3 + $0xb0] sm:$0xf0]  ;;  %v3277_v32 = vor.u32 %v2745_v21, %v2225_v20 }
  0x3b   : > { %v2438_v16 = vor.u32 %v2667_v9, %v2435_v10  ;;  %v2683_v17 = vld [vmem:[%s3730_s1 + $0xc4] sm:$0xf]  ;;  %v2499_v18 = vld [vmem:[%s3730_s1 + $0xc8] sm:$0xf0]  ;;  %v2233_v28 = vld [vmem:[%s3080_s3 + $0xa8] sm:$0xf] }
  0x3c   : > { %v2502_v19 = vor.u32 %v2683_v17, %v2499_v18  ;;  %v2743_v22 = vld [vmem:[%s3080_s3 + $0xa4] sm:$0xf]  ;;  %v2746_v29 = vld [vmem:[%s3080_s3 + $0xb4] sm:$0xf0]  ;;  %v2744_v30 = vld [vmem:[%s3080_s3 + $0xac] sm:$0xf] }
  0x3d   : > { %1623 = vmatpush.bf16.msrb.mxu2 %v2566_v7  ;;  %1445 = vmatpush.bf16.msrb.mxu0 %v2438_v16  ;;  %v2235_v31 = vld [vmem:[%s3080_s3 + $0xb8] sm:$0xf0]  ;;  %v3279_v33 = vor.u32 %v2743_v22, %v2227_v23  ;;  %v3281_v34 = vor.u32 %v2746_v29, %v2233_v28  ;;  %v2241_v36 = vld [vmem:[%s3080_s3 + $0xc0] sm:$0xf]  ;;  %v2749_v37 = vld [vmem:[%s3080_s3 + $0xcc] sm:$0xf0] }
  0x3e   : > { %1099 = vmatmul.bf16.gmra.mxu0 %v3149_v12  ;;  %1712 = vmatpush.bf16.msrb.mxu3 %v2630_v11  ;;  %v3283_v35 = vor.u32 %v2744_v30, %v2235_v31  ;;  %v2747_v38 = vld [vmem:[%s3080_s3 + $0xc4] sm:$0xf]  ;;  %v2243_v39 = vld [vmem:[%s3080_s3 + $0xd0] sm:$0xf0]  ;;  %v2249_v40 = vld [vmem:[%s3080_s3 + $0xc8] sm:$0xf]  ;;  %v3297_v44 = vor.u32 %v2749_v37, %v2241_v36 }
  0x3f   : > { %1188 = vmatmul.bf16.gmra.mxu1 %v3151_v13  ;;  %v2750_v41 = vld [vmem:[%s3080_s3 + $0xd4] sm:$0xf0]  ;;  %v2748_v42 = vld [vmem:[%s3080_s3 + $0xcc] sm:$0xf]  ;;  %v2251_v43 = vld [vmem:[%s3080_s3 + $0xd8] sm:$0xf0]  ;;  %v3299_v45 = vor.u32 %v2747_v38, %v2243_v39 }
  0x40   : > { %1277 = vmatmul.bf16.gmra.mxu2 %v3153_v14  ;;  %1534 = vmatpush.bf16.msrb.mxu1 %v2502_v19  ;;  %v3301_v47 = vor.u32 %v2750_v41, %v2249_v40  ;;  %v3303_v48 = vor.u32 %v2748_v42, %v2251_v43  ;;  %v2697_v56 = vld [vmem:[%s3730_s1 + $0x134] sm:$0xf]  ;;  %v2555_v57 = vld [vmem:[%s3730_s1 + $0x138] sm:$0xf0]  ;;  %v2257_v62 = vld [vmem:[%s3080_s3 + $0xe0] sm:$0xf] }
  0x41   : > { %1366 = vmatmul.bf16.gmra.mxu3 %v3155_v15  ;;  %v2713_v58 = vld [vmem:[%s3730_s1 + $0x1b4] sm:$0xf]  ;;  %v2558_v59 = vor.u32 %v2697_v56, %v2555_v57  ;;  %v2619_v60 = vld [vmem:[%s3730_s1 + $0x1b8] sm:$0xf0]  ;;  %v2753_v63 = vld [vmem:[%s3080_s3 + $0xec] sm:$0xf0] }
  0x42   : > { %v2622_v61 = vor.u32 %v2713_v58, %v2619_v60  ;;  %v2751_v4 = vld [vmem:[%s3080_s3 + $0xe4] sm:$0xf]  ;;  %v2259_v5 = vld [vmem:[%s3080_s3 + $0xf0] sm:$0xf0]  ;;  %v2427_v7 = vld [vmem:[%s3730_s1 + $0x38] sm:$0xf0]  ;;  %v3341_v20 = vor.u32 %v2753_v63, %v2257_v62 }
  0x43   : > { %1624 = vmatpush.bf16.msrb.mxu2 %v2558_v59  ;;  %v2665_v6 = vld [vmem:[%s3730_s1 + $0x34] sm:$0xf]  ;;  %v2265_v9 = vld [vmem:[%s3080_s3 + $0xe8] sm:$0xf]  ;;  %v2754_v10 = vld [vmem:[%s3080_s3 + $0xf4] sm:$0xf0]  ;;  %v3343_v21 = vor.u32 %v2751_v4, %v2259_v5 }
  0x44   : > { %1713 = vmatpush.bf16.msrb.mxu3 %v2622_v61  ;;  %v2681_v8 = vld [vmem:[%s3730_s1 + $0xb4] sm:$0xf]  ;;  %v2430_v11 = vor.u32 %v2665_v6, %v2427_v7  ;;  %v2491_v16 = vld [vmem:[%s3730_s1 + $0xb8] sm:$0xf0]  ;;  %v2752_v17 = vld [vmem:[%s3080_s3 + $0xec] sm:$0xf]  ;;  %v3345_v22 = vor.u32 %v2754_v10, %v2265_v9 }
  0x45   : > { %v2267_v18 = vld [vmem:[%s3080_s3 + $0xf8] sm:$0xf0]  ;;  %v2494_v19 = vor.u32 %v2681_v8, %v2491_v16  ;;  %v2273_v28 = vld [vmem:[%s3080_s3 + $0x100] sm:$0xf]  ;;  %v2757_v29 = vld [vmem:[%s3080_s3 + $0x10c] sm:$0xf0] }
  0x46   : > { %1446 = vmatpush.bf16.msrb.mxu0 %v2430_v11  ;;  %v3347_v23 = vor.u32 %v2752_v17, %v2267_v18  ;;  %v2755_v30 = vld [vmem:[%s3080_s3 + $0x104] sm:$0xf]  ;;  %v2275_v31 = vld [vmem:[%s3080_s3 + $0x110] sm:$0xf0]  ;;  %v2281_v36 = vld [vmem:[%s3080_s3 + $0x108] sm:$0xf]  ;;  %v3361_v40 = vor.u32 %v2757_v29, %v2273_v28 }
  0x47   : > { %1535 = vmatpush.bf16.msrb.mxu1 %v2494_v19  ;;  %v2758_v37 = vld [vmem:[%s3080_s3 + $0x114] sm:$0xf0]  ;;  %v2756_v38 = vld [vmem:[%s3080_s3 + $0x10c] sm:$0xf]  ;;  %v2283_v39 = vld [vmem:[%s3080_s3 + $0x118] sm:$0xf0]  ;;  %v3363_v42 = vor.u32 %v2755_v30, %v2275_v31 }
  0x48   : > { %v3365_v43 = vor.u32 %v2758_v37, %v2281_v36  ;;  %v3367_v57 = vor.u32 %v2756_v38, %v2283_v39  ;;  %v2695_v59 = vld [vmem:[%s3730_s1 + $0x124] sm:$0xf]  ;;  %v2547_v60 = vld [vmem:[%s3730_s1 + $0x128] sm:$0xf0]  ;;  %v2289_v11 = vld [vmem:[%s3080_s3 + $0x120] sm:$0xf] }
  0x49   : > { %v2711_v61 = vld [vmem:[%s3730_s1 + $0x1a4] sm:$0xf]  ;;  %v2550_v62 = vor.u32 %v2695_v59, %v2547_v60  ;;  %v2611_v63 = vld [vmem:[%s3730_s1 + $0x1a8] sm:$0xf0]  ;;  %v2761_v16 = vld [vmem:[%s3080_s3 + $0x12c] sm:$0xf0] }
  0x4a   : > { %v2614_v5 = vor.u32 %v2711_v61, %v2611_v63  ;;  %v2759_v17 = vld [vmem:[%s3080_s3 + $0x124] sm:$0xf]  ;;  %v2291_v18 = vld [vmem:[%s3080_s3 + $0x130] sm:$0xf0]  ;;  %v2419_v28 = vld [vmem:[%s3730_s1 + $0x28] sm:$0xf0]  ;;  %v3413_v59 = vor.u32 %v2761_v16, %v2289_v11 }
  0x4b   : > { %1625 = vmatpush.bf16.msrb.mxu2 %v2550_v62  ;;  %v2663_v19 = vld [vmem:[%s3730_s1 + $0x24] sm:$0xf]  ;;  %v2297_v30 = vld [vmem:[%s3080_s3 + $0x128] sm:$0xf]  ;;  %v2762_v31 = vld [vmem:[%s3080_s3 + $0x134] sm:$0xf0]  ;;  %v3415_v63 = vor.u32 %v2759_v17, %v2291_v18 }
  0x4c   : > { %1714 = vmatpush.bf16.msrb.mxu3 %v2614_v5  ;;  %v2679_v29 = vld [vmem:[%s3730_s1 + $0xa4] sm:$0xf]  ;;  %v2422_v36 = vor.u32 %v2663_v19, %v2419_v28  ;;  %v2483_v37 = vld [vmem:[%s3730_s1 + $0xa8] sm:$0xf0]  ;;  %v2305_v19 = vld [vmem:[%s3080_s3 + $0x140] sm:$0xf] }
  0x4d   : > { %v2760_v39 = vld [vmem:[%s3080_s3 + $0x12c] sm:$0xf]  ;;  %v2765_v28 = vld [vmem:[%s3080_s3 + $0x14c] sm:$0xf0] }
  0x4e   : > { %1104 = vmatmul.bf16.gmra.mxu0 %v3169_v24 }
  0x4f   : > { %1193 = vmatmul.bf16.gmra.mxu1 %v3171_v25  ;;  %1447 = vmatpush.bf16.msrb.mxu0 %v2422_v36  ;;  %v2766_v36 = vld [vmem:[%s3080_s3 + $0x154] sm:$0xf0] }
  0x50   : > { %1282 = vmatmul.bf16.gmra.mxu2 %v3173_v26 }
  0x51   : > { %1371 = vmatmul.bf16.gmra.mxu3 %v3175_v27 }
  0x5e   : > { %1109 = vmatmul.bf16.gmra.mxu0 %v3213_v49 }
  0x5f   : > { %1198 = vmatmul.bf16.gmra.mxu1 %v3215_v50 }
  0x60   : > { %1287 = vmatmul.bf16.gmra.mxu2 %v3217_v54 }
  0x61   : > { %1376 = vmatmul.bf16.gmra.mxu3 %v3219_v55 }
  0x6e   : > { %1114 = vmatmul.bf16.gmra.mxu0 %v3233_v0 }
  0x6f   : > { %1203 = vmatmul.bf16.gmra.mxu1 %v3235_v1 }
  0x70   : > { %1292 = vmatmul.bf16.gmra.mxu2 %v3237_v2 }
  0x71   : > { %1381 = vmatmul.bf16.gmra.mxu3 %v3239_v3 }
  0x7e   : > { %1119 = vmatmul.bf16.gmra.mxu0 %v3277_v32 }
  0x7f   : > { %1208 = vmatmul.bf16.gmra.mxu1 %v3279_v33 }
  0x80   : > { %1297 = vmatmul.bf16.gmra.mxu2 %v3281_v34 }
  0x81   : > { %1386 = vmatmul.bf16.gmra.mxu3 %v3283_v35 }
  0x8e   : > { %1124 = vmatmul.bf16.gmra.mxu0 %v3297_v44 }
  0x8f   : > { %1213 = vmatmul.bf16.gmra.mxu1 %v3299_v45 }
  0x90   : > { %1302 = vmatmul.bf16.gmra.mxu2 %v3301_v47 }
  0x91   : > { %1391 = vmatmul.bf16.gmra.mxu3 %v3303_v48 }
  0x9e   : > { %1129 = vmatmul.bf16.gmra.mxu0 %v3341_v20 }
  0x9f   : > { %1218 = vmatmul.bf16.gmra.mxu1 %v3343_v21 }
  0xa0   : > { %1307 = vmatmul.bf16.gmra.mxu2 %v3345_v22 }
  0xa1   : > { %1396 = vmatmul.bf16.gmra.mxu3 %v3347_v23 }
  0xab   : > { %v1095_v41 = vpop.f32.mrf.mxu0 }
  0xac   : > { %v1184_v56 = vpop.f32.mrf.mxu1 }
  0xad   : > { %v1185_v58 = vadd.f32 %v1184_v56, %v1095_v41  ;;  %v2299_v41 = vld [vmem:[%s3080_s3 + $0x138] sm:$0xf0]  ;;  %v2486_v56 = vor.u32 %v2679_v29, %v2483_v37  ;;  %v2763_v29 = vld [vmem:[%s3080_s3 + $0x144] sm:$0xf] }
  0xae   : > { %1134 = vmatmul.bf16.gmra.mxu0 %v3361_v40 }
  0xaf   : > { %1223 = vmatmul.bf16.gmra.mxu1 %v3363_v42 }
  0xb0   : > { %1312 = vmatmul.bf16.gmra.mxu2 %v3365_v43  ;;  %1536 = vmatpush.bf16.msrb.mxu1 %v2486_v56  ;;  %v3435_v56 = vor.u32 %v2765_v28, %v2305_v19  ;;  %v2603_v19 = vld [vmem:[%s3730_s1 + $0x198] sm:$0xf0] }
  0xb1   : > { %1401 = vmatmul.bf16.gmra.mxu3 %v3367_v57 }
  0xb3   : > { %v1273_v4 = vpop.f32.mrf.mxu2  ;;  %v1097_v8 = vpop.f32.mrf.mxu0 }
  0xb4   : > { %v1274_v6 = vadd.f32 %v1273_v4, %v1185_v58  ;;  %v1362_v7 = vpop.f32.mrf.mxu3  ;;  %v1186_v9 = vpop.f32.mrf.mxu1  ;;  %v3417_v4 = vor.u32 %v2762_v31, %v2297_v30  ;;  %v2307_v30 = vld [vmem:[%s3080_s3 + $0x150] sm:$0xf0]  ;;  %v2313_v31 = vld [vmem:[%s3080_s3 + $0x148] sm:$0xf] }
  0xb5   : > { %v1187_v38 = vadd.f32 %v1186_v9, %v1097_v8 }
  0xb6   : > { %v1363_v10 = vadd.f32 %v1362_v7, %v1274_v6  ;;  %v3419_v6 = vor.u32 %v2760_v39, %v2299_v41  ;;  %v2315_v39 = vld [vmem:[%s3080_s3 + $0x158] sm:$0xf0] }
  0xb8   : > { %1993 = vst [vmem:[%s3390_s26] sm:$0xff] %v1363_v10 }
  0xbb   : > { %v1275_v58 = vpop.f32.mrf.mxu2  ;;  %v1100_v62 = vpop.f32.mrf.mxu0 }
  0xbc   : > { %v1276_v60 = vadd.f32 %v1275_v58, %v1187_v38  ;;  %v1364_v61 = vpop.f32.mrf.mxu3  ;;  %v1189_v5 = vpop.f32.mrf.mxu1  ;;  %v2764_v38 = vld [vmem:[%s3080_s3 + $0x14c] sm:$0xf] }
  0xbd   : > { %v1190_v8 = vadd.f32 %v1189_v5, %v1100_v62  ;;  %v3437_v62 = vor.u32 %v2763_v29, %v2307_v30  ;;  %v3439_v5 = vor.u32 %v2766_v36, %v2313_v31 }
  0xbe   : > { %v1365_v7 = vadd.f32 %v1364_v61, %v1276_v60  ;;  %1139 = vmatmul.bf16.gmra.mxu0 %v3413_v59 }
  0xbf   : > { %1228 = vmatmul.bf16.gmra.mxu1 %v3415_v63  ;;  %3749 = vst [vmem:[#allocation3_spill] sm:$0xff] %v3437_v62 }
  0xc0   : > { %1995 = vst [vmem:[%s3390_s26 + $0x10] sm:$0xff] %v1365_v7  ;;  %1317 = vmatmul.bf16.gmra.mxu2 %v3417_v4 }
  0xc1   : > { %1406 = vmatmul.bf16.gmra.mxu3 %v3419_v6  ;;  %3750 = vst [vmem:[#allocation4_spill] sm:$0xff] %v3439_v5 }
  0xc3   : > { %v1278_v9 = vpop.f32.mrf.mxu2  ;;  %v1102_v16 = vpop.f32.mrf.mxu0 }
  0xc4   : > { %v1279_v10 = vadd.f32 %v1278_v9, %v1190_v8  ;;  %v1367_v11 = vpop.f32.mrf.mxu3  ;;  %v1191_v17 = vpop.f32.mrf.mxu1  ;;  %v3441_v8 = vor.u32 %v2764_v38, %v2315_v39  ;;  %v2321_v39 = vld [vmem:[%s3080_s3 + $0x160] sm:$0xf] }
  0xc5   : > { %v1192_v37 = vadd.f32 %v1191_v17, %v1102_v16  ;;  %v2539_v16 = vld [vmem:[%s3730_s1 + $0x118] sm:$0xf0]  ;;  %v2709_v17 = vld [vmem:[%s3730_s1 + $0x194] sm:$0xf] }
  0xc6   : > { %v1368_v18 = vadd.f32 %v1367_v11, %v1279_v10  ;;  %3751 = vst [vmem:[#allocation5_spill] sm:$0xff] %v3441_v8  ;;  %v2693_v11 = vld [vmem:[%s3730_s1 + $0x114] sm:$0xf]  ;;  %v2606_v29 = vor.u32 %v2709_v17, %v2603_v19  ;;  %v2475_v17 = vld [vmem:[%s3730_s1 + $0x98] sm:$0xf0] }
  0xc7   : > { %v2768_v19 = vld [vmem:[%s3080_s3 + $0x16c] sm:$0xf] }
  0xc8   : > { %1997 = vst [vmem:[%s3390_s26 + $0x20] sm:$0xff] %v1368_v18  ;;  %v2542_v18 = vor.u32 %v2693_v11, %v2539_v16  ;;  %1715 = vmatpush.bf16.msrb.mxu3 %v2606_v29  ;;  %v2677_v16 = vld [vmem:[%s3730_s1 + $0x94] sm:$0xf] }
  0xc9   : > { %v2478_v29 = vor.u32 %v2677_v16, %v2475_v17  ;;  %v2773_v16 = vld [vmem:[%s3080_s3 + $0x18c] sm:$0xf0]  ;;  %v2771_v17 = vld [vmem:[%s3080_s3 + $0x184] sm:$0xf] }
  0xca   : > { %1626 = vmatpush.bf16.msrb.mxu2 %v2542_v18 }
  0xcb   : > { %v1280_v41 = vpop.f32.mrf.mxu2  ;;  %v1105_v61 = vpop.f32.mrf.mxu0  ;;  %1537 = vmatpush.bf16.msrb.mxu1 %v2478_v29  ;;  %v2772_v29 = vld [vmem:[%s3080_s3 + $0x18c] sm:$0xf] }
  0xcc   : > { %v1281_v58 = vadd.f32 %v1280_v41, %v1192_v37  ;;  %v1369_v60 = vpop.f32.mrf.mxu3  ;;  %v1194_v7 = vpop.f32.mrf.mxu1  ;;  %v2769_v41 = vld [vmem:[%s3080_s3 + $0x16c] sm:$0xf0] }
  0xcd   : > { %v1195_v10 = vadd.f32 %v1194_v7, %v1105_v61  ;;  %v2329_v61 = vld [vmem:[%s3080_s3 + $0x168] sm:$0xf]  ;;  %v2661_v7 = vld [vmem:[%s3730_s1 + $0x14] sm:$0xf] }
  0xce   : > { %v1370_v9 = vadd.f32 %v1369_v60, %v1281_v58  ;;  %1144 = vmatmul.bf16.gmra.mxu0 %v3435_v56  ;;  %v2767_v58 = vld [vmem:[%s3080_s3 + $0x164] sm:$0xf]  ;;  %v2323_v60 = vld [vmem:[%s3080_s3 + $0x170] sm:$0xf0] }
  0xcf   : > { %1233 = vmatmul.bf16.gmra.mxu1 %v3437_v62 }
  0xd0   : > { %1999 = vst [vmem:[%s3390_s26 + $0x30] sm:$0xff] %v1370_v9  ;;  %1322 = vmatmul.bf16.gmra.mxu2 %v3439_v5  ;;  %v2411_v9 = vld [vmem:[%s3730_s1 + $0x18] sm:$0xf0] }
  0xd1   : > { %1411 = vmatmul.bf16.gmra.mxu3 %v3441_v8  ;;  %v2414_v11 = vor.u32 %v2661_v7, %v2411_v9  ;;  %v3483_v9 = vor.u32 %v2767_v58, %v2323_v60 }
  0xd3   : > { %v1283_v28 = vpop.f32.mrf.mxu2  ;;  %v1107_v36 = vpop.f32.mrf.mxu0  ;;  %1448 = vmatpush.bf16.msrb.mxu0 %v2414_v11  ;;  %3753 = vst [vmem:[#allocation7_spill] sm:$0xff] %v3483_v9  ;;  %v2337_v11 = vld [vmem:[%s3080_s3 + $0x180] sm:$0xf] }
  0xd4   : > { %v1284_v30 = vadd.f32 %v1283_v28, %v1195_v10  ;;  %v1372_v31 = vpop.f32.mrf.mxu3  ;;  %v1196_v37 = vpop.f32.mrf.mxu1  ;;  %v2770_v10 = vld [vmem:[%s3080_s3 + $0x174] sm:$0xf0]  ;;  %v2331_v28 = vld [vmem:[%s3080_s3 + $0x178] sm:$0xf0] }
  0xd5   : > { %v1197_v18 = vadd.f32 %v1196_v37, %v1107_v36  ;;  %v3485_v5 = vor.u32 %v2770_v10, %v2329_v61  ;;  %v3487_v36 = vor.u32 %v2768_v19, %v2331_v28  ;;  %v2774_v19 = vld [vmem:[%s3080_s3 + $0x194] sm:$0xf0] }
  0xd6   : > { %v1373_v38 = vadd.f32 %v1372_v31, %v1284_v30  ;;  %v3481_v31 = vor.u32 %v2769_v41, %v2321_v39 }
  0xd7   : > { %3754 = vst [vmem:[#allocation8_spill] sm:$0xff] %v3485_v5 }
  0xd8   : > { %2001 = vst [vmem:[%s3390_s26 + $0x40] sm:$0xff] %v1373_v38 }
  0xd9   : > { %3752 = vst [vmem:[#allocation6_spill] sm:$0xff] %v3481_v31 }
  0xda   : > { %3755 = vst [vmem:[#allocation9_spill] sm:$0xff] %v3487_v36 }
  0xdb   : > { %v1285_v30 = vpop.f32.mrf.mxu2  ;;  %v1110_v7 = vpop.f32.mrf.mxu0 }
  0xdc   : > { %v1286_v38 = vadd.f32 %v1285_v30, %v1197_v18  ;;  %v1374_v8 = vpop.f32.mrf.mxu3  ;;  %v1199_v62 = vpop.f32.mrf.mxu1  ;;  %v2345_v18 = vld [vmem:[%s3080_s3 + $0x188] sm:$0xf]  ;;  %v2347_v30 = vld [vmem:[%s3080_s3 + $0x198] sm:$0xf0] }
  0xdd   : > { %v1200_v39 = vadd.f32 %v1199_v62, %v1110_v7  ;;  %v2339_v62 = vld [vmem:[%s3080_s3 + $0x190] sm:$0xf0]  ;;  %v3503_v7 = vor.u32 %v2773_v16, %v2337_v11  ;;  %v2531_v11 = vld [vmem:[%s3730_s1 + $0x108] sm:$0xf0] }
  0xde   : > { %v1375_v37 = vadd.f32 %v1374_v8, %v1286_v38  ;;  %1149 = vmatmul.bf16.gmra.mxu0 %v3481_v31 }
  0xdf   : > { %1238 = vmatmul.bf16.gmra.mxu1 %v3483_v9  ;;  %3756 = vst [vmem:[#allocation10_spill] sm:$0xff] %v3503_v7 }
  0xe0   : > { %2003 = vst [vmem:[%s3390_s26 + $0x50] sm:$0xff] %v1375_v37  ;;  %1327 = vmatmul.bf16.gmra.mxu2 %v3485_v5 }
  0xe1   : > { %1416 = vmatmul.bf16.gmra.mxu3 %v3487_v36  ;;  %v3505_v36 = vor.u32 %v2771_v17, %v2339_v62  ;;  %v2595_v17 = vld [vmem:[%s3730_s1 + $0x188] sm:$0xf0] }
  0xe3   : > { %v1288_v41 = vpop.f32.mrf.mxu2  ;;  %v1112_v8 = vpop.f32.mrf.mxu0  ;;  %3757 = vst [vmem:[#allocation11_spill] sm:$0xff] %v3505_v36 }
  0xe4   : > { %v1289_v58 = vadd.f32 %v1288_v41, %v1200_v39  ;;  %v1377_v60 = vpop.f32.mrf.mxu3  ;;  %v1201_v61 = vpop.f32.mrf.mxu1 }
  0xe5   : > { %v1202_v28 = vadd.f32 %v1201_v61, %v1112_v8  ;;  %v2691_v61 = vld [vmem:[%s3730_s1 + $0x104] sm:$0xf] }
  0xe6   : > { %v1378_v10 = vadd.f32 %v1377_v60, %v1289_v58  ;;  %v3507_v58 = vor.u32 %v2774_v19, %v2345_v18  ;;  %v2534_v16 = vor.u32 %v2691_v61, %v2531_v11  ;;  %v2361_v61 = vld [vmem:[%s3080_s3 + $0x1a8] sm:$0xf]  ;;  %v2659_v11 = vld [vmem:[%s3730_s1 + $0x4] sm:$0xf] }
  0xe8   : > { %2005 = vst [vmem:[%s3390_s26 + $0x60] sm:$0xff] %v1378_v10  ;;  %v3509_v10 = vor.u32 %v2772_v29, %v2347_v30  ;;  %1627 = vmatpush.bf16.msrb.mxu2 %v2534_v16 }
  0xe9   : > { %3758 = vst [vmem:[#allocation12_spill] sm:$0xff] %v3507_v58 }
  0xea   : > { %3759 = vst [vmem:[#allocation13_spill] sm:$0xff] %v3509_v10 }
  0xeb   : > { %v1290_v38 = vpop.f32.mrf.mxu2  ;;  %v1115_v41 = vpop.f32.mrf.mxu0 }
  0xec   : > { %v1291_v37 = vadd.f32 %v1290_v38, %v1202_v28  ;;  %v1379_v39 = vpop.f32.mrf.mxu3  ;;  %v1204_v60 = vpop.f32.mrf.mxu1 }
  0xed   : > { %v1205_v8 = vadd.f32 %v1204_v60, %v1115_v41  ;;  %v2775_v41 = vld [vmem:[%s3080_s3 + $0x1a4] sm:$0xf]  ;;  %v2355_v60 = vld [vmem:[%s3080_s3 + $0x1b0] sm:$0xf0] }
  0xee   : > { %v1380_v5 = vadd.f32 %v1379_v39, %v1291_v37  ;;  %1154 = vmatmul.bf16.gmra.mxu0 %v3503_v7  ;;  %v2353_v37 = vld [vmem:[%s3080_s3 + $0x1a0] sm:$0xf]  ;;  %v2777_v39 = vld [vmem:[%s3080_s3 + $0x1ac] sm:$0xf0] }
  0xef   : > { %1243 = vmatmul.bf16.gmra.mxu1 %v3505_v36 }
  0xf0   : > { %2007 = vst [vmem:[%s3390_s26 + $0x70] sm:$0xff] %v1380_v5  ;;  %1332 = vmatmul.bf16.gmra.mxu2 %v3507_v58  ;;  %v2707_v5 = vld [vmem:[%s3730_s1 + $0x184] sm:$0xf]  ;;  %v3549_v58 = vor.u32 %v2777_v39, %v2353_v37 }
  0xf1   : > { %1421 = vmatmul.bf16.gmra.mxu3 %v3509_v10  ;;  %v2598_v18 = vor.u32 %v2707_v5, %v2595_v17  ;;  %v2778_v5 = vld [vmem:[%s3080_s3 + $0x1b4] sm:$0xf0]  ;;  %v2675_v17 = vld [vmem:[%s3730_s1 + $0x84] sm:$0xf] }
  0xf2   : > { %v3553_v9 = vor.u32 %v2778_v5, %v2361_v61  ;;  %v2369_v61 = vld [vmem:[%s3080_s3 + $0x1c0] sm:$0xf]  ;;  %v2781_v5 = vld [vmem:[%s3080_s3 + $0x1cc] sm:$0xf0] }
  0xf3   : > { %v1293_v62 = vpop.f32.mrf.mxu2  ;;  %v1117_v29 = vpop.f32.mrf.mxu0  ;;  %1716 = vmatpush.bf16.msrb.mxu3 %v2598_v18 }
  0xf4   : > { %v1294_v19 = vadd.f32 %v1293_v62, %v1205_v8  ;;  %v1382_v28 = vpop.f32.mrf.mxu3  ;;  %v1206_v30 = vpop.f32.mrf.mxu1  ;;  %v2403_v8 = vld [vmem:[%s3730_s1 + $0x8] sm:$0xf0]  ;;  %3760 = vst [vmem:[#allocation14_spill] sm:$0xff] %v3553_v9 }
  0xf5   : > { %v2406_v16 = vor.u32 %v2659_v11, %v2403_v8  ;;  %v2467_v62 = vld [vmem:[%s3730_s1 + $0x88] sm:$0xf0]  ;;  %v1207_v18 = vadd.f32 %v1206_v30, %v1117_v29  ;;  %v3551_v8 = vor.u32 %v2775_v41, %v2355_v60 }
  0xf6   : > { %v1383_v38 = vadd.f32 %v1382_v28, %v1294_v19  ;;  %v2776_v19 = vld [vmem:[%s3080_s3 + $0x1ac] sm:$0xf]  ;;  %v2363_v28 = vld [vmem:[%s3080_s3 + $0x1b8] sm:$0xf0] }
  0xf7   : > { %1449 = vmatpush.bf16.msrb.mxu0 %v2406_v16  ;;  %v3555_v29 = vor.u32 %v2776_v19, %v2363_v28  ;;  %v2779_v16 = vld [vmem:[%s3080_s3 + $0x1c4] sm:$0xf]  ;;  %v2780_v19 = vld [vmem:[%s3080_s3 + $0x1cc] sm:$0xf]  ;;  %v2379_v28 = vld [vmem:[%s3080_s3 + $0x1d8] sm:$0xf0] }
  0xf8   : > { %2009 = vst [vmem:[%s3390_s26 + $0x80] sm:$0xff] %v1383_v38  ;;  %v2470_v38 = vor.u32 %v2675_v17, %v2467_v62  ;;  %v2377_v17 = vld [vmem:[%s3080_s3 + $0x1c8] sm:$0xf]  ;;  %v2782_v62 = vld [vmem:[%s3080_s3 + $0x1d4] sm:$0xf0] }
  0xf9   : > { %3761 = vst [vmem:[#allocation15_spill] sm:$0xff] %v3555_v29 }
  0xfa   : > { %1538 = vmatpush.bf16.msrb.mxu1 %v2470_v38 }
  0xfb   : > { %v1295_v10 = vpop.f32.mrf.mxu2  ;;  %v1120_v11 = vpop.f32.mrf.mxu0 }
  0xfc   : > { %v1296_v36 = vadd.f32 %v1295_v10, %v1207_v18  ;;  %v1384_v7 = vpop.f32.mrf.mxu3  ;;  %v1209_v31 = vpop.f32.mrf.mxu1 }
  0xfd   : > { %v1210_v10 = vadd.f32 %v1209_v31, %v1120_v11  ;;  %v2371_v31 = vld [vmem:[%s3080_s3 + $0x1d0] sm:$0xf0]  ;;  %v3571_v11 = vor.u32 %v2781_v5, %v2369_v61 }
  0xfe   : > { %v1385_v30 = vadd.f32 %v1384_v7, %v1296_v36  ;;  %1159 = vmatmul.bf16.gmra.mxu0 %v3549_v58 }
  0xff   : > { %1248 = vmatmul.bf16.gmra.mxu1 %v3551_v8  ;;  %3762 = vst [vmem:[#allocation16_spill] sm:$0xff] %v3571_v11 }
 0x100   : > { %2011 = vst [vmem:[%s3390_s26 + $0x90] sm:$0xff] %v1385_v30  ;;  %1337 = vmatmul.bf16.gmra.mxu2 %v3553_v9 }
 0x101   : > { %1426 = vmatmul.bf16.gmra.mxu3 %v3555_v29  ;;  %v3573_v29 = vor.u32 %v2779_v16, %v2371_v31 }
 0x103   : > { %v1298_v37 = vpop.f32.mrf.mxu2  ;;  %v1122_v36 = vpop.f32.mrf.mxu0  ;;  %3763 = vst [vmem:[#allocation17_spill] sm:$0xff] %v3573_v29 }
 0x104   : > { %v1299_v39 = vadd.f32 %v1298_v37, %v1210_v10  ;;  %v1387_v41 = vpop.f32.mrf.mxu3  ;;  %v1211_v7 = vpop.f32.mrf.mxu1 }
 0x105   : > { %v1212_v18 = vadd.f32 %v1211_v7, %v1122_v36 }
 0x106   : > { %v1388_v60 = vadd.f32 %v1387_v41, %v1299_v39  ;;  %v3575_v39 = vor.u32 %v2782_v62, %v2377_v17  ;;  %v2385_v62 = vld [vmem:[%s3080_s3 + $0x1e0] sm:$0xf] }
 0x108   : > { %2013 = vst [vmem:[%s3390_s26 + $0xa0] sm:$0xff] %v1388_v60  ;;  %v3577_v60 = vor.u32 %v2780_v19, %v2379_v28  ;;  %v2387_v19 = vld [vmem:[%s3080_s3 + $0x1f0] sm:$0xf0]  ;;  %v2393_v28 = vld [vmem:[%s3080_s3 + $0x1e8] sm:$0xf] }
 0x109   : > { %3764 = vst [vmem:[#allocation18_spill] sm:$0xff] %v3575_v39 }
 0x10a   : > { %3765 = vst [vmem:[#allocation19_spill] sm:$0xff] %v3577_v60 }
 0x10b   : > { %v1300_v38 = vpop.f32.mrf.mxu2  ;;  %v1125_v37 = vpop.f32.mrf.mxu0 }
 0x10c   : > { %v1301_v30 = vadd.f32 %v1300_v38, %v1212_v18  ;;  %v1389_v10 = vpop.f32.mrf.mxu3  ;;  %v1214_v41 = vpop.f32.mrf.mxu1  ;;  %v2783_v18 = vld [vmem:[%s3080_s3 + $0x1e4] sm:$0xf]  ;;  %v2786_v38 = vld [vmem:[%s3080_s3 + $0x1f4] sm:$0xf0] }
 0x10d   : > { %v1215_v36 = vadd.f32 %v1214_v41, %v1125_v37  ;;  %v2395_v37 = vld [vmem:[%s3080_s3 + $0x1f8] sm:$0xf0] }
 0x10e   : > { %v1390_v9 = vadd.f32 %v1389_v10, %v1301_v30  ;;  %1164 = vmatmul.bf16.gmra.mxu0 %v3571_v11  ;;  %v2784_v10 = vld [vmem:[%s3080_s3 + $0x1ec] sm:$0xf] }
 0x10f   : > { %1253 = vmatmul.bf16.gmra.mxu1 %v3573_v29  ;;  %v3595_v29 = vor.u32 %v2783_v18, %v2387_v19 }
 0x110   : > { %2015 = vst [vmem:[%s3390_s26 + $0xb0] sm:$0xff] %v1390_v9  ;;  %1342 = vmatmul.bf16.gmra.mxu2 %v3575_v39  ;;  %v2785_v9 = vld [vmem:[%s3080_s3 + $0x1ec] sm:$0xf0] }
 0x111   : > { %1431 = vmatmul.bf16.gmra.mxu3 %v3577_v60  ;;  %v3593_v60 = vor.u32 %v2785_v9, %v2385_v62 }
 0x113   : > { %v1303_v7 = vpop.f32.mrf.mxu2  ;;  %v1127_v16 = vpop.f32.mrf.mxu0 }
 0x114   : > { %v1304_v61 = vadd.f32 %v1303_v7, %v1215_v36  ;;  %v1392_v5 = vpop.f32.mrf.mxu3  ;;  %v1216_v31 = vpop.f32.mrf.mxu1 }
 0x115   : > { %v1217_v30 = vadd.f32 %v1216_v31, %v1127_v16 }
 0x116   : > { %v1393_v17 = vadd.f32 %v1392_v5, %v1304_v61  ;;  %v3597_v61 = vor.u32 %v2786_v38, %v2393_v28 }
 0x118   : > { %2017 = vst [vmem:[%s3390_s26 + $0xc0] sm:$0xff] %v1393_v17  ;;  %v3599_v17 = vor.u32 %v2784_v10, %v2395_v37 }
 0x11b   : > { %v1305_v41 = vpop.f32.mrf.mxu2  ;;  %v1130_v7 = vpop.f32.mrf.mxu0 }
 0x11c   : > { %v1306_v39 = vadd.f32 %v1305_v41, %v1217_v30  ;;  %v1394_v36 = vpop.f32.mrf.mxu3  ;;  %v1219_v5 = vpop.f32.mrf.mxu1 }
 0x11d   : > { %v1220_v16 = vadd.f32 %v1219_v5, %v1130_v7 }
 0x11e   : > { %v1395_v11 = vadd.f32 %v1394_v36, %v1306_v39  ;;  %1169 = vmatmul.bf16.gmra.mxu0 %v3593_v60 }
 0x11f   : > { %1258 = vmatmul.bf16.gmra.mxu1 %v3595_v29 }
 0x120   : > { %2019 = vst [vmem:[%s3390_s26 + $0xd0] sm:$0xff] %v1395_v11  ;;  %1347 = vmatmul.bf16.gmra.mxu2 %v3597_v61 }
 0x121   : > { %1436 = vmatmul.bf16.gmra.mxu3 %v3599_v17 }
 0x123   : > { %v1308_v31 = vpop.f32.mrf.mxu2  ;;  %v1132_v18 = vpop.f32.mrf.mxu0 }
 0x124   : > { %v1309_v62 = vadd.f32 %v1308_v31, %v1220_v16  ;;  %v1397_v9 = vpop.f32.mrf.mxu3  ;;  %v1221_v19 = vpop.f32.mrf.mxu1 }
 0x125   : > { %v1222_v38 = vadd.f32 %v1221_v19, %v1132_v18 }
 0x126   : > { %v1398_v28 = vadd.f32 %v1397_v9, %v1309_v62 }
 0x128   : > { %2021 = vst [vmem:[%s3390_s26 + $0xe0] sm:$0xff] %v1398_v28 }
 0x12b   : > { %v1310_v39 = vpop.f32.mrf.mxu2  ;;  %v1135_v11 = vpop.f32.mrf.mxu0 }
 0x12c   : > { %v1311_v30 = vadd.f32 %v1310_v39, %v1222_v38  ;;  %v1399_v10 = vpop.f32.mrf.mxu3  ;;  %v1224_v37 = vpop.f32.mrf.mxu1 }
 0x12d   : > { %v1225_v36 = vadd.f32 %v1224_v37, %v1135_v11 }
 0x12e   : > { %v1400_v41 = vadd.f32 %v1399_v10, %v1311_v30  ;;  %1450 = vmatmul.bf16.vlgmr.msrb.gmra.mxu0 %v3100_v46 }
 0x12f   : > { %1539 = vmatmul.bf16.vlgmr.msrb.gmra.mxu1 %v3107_v51 }
 0x130   : > { %2023 = vst [vmem:[%s3390_s26 + $0xf0] sm:$0xff] %v1400_v41  ;;  %1628 = vmatmul.bf16.vlgmr.msrb.gmra.mxu2 %v3109_v52 }
 0x131   : > { %1717 = vmatmul.bf16.vlgmr.msrb.gmra.mxu3 %v3111_v53 }
 0x133   : > { %v1313_v7 = vpop.f32.mrf.mxu2  ;;  %v1137_v31 = vpop.f32.mrf.mxu0 }
 0x134   : > { %v1314_v5 = vadd.f32 %v1313_v7, %v1225_v36  ;;  %v1402_v16 = vpop.f32.mrf.mxu3  ;;  %v1226_v62 = vpop.f32.mrf.mxu1 }
 0x135   : > { %v1227_v18 = vadd.f32 %v1226_v62, %v1137_v31 }
 0x136   : > { %v1403_v9 = vadd.f32 %v1402_v16, %v1314_v5 }
 0x138   : > { %2025 = vst [vmem:[%s3390_s26 + $0x100] sm:$0xff] %v1403_v9 }
 0x13b   : > { %v1315_v19 = vpop.f32.mrf.mxu2  ;;  %v1140_v38 = vpop.f32.mrf.mxu0 }
 0x13c   : > { %v1316_v28 = vadd.f32 %v1315_v19, %v1227_v18  ;;  %v1404_v46 = vpop.f32.mrf.mxu3  ;;  %v1229_v39 = vpop.f32.mrf.mxu1 }
 0x13d   : > { %v1230_v52 = vadd.f32 %v1229_v39, %v1140_v38 }
 0x13e   : > { %v1405_v51 = vadd.f32 %v1404_v46, %v1316_v28  ;;  %1455 = vmatmul.bf16.gmra.mxu0 %v3149_v12 }
 0x13f   : > { %1544 = vmatmul.bf16.gmra.mxu1 %v3151_v13 }
 0x140   : > { %2027 = vst [vmem:[%s3390_s26 + $0x110] sm:$0xff] %v1405_v51  ;;  %1633 = vmatmul.bf16.gmra.mxu2 %v3153_v14 }
 0x141   : > { %1722 = vmatmul.bf16.gmra.mxu3 %v3155_v15 }
 0x143   : > { %v1318_v53 = vpop.f32.mrf.mxu2  ;;  %v1142_v11 = vpop.f32.mrf.mxu0 }
 0x144   : > { %v1319_v30 = vadd.f32 %v1318_v53, %v1230_v52  ;;  %v1407_v10 = vpop.f32.mrf.mxu3  ;;  %v1231_v37 = vpop.f32.mrf.mxu1 }
 0x145   : > { %v1232_v36 = vadd.f32 %v1231_v37, %v1142_v11 }
 0x146   : > { %v1408_v41 = vadd.f32 %v1407_v10, %v1319_v30 }
 0x148   : > { %2029 = vst [vmem:[%s3390_s26 + $0x120] sm:$0xff] %v1408_v41 }
 0x14b   : > { %v1320_v7 = vpop.f32.mrf.mxu2  ;;  %v1145_v16 = vpop.f32.mrf.mxu0 }
 0x14c   : > { %v1321_v5 = vadd.f32 %v1320_v7, %v1232_v36  ;;  %v1409_v12 = vpop.f32.mrf.mxu3  ;;  %v1234_v31 = vpop.f32.mrf.mxu1 }
 0x14d   : > { %v1235_v14 = vadd.f32 %v1234_v31, %v1145_v16 }
 0x14e   : > { %v1410_v13 = vadd.f32 %v1409_v12, %v1321_v5  ;;  %1460 = vmatmul.bf16.gmra.mxu0 %v3169_v24 }
 0x14f   : > { %1549 = vmatmul.bf16.gmra.mxu1 %v3171_v25 }
 0x150   : > { %2031 = vst [vmem:[%s3390_s26 + $0x130] sm:$0xff] %v1410_v13  ;;  %1638 = vmatmul.bf16.gmra.mxu2 %v3173_v26 }
 0x151   : > { %1727 = vmatmul.bf16.gmra.mxu3 %v3175_v27 }
 0x153   : > { %v1323_v15 = vpop.f32.mrf.mxu2  ;;  %v1147_v18 = vpop.f32.mrf.mxu0 }
 0x154   : > { %v1324_v62 = vadd.f32 %v1323_v15, %v1235_v14  ;;  %v1412_v9 = vpop.f32.mrf.mxu3  ;;  %v1236_v19 = vpop.f32.mrf.mxu1 }
 0x155   : > { %v1237_v46 = vadd.f32 %v1236_v19, %v1147_v18 }
 0x156   : > { %v1413_v28 = vadd.f32 %v1412_v9, %v1324_v62 }
 0x158   : > { %2033 = vst [vmem:[%s3390_s26 + $0x140] sm:$0xff] %v1413_v28 }
 0x15b   : > { %v1325_v38 = vpop.f32.mrf.mxu2  ;;  %v1150_v51 = vpop.f32.mrf.mxu0 }
 0x15c   : > { %v1326_v39 = vadd.f32 %v1325_v38, %v1237_v46  ;;  %v1414_v24 = vpop.f32.mrf.mxu3  ;;  %v1239_v52 = vpop.f32.mrf.mxu1 }
 0x15d   : > { %v1240_v26 = vadd.f32 %v1239_v52, %v1150_v51 }
 0x15e   : > { %v1415_v25 = vadd.f32 %v1414_v24, %v1326_v39  ;;  %1465 = vmatmul.bf16.gmra.mxu0 %v3213_v49 }
 0x15f   : > { %1554 = vmatmul.bf16.gmra.mxu1 %v3215_v50 }
 0x160   : > { %2035 = vst [vmem:[%s3390_s26 + $0x150] sm:$0xff] %v1415_v25  ;;  %1643 = vmatmul.bf16.gmra.mxu2 %v3217_v54 }
 0x161   : > { %1732 = vmatmul.bf16.gmra.mxu3 %v3219_v55 }
 0x163   : > { %v1328_v27 = vpop.f32.mrf.mxu2  ;;  %v1152_v10 = vpop.f32.mrf.mxu0 }
 0x164   : > { %v1329_v53 = vadd.f32 %v1328_v27, %v1240_v26  ;;  %v1417_v30 = vpop.f32.mrf.mxu3  ;;  %v1241_v11 = vpop.f32.mrf.mxu1 }
 0x165   : > { %v1242_v41 = vadd.f32 %v1241_v11, %v1152_v10 }
 0x166   : > { %v1418_v37 = vadd.f32 %v1417_v30, %v1329_v53 }
 0x168   : > { %2037 = vst [vmem:[%s3390_s26 + $0x160] sm:$0xff] %v1418_v37 }
 0x16b   : > { %v1330_v36 = vpop.f32.mrf.mxu2  ;;  %v1155_v5 = vpop.f32.mrf.mxu0 }
 0x16c   : > { %v1331_v7 = vadd.f32 %v1330_v36, %v1242_v41  ;;  %v1419_v49 = vpop.f32.mrf.mxu3  ;;  %v1244_v12 = vpop.f32.mrf.mxu1 }
 0x16d   : > { %v1245_v54 = vadd.f32 %v1244_v12, %v1155_v5 }
 0x16e   : > { %v1420_v50 = vadd.f32 %v1419_v49, %v1331_v7  ;;  %1470 = vmatmul.bf16.gmra.mxu0 %v3233_v0 }
 0x16f   : > { %1559 = vmatmul.bf16.gmra.mxu1 %v3235_v1 }
 0x170   : > { %2039 = vst [vmem:[%s3390_s26 + $0x170] sm:$0xff] %v1420_v50  ;;  %1648 = vmatmul.bf16.gmra.mxu2 %v3237_v2 }
 0x171   : > { %1737 = vmatmul.bf16.gmra.mxu3 %v3239_v3 }
 0x173   : > { %v1333_v55 = vpop.f32.mrf.mxu2  ;;  %v1157_v13 = vpop.f32.mrf.mxu0 }
 0x174   : > { %v1334_v16 = vadd.f32 %v1333_v55, %v1245_v54  ;;  %v1422_v31 = vpop.f32.mrf.mxu3  ;;  %v1246_v14 = vpop.f32.mrf.mxu1 }
 0x175   : > { %v1247_v62 = vadd.f32 %v1246_v14, %v1157_v13 }
 0x176   : > { %v1423_v15 = vadd.f32 %v1422_v31, %v1334_v16 }
 0x178   : > { %2041 = vst [vmem:[%s3390_s26 + $0x180] sm:$0xff] %v1423_v15 }
 0x17b   : > { %v1335_v9 = vpop.f32.mrf.mxu2  ;;  %v1160_v19 = vpop.f32.mrf.mxu0 }
 0x17c   : > { %v1336_v18 = vadd.f32 %v1335_v9, %v1247_v62  ;;  %v1424_v0 = vpop.f32.mrf.mxu3  ;;  %v1249_v28 = vpop.f32.mrf.mxu1 }
 0x17d   : > { %v1250_v2 = vadd.f32 %v1249_v28, %v1160_v19 }
 0x17e   : > { %v1425_v1 = vadd.f32 %v1424_v0, %v1336_v18  ;;  %1475 = vmatmul.bf16.gmra.mxu0 %v3277_v32 }
 0x17f   : > { %1564 = vmatmul.bf16.gmra.mxu1 %v3279_v33 }
 0x180   : > { %2043 = vst [vmem:[%s3390_s26 + $0x190] sm:$0xff] %v1425_v1  ;;  %1653 = vmatmul.bf16.gmra.mxu2 %v3281_v34 }
 0x181   : > { %1742 = vmatmul.bf16.gmra.mxu3 %v3283_v35 }
 0x183   : > { %v1338_v3 = vpop.f32.mrf.mxu2  ;;  %v1162_v39 = vpop.f32.mrf.mxu0 }
 0x184   : > { %v1339_v46 = vadd.f32 %v1338_v3, %v1250_v2  ;;  %v1427_v38 = vpop.f32.mrf.mxu3  ;;  %v1251_v24 = vpop.f32.mrf.mxu1 }
 0x185   : > { %v1252_v52 = vadd.f32 %v1251_v24, %v1162_v39 }
 0x186   : > { %v1428_v51 = vadd.f32 %v1427_v38, %v1339_v46 }
 0x188   : > { %2045 = vst [vmem:[%s3390_s26 + $0x1a0] sm:$0xff] %v1428_v51 }
 0x18b   : > { %v1340_v25 = vpop.f32.mrf.mxu2  ;;  %v1165_v27 = vpop.f32.mrf.mxu0 }
 0x18c   : > { %v1341_v26 = vadd.f32 %v1340_v25, %v1252_v52  ;;  %v1429_v32 = vpop.f32.mrf.mxu3  ;;  %v1254_v53 = vpop.f32.mrf.mxu1 }
 0x18d   : > { %v1255_v34 = vadd.f32 %v1254_v53, %v1165_v27 }
 0x18e   : > { %v1430_v33 = vadd.f32 %v1429_v32, %v1341_v26  ;;  %1480 = vmatmul.bf16.gmra.mxu0 %v3297_v44 }
 0x18f   : > { %1569 = vmatmul.bf16.gmra.mxu1 %v3299_v45 }
 0x190   : > { %2047 = vst [vmem:[%s3390_s26 + $0x1b0] sm:$0xff] %v1430_v33  ;;  %1658 = vmatmul.bf16.gmra.mxu2 %v3301_v47 }
 0x191   : > { %1747 = vmatmul.bf16.gmra.mxu3 %v3303_v48 }
 0x193   : > { %v1343_v35 = vpop.f32.mrf.mxu2  ;;  %v1167_v11 = vpop.f32.mrf.mxu0 }
 0x194   : > { %v1344_v30 = vadd.f32 %v1343_v35, %v1255_v34  ;;  %v1432_v10 = vpop.f32.mrf.mxu3  ;;  %v1256_v37 = vpop.f32.mrf.mxu1  ;;  %v3767_v35 = vld [vmem:[#allocation4_spill] sm:$0xff] }
 0x195   : > { %v1257_v36 = vadd.f32 %v1256_v37, %v1167_v11 }
 0x196   : > { %v1433_v41 = vadd.f32 %v1432_v10, %v1344_v30  ;;  %v3768_v30 = vld [vmem:[#allocation5_spill] sm:$0xff] }
 0x198   : > { %2049 = vst [vmem:[%s3390_s26 + $0x1c0] sm:$0xff] %v1433_v41 }
 0x19b   : > { %v1345_v7 = vpop.f32.mrf.mxu2  ;;  %v1170_v5 = vpop.f32.mrf.mxu0 }
 0x19c   : > { %v1346_v49 = vadd.f32 %v1345_v7, %v1257_v36  ;;  %v1434_v44 = vpop.f32.mrf.mxu3  ;;  %v1259_v12 = vpop.f32.mrf.mxu1 }
 0x19d   : > { %v1260_v47 = vadd.f32 %v1259_v12, %v1170_v5 }
 0x19e   : > { %v1435_v45 = vadd.f32 %v1434_v44, %v1346_v49  ;;  %1485 = vmatmul.bf16.gmra.mxu0 %v3341_v20 }
 0x19f   : > { %1574 = vmatmul.bf16.gmra.mxu1 %v3343_v21 }
 0x1a0   : > { %2051 = vst [vmem:[%s3390_s26 + $0x1d0] sm:$0xff] %v1435_v45  ;;  %1663 = vmatmul.bf16.gmra.mxu2 %v3345_v22 }
 0x1a1   : > { %1752 = vmatmul.bf16.gmra.mxu3 %v3347_v23 }
 0x1a3   : > { %v1348_v48 = vpop.f32.mrf.mxu2  ;;  %v1172_v55 = vpop.f32.mrf.mxu0 }
 0x1a4   : > { %v1349_v50 = vadd.f32 %v1348_v48, %v1260_v47  ;;  %v1437_v54 = vpop.f32.mrf.mxu3  ;;  %v1261_v16 = vpop.f32.mrf.mxu1  ;;  %v3769_v48 = vld [vmem:[#allocation6_spill] sm:$0xff] }
 0x1a5   : > { %v1262_v13 = vadd.f32 %v1261_v16, %v1172_v55  ;;  %v3771_v55 = vld [vmem:[#allocation8_spill] sm:$0xff]  ;;  %v3772_v16 = vld [vmem:[#allocation9_spill] sm:$0xff] }
 0x1a6   : > { %v1438_v31 = vadd.f32 %v1437_v54, %v1349_v50  ;;  %v3770_v54 = vld [vmem:[#allocation7_spill] sm:$0xff] }
 0x1a8   : > { %2053 = vst [vmem:[%s3390_s26 + $0x1e0] sm:$0xff] %v1438_v31 }
 0x1ab   : > { %v1350_v14 = vpop.f32.mrf.mxu2  ;;  %v1451_v62 = vpop.f32.mrf.mxu0 }
 0x1ac   : > { %v1351_v15 = vadd.f32 %v1350_v14, %v1262_v13  ;;  %v1439_v20 = vpop.f32.mrf.mxu3  ;;  %v1540_v9 = vpop.f32.mrf.mxu1 }
 0x1ad   : > { %v1541_v22 = vadd.f32 %v1540_v9, %v1451_v62 }
 0x1ae   : > { %v1440_v21 = vadd.f32 %v1439_v20, %v1351_v15  ;;  %1490 = vmatmul.bf16.gmra.mxu0 %v3361_v40 }
 0x1af   : > { %1579 = vmatmul.bf16.gmra.mxu1 %v3363_v42 }
 0x1b0   : > { %2055 = vst [vmem:[%s3390_s26 + $0x1f0] sm:$0xff] %v1440_v21  ;;  %1668 = vmatmul.bf16.gmra.mxu2 %v3365_v43 }
 0x1b1   : > { %1757 = vmatmul.bf16.gmra.mxu3 %v3367_v57 }
 0x1b3   : > { %v1629_v23 = vpop.f32.mrf.mxu2  ;;  %v1453_v19 = vpop.f32.mrf.mxu0 }
 0x1b4   : > { %v1630_v18 = vadd.f32 %v1629_v23, %v1541_v22  ;;  %v1718_v0 = vpop.f32.mrf.mxu3  ;;  %v1542_v28 = vpop.f32.mrf.mxu1 }
 0x1b5   : > { %v1543_v2 = vadd.f32 %v1542_v28, %v1453_v19  ;;  %v3773_v28 = vld [vmem:[#allocation10_spill] sm:$0xff] }
 0x1b6   : > { %v1719_v1 = vadd.f32 %v1718_v0, %v1630_v18 }
 0x1b8   : > { %1994 = vst [vmem:[%s3390_s26 + $0x8] sm:$0xff] %v1719_v1 }
 0x1bb   : > { %v1631_v3 = vpop.f32.mrf.mxu2  ;;  %v1456_v38 = vpop.f32.mrf.mxu0 }
 0x1bc   : > { %v1632_v46 = vadd.f32 %v1631_v3, %v1543_v2  ;;  %v1720_v40 = vpop.f32.mrf.mxu3  ;;  %v1545_v39 = vpop.f32.mrf.mxu1  ;;  %v3774_v2 = vld [vmem:[#allocation11_spill] sm:$0xff]  ;;  %v3775_v3 = vld [vmem:[#allocation12_spill] sm:$0xff] }
 0x1bd   : > { %v1546_v43 = vadd.f32 %v1545_v39, %v1456_v38 }
 0x1be   : > { %v1721_v42 = vadd.f32 %v1720_v40, %v1632_v46  ;;  %1495 = vmatmul.bf16.gmra.mxu0 %v3413_v59  ;;  %v3776_v46 = vld [vmem:[#allocation13_spill] sm:$0xff] }
 0x1bf   : > { %1584 = vmatmul.bf16.gmra.mxu1 %v3415_v63 }
 0x1c0   : > { %1996 = vst [vmem:[%s3390_s26 + $0x18] sm:$0xff] %v1721_v42  ;;  %1673 = vmatmul.bf16.gmra.mxu2 %v3417_v4 }
 0x1c1   : > { %1762 = vmatmul.bf16.gmra.mxu3 %v3419_v6  ;;  %v3766_v6 = vld [vmem:[#allocation3_spill] sm:$0xff] }
 0x1c3   : > { %v1634_v57 = vpop.f32.mrf.mxu2  ;;  %v1458_v52 = vpop.f32.mrf.mxu0 }
 0x1c4   : > { %v1635_v24 = vadd.f32 %v1634_v57, %v1546_v43  ;;  %v1723_v51 = vpop.f32.mrf.mxu3  ;;  %v1547_v25 = vpop.f32.mrf.mxu1 }
 0x1c5   : > { %v1548_v32 = vadd.f32 %v1547_v25, %v1458_v52 }
 0x1c6   : > { %v1724_v26 = vadd.f32 %v1723_v51, %v1635_v24 }
 0x1c8   : > { %1998 = vst [vmem:[%s3390_s26 + $0x28] sm:$0xff] %v1724_v26 }
 0x1cb   : > { %v1636_v27 = vpop.f32.mrf.mxu2  ;;  %v1461_v33 = vpop.f32.mrf.mxu0 }
 0x1cc   : > { %v1637_v53 = vadd.f32 %v1636_v27, %v1548_v32  ;;  %v1725_v59 = vpop.f32.mrf.mxu3  ;;  %v1550_v34 = vpop.f32.mrf.mxu1 }
 0x1cd   : > { %v1551_v4 = vadd.f32 %v1550_v34, %v1461_v33  ;;  %v3778_v33 = vld [vmem:[#allocation15_spill] sm:$0xff] }
 0x1ce   : > { %v1726_v63 = vadd.f32 %v1725_v59, %v1637_v53  ;;  %1500 = vmatmul.bf16.gmra.mxu0 %v3435_v56  ;;  %v3777_v59 = vld [vmem:[#allocation14_spill] sm:$0xff] }
 0x1cf   : > { %1589 = vmatmul.bf16.gmra.mxu1 %v3766_v6 }
 0x1d0   : > { %2000 = vst [vmem:[%s3390_s26 + $0x38] sm:$0xff] %v1726_v63  ;;  %1678 = vmatmul.bf16.gmra.mxu2 %v3767_v35 }
 0x1d1   : > { %1767 = vmatmul.bf16.gmra.mxu3 %v3768_v30 }
 0x1d3   : > { %v1639_v10 = vpop.f32.mrf.mxu2  ;;  %v1463_v41 = vpop.f32.mrf.mxu0 }
 0x1d4   : > { %v1640_v11 = vadd.f32 %v1639_v10, %v1551_v4  ;;  %v1728_v37 = vpop.f32.mrf.mxu3  ;;  %v1552_v36 = vpop.f32.mrf.mxu1 }
 0x1d5   : > { %v1553_v49 = vadd.f32 %v1552_v36, %v1463_v41 }
 0x1d6   : > { %v1729_v7 = vadd.f32 %v1728_v37, %v1640_v11 }
 0x1d8   : > { %2002 = vst [vmem:[%s3390_s26 + $0x48] sm:$0xff] %v1729_v7  ;;  %v3779_v7 = vld [vmem:[#allocation16_spill] sm:$0xff] }
 0x1db   : > { %v1641_v44 = vpop.f32.mrf.mxu2  ;;  %v1466_v12 = vpop.f32.mrf.mxu0 }
 0x1dc   : > { %v1642_v5 = vadd.f32 %v1641_v44, %v1553_v49  ;;  %v1730_v56 = vpop.f32.mrf.mxu3  ;;  %v1555_v45 = vpop.f32.mrf.mxu1  ;;  %v3780_v44 = vld [vmem:[#allocation17_spill] sm:$0xff] }
 0x1dd   : > { %v1556_v50 = vadd.f32 %v1555_v45, %v1466_v12 }
 0x1de   : > { %v1731_v47 = vadd.f32 %v1730_v56, %v1642_v5  ;;  %1505 = vmatmul.bf16.gmra.mxu0 %v3769_v48  ;;  %v3781_v5 = vld [vmem:[#allocation18_spill] sm:$0xff]  ;;  %v3782_v56 = vld [vmem:[#allocation19_spill] sm:$0xff] }
 0x1df   : > { %1594 = vmatmul.bf16.gmra.mxu1 %v3770_v54 }
 0x1e0   : > { %2004 = vst [vmem:[%s3390_s26 + $0x58] sm:$0xff] %v1731_v47  ;;  %1683 = vmatmul.bf16.gmra.mxu2 %v3771_v55 }
 0x1e1   : > { %1772 = vmatmul.bf16.gmra.mxu3 %v3772_v16 }
 0x1e3   : > { %v1644_v31 = vpop.f32.mrf.mxu2  ;;  %v1468_v15 = vpop.f32.mrf.mxu0 }
 0x1e4   : > { %v1645_v13 = vadd.f32 %v1644_v31, %v1556_v50  ;;  %v1733_v14 = vpop.f32.mrf.mxu3  ;;  %v1557_v20 = vpop.f32.mrf.mxu1 }
 0x1e5   : > { %v1558_v9 = vadd.f32 %v1557_v20, %v1468_v15 }
 0x1e6   : > { %v1734_v62 = vadd.f32 %v1733_v14, %v1645_v13 }
 0x1e8   : > { %2006 = vst [vmem:[%s3390_s26 + $0x68] sm:$0xff] %v1734_v62 }
 0x1eb   : > { %v1646_v21 = vpop.f32.mrf.mxu2  ;;  %v1471_v18 = vpop.f32.mrf.mxu0 }
 0x1ec   : > { %v1647_v22 = vadd.f32 %v1646_v21, %v1558_v9  ;;  %v1735_v23 = vpop.f32.mrf.mxu3  ;;  %v1560_v0 = vpop.f32.mrf.mxu1 }
 0x1ed   : > { %v1561_v1 = vadd.f32 %v1560_v0, %v1471_v18 }
 0x1ee   : > { %v1736_v19 = vadd.f32 %v1735_v23, %v1647_v22  ;;  %1510 = vmatmul.bf16.gmra.mxu0 %v3773_v28 }
 0x1ef   : > { %1599 = vmatmul.bf16.gmra.mxu1 %v3774_v2 }
 0x1f0   : > { %2008 = vst [vmem:[%s3390_s26 + $0x78] sm:$0xff] %v1736_v19  ;;  %1688 = vmatmul.bf16.gmra.mxu2 %v3775_v3 }
 0x1f1   : > { %1777 = vmatmul.bf16.gmra.mxu3 %v3776_v46 }
 0x1f3   : > { %v1649_v40 = vpop.f32.mrf.mxu2  ;;  %v1473_v42 = vpop.f32.mrf.mxu0 }
 0x1f4   : > { %v1650_v38 = vadd.f32 %v1649_v40, %v1561_v1  ;;  %v1738_v39 = vpop.f32.mrf.mxu3  ;;  %v1562_v43 = vpop.f32.mrf.mxu1 }
 0x1f5   : > { %v1563_v24 = vadd.f32 %v1562_v43, %v1473_v42 }
 0x1f6   : > { %v1739_v57 = vadd.f32 %v1738_v39, %v1650_v38 }
 0x1f8   : > { %2010 = vst [vmem:[%s3390_s26 + $0x88] sm:$0xff] %v1739_v57 }
 0x1fb   : > { %v1651_v51 = vpop.f32.mrf.mxu2  ;;  %v1476_v26 = vpop.f32.mrf.mxu0 }
 0x1fc   : > { %v1652_v52 = vadd.f32 %v1651_v51, %v1563_v24  ;;  %v1740_v25 = vpop.f32.mrf.mxu3  ;;  %v1565_v32 = vpop.f32.mrf.mxu1 }
 0x1fd   : > { %v1566_v53 = vadd.f32 %v1565_v32, %v1476_v26 }
 0x1fe   : > { %v1741_v27 = vadd.f32 %v1740_v25, %v1652_v52  ;;  %1515 = vmatmul.bf16.gmra.mxu0 %v3549_v58 }
 0x1ff   : > { %1604 = vmatmul.bf16.gmra.mxu1 %v3551_v8 }
 0x200   : > { %2012 = vst [vmem:[%s3390_s26 + $0x98] sm:$0xff] %v1741_v27  ;;  %1693 = vmatmul.bf16.gmra.mxu2 %v3777_v59 }
 0x201   : > { %1782 = vmatmul.bf16.gmra.mxu3 %v3778_v33 }
 0x203   : > { %v1654_v34 = vpop.f32.mrf.mxu2  ;;  %v1478_v6 = vpop.f32.mrf.mxu0 }
 0x204   : > { %v1655_v63 = vadd.f32 %v1654_v34, %v1566_v53  ;;  %v1743_v4 = vpop.f32.mrf.mxu3  ;;  %v1567_v35 = vpop.f32.mrf.mxu1 }
 0x205   : > { %v1568_v10 = vadd.f32 %v1567_v35, %v1478_v6 }
 0x206   : > { %v1744_v30 = vadd.f32 %v1743_v4, %v1655_v63 }
 0x208   : > { %2014 = vst [vmem:[%s3390_s26 + $0xa8] sm:$0xff] %v1744_v30 }
 0x20b   : > { %v1656_v11 = vpop.f32.mrf.mxu2  ;;  %v1481_v41 = vpop.f32.mrf.mxu0 }
 0x20c   : > { %v1657_v37 = vadd.f32 %v1656_v11, %v1568_v10  ;;  %v1745_v58 = vpop.f32.mrf.mxu3  ;;  %v1570_v36 = vpop.f32.mrf.mxu1 }
 0x20d   : > { %v1571_v49 = vadd.f32 %v1570_v36, %v1481_v41 }
 0x20e   : > { %v1746_v8 = vadd.f32 %v1745_v58, %v1657_v37  ;;  %1520 = vmatmul.bf16.gmra.mxu0 %v3779_v7 }
 0x20f   : > { %1609 = vmatmul.bf16.gmra.mxu1 %v3780_v44 }
 0x210   : > { %2016 = vst [vmem:[%s3390_s26 + $0xb8] sm:$0xff] %v1746_v8  ;;  %1698 = vmatmul.bf16.gmra.mxu2 %v3781_v5 }
 0x211   : > { %1787 = vmatmul.bf16.gmra.mxu3 %v3782_v56 }
 0x213   : > { %v1659_v12 = vpop.f32.mrf.mxu2  ;;  %v1483_v48 = vpop.f32.mrf.mxu0 }
 0x214   : > { %v1660_v45 = vadd.f32 %v1659_v12, %v1571_v49  ;;  %v1748_v47 = vpop.f32.mrf.mxu3  ;;  %v1572_v50 = vpop.f32.mrf.mxu1 }
 0x215   : > { %v1573_v55 = vadd.f32 %v1572_v50, %v1483_v48 }
 0x216   : > { %v1749_v54 = vadd.f32 %v1748_v47, %v1660_v45 }
 0x218   : > { %2018 = vst [vmem:[%s3390_s26 + $0xc8] sm:$0xff] %v1749_v54 }
 0x21b   : > { %v1661_v16 = vpop.f32.mrf.mxu2  ;;  %v1486_v14 = vpop.f32.mrf.mxu0 }
 0x21c   : > { %v1662_v31 = vadd.f32 %v1661_v16, %v1573_v55  ;;  %v1750_v13 = vpop.f32.mrf.mxu3  ;;  %v1575_v15 = vpop.f32.mrf.mxu1 }
 0x21d   : > { %v1576_v62 = vadd.f32 %v1575_v15, %v1486_v14 }
 0x21e   : > { %v1751_v20 = vadd.f32 %v1750_v13, %v1662_v31  ;;  %1525 = vmatmul.bf16.gmra.mxu0 %v3593_v60 }
 0x21f   : > { %1614 = vmatmul.bf16.gmra.mxu1 %v3595_v29 }
 0x220   : > { %2020 = vst [vmem:[%s3390_s26 + $0xd8] sm:$0xff] %v1751_v20  ;;  %1703 = vmatmul.bf16.gmra.mxu2 %v3597_v61 }
 0x221   : > { %1792 = vmatmul.bf16.gmra.mxu3 %v3599_v17 }
 0x223   : > { %v1664_v9 = vpop.f32.mrf.mxu2  ;;  %v1488_v23 = vpop.f32.mrf.mxu0 }
 0x224   : > { %v1665_v21 = vadd.f32 %v1664_v9, %v1576_v62  ;;  %v1753_v22 = vpop.f32.mrf.mxu3  ;;  %v1577_v18 = vpop.f32.mrf.mxu1 }
 0x225   : > { %v1578_v19 = vadd.f32 %v1577_v18, %v1488_v23 }
 0x226   : > { %v1754_v0 = vadd.f32 %v1753_v22, %v1665_v21 }
 0x228   : > { %2022 = vst [vmem:[%s3390_s26 + $0xe8] sm:$0xff] %v1754_v0 }
 0x22b   : > { %v1666_v28 = vpop.f32.mrf.mxu2  ;;  %v1491_v2 = vpop.f32.mrf.mxu0 }
 0x22c   : > { %v1667_v60 = vadd.f32 %v1666_v28, %v1578_v19  ;;  %v1755_v1 = vpop.f32.mrf.mxu3  ;;  %v1580_v3 = vpop.f32.mrf.mxu1 }
 0x22d   : > { %v1581_v61 = vadd.f32 %v1580_v3, %v1491_v2 }
 0x22e   : > { %v1756_v29 = vadd.f32 %v1755_v1, %v1667_v60 }
 0x230   : > { %2024 = vst [vmem:[%s3390_s26 + $0xf8] sm:$0xff] %v1756_v29 }
 0x233   : > { %v1669_v46 = vpop.f32.mrf.mxu2  ;;  %v1493_v38 = vpop.f32.mrf.mxu0 }
 0x234   : > { %v1670_v17 = vadd.f32 %v1669_v46, %v1581_v61  ;;  %v1758_v40 = vpop.f32.mrf.mxu3  ;;  %v1582_v39 = vpop.f32.mrf.mxu1 }
 0x235   : > { %v1583_v43 = vadd.f32 %v1582_v39, %v1493_v38 }
 0x236   : > { %v1759_v42 = vadd.f32 %v1758_v40, %v1670_v17 }
 0x238   : > { %2026 = vst [vmem:[%s3390_s26 + $0x108] sm:$0xff] %v1759_v42 }
 0x23b   : > { %v1671_v57 = vpop.f32.mrf.mxu2  ;;  %v1496_v52 = vpop.f32.mrf.mxu0 }
 0x23c   : > { %v1672_v24 = vadd.f32 %v1671_v57, %v1583_v43  ;;  %v1760_v51 = vpop.f32.mrf.mxu3  ;;  %v1585_v25 = vpop.f32.mrf.mxu1 }
 0x23d   : > { %v1586_v32 = vadd.f32 %v1585_v25, %v1496_v52 }
 0x23e   : > { %v1761_v26 = vadd.f32 %v1760_v51, %v1672_v24 }
 0x240   : > { %2028 = vst [vmem:[%s3390_s26 + $0x118] sm:$0xff] %v1761_v26 }
 0x243   : > { %v1674_v27 = vpop.f32.mrf.mxu2  ;;  %v1498_v33 = vpop.f32.mrf.mxu0 }
 0x244   : > { %v1675_v53 = vadd.f32 %v1674_v27, %v1586_v32  ;;  %v1763_v59 = vpop.f32.mrf.mxu3  ;;  %v1587_v34 = vpop.f32.mrf.mxu1 }
 0x245   : > { %v1588_v4 = vadd.f32 %v1587_v34, %v1498_v33 }
 0x246   : > { %v1764_v63 = vadd.f32 %v1763_v59, %v1675_v53 }
 0x248   : > { %2030 = vst [vmem:[%s3390_s26 + $0x128] sm:$0xff] %v1764_v63 }
 0x24b   : > { %v1676_v6 = vpop.f32.mrf.mxu2  ;;  %v1501_v10 = vpop.f32.mrf.mxu0 }
 0x24c   : > { %v1677_v35 = vadd.f32 %v1676_v6, %v1588_v4  ;;  %v1765_v30 = vpop.f32.mrf.mxu3  ;;  %v1590_v11 = vpop.f32.mrf.mxu1 }
 0x24d   : > { %v1591_v58 = vadd.f32 %v1590_v11, %v1501_v10 }
 0x24e   : > { %v1766_v37 = vadd.f32 %v1765_v30, %v1677_v35 }
 0x250   : > { %2032 = vst [vmem:[%s3390_s26 + $0x138] sm:$0xff] %v1766_v37 }
 0x253   : > { %v1679_v41 = vpop.f32.mrf.mxu2  ;;  %v1503_v7 = vpop.f32.mrf.mxu0 }
 0x254   : > { %v1680_v36 = vadd.f32 %v1679_v41, %v1591_v58  ;;  %v1768_v8 = vpop.f32.mrf.mxu3  ;;  %v1592_v49 = vpop.f32.mrf.mxu1 }
 0x255   : > { %v1593_v5 = vadd.f32 %v1592_v49, %v1503_v7 }
 0x256   : > { %v1769_v44 = vadd.f32 %v1768_v8, %v1680_v36 }
 0x258   : > { %2034 = vst [vmem:[%s3390_s26 + $0x148] sm:$0xff] %v1769_v44 }
 0x25b   : > { %v1681_v56 = vpop.f32.mrf.mxu2  ;;  %v1506_v47 = vpop.f32.mrf.mxu0 }
 0x25c   : > { %v1682_v12 = vadd.f32 %v1681_v56, %v1593_v5  ;;  %v1770_v45 = vpop.f32.mrf.mxu3  ;;  %v1595_v48 = vpop.f32.mrf.mxu1 }
 0x25d   : > { %v1596_v54 = vadd.f32 %v1595_v48, %v1506_v47 }
 0x25e   : > { %v1771_v50 = vadd.f32 %v1770_v45, %v1682_v12 }
 0x260   : > { %2036 = vst [vmem:[%s3390_s26 + $0x158] sm:$0xff] %v1771_v50 }
 0x263   : > { %v1684_v55 = vpop.f32.mrf.mxu2  ;;  %v1508_v13 = vpop.f32.mrf.mxu0 }
 0x264   : > { %v1685_v16 = vadd.f32 %v1684_v55, %v1596_v54  ;;  %v1773_v31 = vpop.f32.mrf.mxu3  ;;  %v1597_v14 = vpop.f32.mrf.mxu1 }
 0x265   : > { %v1598_v20 = vadd.f32 %v1597_v14, %v1508_v13 }
 0x266   : > { %v1774_v15 = vadd.f32 %v1773_v31, %v1685_v16 }
 0x268   : > { %2038 = vst [vmem:[%s3390_s26 + $0x168] sm:$0xff] %v1774_v15 }
 0x26b   : > { %v1686_v62 = vpop.f32.mrf.mxu2  ;;  %v1511_v22 = vpop.f32.mrf.mxu0 }
 0x26c   : > { %v1687_v9 = vadd.f32 %v1686_v62, %v1598_v20  ;;  %v1775_v21 = vpop.f32.mrf.mxu3  ;;  %v1600_v23 = vpop.f32.mrf.mxu1 }
 0x26d   : > { %v1601_v0 = vadd.f32 %v1600_v23, %v1511_v22 }
 0x26e   : > { %v1776_v18 = vadd.f32 %v1775_v21, %v1687_v9 }
 0x270   : > { %2040 = vst [vmem:[%s3390_s26 + $0x178] sm:$0xff] %v1776_v18 }
 0x273   : > { %v1689_v19 = vpop.f32.mrf.mxu2  ;;  %v1513_v1 = vpop.f32.mrf.mxu0 }
 0x274   : > { %v1690_v28 = vadd.f32 %v1689_v19, %v1601_v0  ;;  %v1778_v60 = vpop.f32.mrf.mxu3  ;;  %v1602_v2 = vpop.f32.mrf.mxu1 }
 0x275   : > { %v1603_v29 = vadd.f32 %v1602_v2, %v1513_v1 }
 0x276   : > { %v1779_v3 = vadd.f32 %v1778_v60, %v1690_v28 }
 0x278   : > { %2042 = vst [vmem:[%s3390_s26 + $0x188] sm:$0xff] %v1779_v3 }
 0x27b   : > { %v1691_v61 = vpop.f32.mrf.mxu2  ;;  %v1516_v40 = vpop.f32.mrf.mxu0 }
 0x27c   : > { %v1692_v46 = vadd.f32 %v1691_v61, %v1603_v29  ;;  %v1780_v17 = vpop.f32.mrf.mxu3  ;;  %v1605_v38 = vpop.f32.mrf.mxu1 }
 0x27d   : > { %v1606_v42 = vadd.f32 %v1605_v38, %v1516_v40 }
 0x27e   : > { %v1781_v39 = vadd.f32 %v1780_v17, %v1692_v46 }
 0x280   : > { %2044 = vst [vmem:[%s3390_s26 + $0x198] sm:$0xff] %v1781_v39 }
 0x283   : > { %v1694_v43 = vpop.f32.mrf.mxu2  ;;  %v1518_v51 = vpop.f32.mrf.mxu0 }
 0x284   : > { %v1695_v57 = vadd.f32 %v1694_v43, %v1606_v42  ;;  %v1783_v24 = vpop.f32.mrf.mxu3  ;;  %v1607_v52 = vpop.f32.mrf.mxu1 }
 0x285   : > { %v1608_v26 = vadd.f32 %v1607_v52, %v1518_v51 }
 0x286   : > { %v1784_v25 = vadd.f32 %v1783_v24, %v1695_v57 }
 0x288   : > { %2046 = vst [vmem:[%s3390_s26 + $0x1a8] sm:$0xff] %v1784_v25 }
 0x28b   : > { %v1696_v32 = vpop.f32.mrf.mxu2  ;;  %v1521_v59 = vpop.f32.mrf.mxu0 }
 0x28c   : > { %v1697_v27 = vadd.f32 %v1696_v32, %v1608_v26  ;;  %v1785_v53 = vpop.f32.mrf.mxu3  ;;  %v1610_v33 = vpop.f32.mrf.mxu1 }
 0x28d   : > { %v1611_v63 = vadd.f32 %v1610_v33, %v1521_v59 }
 0x28e   : > { %v1786_v34 = vadd.f32 %v1785_v53, %v1697_v27 }
 0x290   : > { %2048 = vst [vmem:[%s3390_s26 + $0x1b8] sm:$0xff] %v1786_v34 }
 0x293   : > { %v1699_v4 = vpop.f32.mrf.mxu2  ;;  %v1523_v30 = vpop.f32.mrf.mxu0 }
 0x294   : > { %v1700_v6 = vadd.f32 %v1699_v4, %v1611_v63  ;;  %v1788_v35 = vpop.f32.mrf.mxu3  ;;  %v1612_v10 = vpop.f32.mrf.mxu1 }
 0x295   : > { %v1613_v37 = vadd.f32 %v1612_v10, %v1523_v30 }
 0x296   : > { %v1789_v11 = vadd.f32 %v1788_v35, %v1700_v6 }
 0x298   : > { %2050 = vst [vmem:[%s3390_s26 + $0x1c8] sm:$0xff] %v1789_v11 }
 0x29b   : > { %v1701_v58 = vpop.f32.mrf.mxu2  ;;  %v1526_v8 = vpop.f32.mrf.mxu0 }
 0x29c   : > { %v1702_v41 = vadd.f32 %v1701_v58, %v1613_v37  ;;  %v1790_v36 = vpop.f32.mrf.mxu3  ;;  %v1615_v7 = vpop.f32.mrf.mxu1 }
 0x29d   : > { %v1616_v44 = vadd.f32 %v1615_v7, %v1526_v8 }
 0x29e   : > { %v1791_v49 = vadd.f32 %v1790_v36, %v1702_v41 }
 0x2a0   : > { %2052 = vst [vmem:[%s3390_s26 + $0x1d8] sm:$0xff] %v1791_v49 }
 0x2a3   : > { %v1704_v5 = vpop.f32.mrf.mxu2  ;;  %v1528_v47 = vpop.f32.mrf.mxu0 }
 0x2a4   : > { %v1705_v56 = vadd.f32 %v1704_v5, %v1616_v44  ;;  %v1793_v12 = vpop.f32.mrf.mxu3  ;;  %v1617_v48 = vpop.f32.mrf.mxu1 }
 0x2a5   : > { %v1618_v50 = vadd.f32 %v1617_v48, %v1528_v47 }
 0x2a6   : > { %v1794_v45 = vadd.f32 %v1793_v12, %v1705_v56 }
 0x2a8   : > { %2054 = vst [vmem:[%s3390_s26 + $0x1e8] sm:$0xff] %v1794_v45 }
 0x2ab   : > { %v1706_v54 = vpop.f32.mrf.mxu2 }
 0x2ac   : > { %v1707_v55 = vadd.f32 %v1706_v54, %v1618_v50  ;;  %v1795_v16 = vpop.f32.mrf.mxu3 }
 0x2ae   : > { %v1796_v31 = vadd.f32 %v1795_v16, %v1707_v55 }
 0x2b0   : > { %2056 = vst [vmem:[%s3390_s26 + $0x1f8] sm:$0xff] %v1796_v31 }
 0x2b1 PF: > { %s12_s11 = sadd.s32 1, %s2833_s11   ;;  %s3783_s9 = smov %s2829_s10 }
 0x2b2   : > { %p9_p5 = scmp.ge.s32.totalorder %s12_s11, 4   ;;  %s3784_s10 = smov %s3786_s12 }
 0x2b4   :  { %11 = sbr.rel (!%p9_p5) target bundleno = 2 (0x2), region = 67 }

</bundles_post_ra>
